<compile_context>
chip_gen: v7x
topology: tpu7x:2x2x1
jax: 0.10.0
libtpu: 0.0.40
codegen_flags: <defaults>
</compile_context>

<pallas_src>
import jax
import jax.numpy as jnp
from jax.experimental import pallas as pl
from jax.experimental.pallas import tpu as pltpu

LANE = 128
ROW_TILE = 256          # row tile per grid step (256-512 recommended)


def _ceil_to(x, m):
    return ((x + m - 1) // m) * m


# ----------------------------------------------------------------------------
# Fused 4-layer encoder kernel.  One grid step = one row tile; all weights,
# scales and biases are VMEM-resident (constant index_map across the grid).
# ----------------------------------------------------------------------------
def _encoder_kernel(x_ref,
                    w1_ref, s1_ref, b1_ref,
                    w2_ref, s2_ref, b2_ref,
                    w3_ref, s3_ref, b3_ref,
                    w4_ref, s4_ref, b4_ref,
                    o_ref):
    def layer(h_bf16, w_ref, s_ref, b_ref, relu):
        # int8 weights are exactly representable in bf16 (|q| <= 127).  The
        # per-output-channel scale commutes out of the contraction, so it is
        # applied to the small (TM, N) f32 accumulator, not the (K, N) tile.
        acc = jnp.dot(h_bf16, w_ref[...].astype(jnp.bfloat16),
                      preferred_element_type=jnp.float32)
        y = acc * s_ref[...] + b_ref[...]          # (1, N) broadcast over rows
        if relu:
            y = jnp.maximum(y, 0.0)
        return y

    h = layer(x_ref[...], w1_ref, s1_ref, b1_ref, True)   # x already bf16
    h = layer(h.astype(jnp.bfloat16), w2_ref, s2_ref, b2_ref, True)
    h = layer(h.astype(jnp.bfloat16), w3_ref, s3_ref, b3_ref, True)
    h = layer(h.astype(jnp.bfloat16), w4_ref, s4_ref, b4_ref, False)
    o_ref[...] = h.astype(o_ref.dtype)


def _forward_impl(x, params, out_dim):
    """padded/jit-friendly forward: pad -> fused, row-tiled pallas_call -> slice."""
    w1, s1, b1, w2, s2, b2, w3, s3, b3, w4, s4, b4 = params
    M, Din = x.shape
    Din_p, H1 = w1.shape
    H2 = w2.shape[1]
    H3 = w3.shape[1]
    Dout_p = w4.shape[1]

    # Pad rows to the bf16 sublane tile (16) and to a multiple of the row
    # tile so the grid divides evenly; cast once to bf16 (MXU LHS dtype).
    Mp = max(_ceil_to(M, 16), 16)
    tm = min(ROW_TILE, Mp)
    Mp = _ceil_to(Mp, tm)
    xp = jnp.pad(x.astype(jnp.float32),
                 ((0, Mp - M), (0, Din_p - Din))).astype(jnp.bfloat16)

    flops = 2 * Mp * (Din_p * H1 + H1 * H2 + H2 * H3 + H3 * Dout_p)
    bytes_accessed = (
        xp.size * 2                                       # bf16 activations in
        + sum(w.size for w in (w1, w2, w3, w4))           # int8 weights
        + sum(a.size * 4 for a in (s1, b1, s2, b2, s3, b3, s4, b4))
        + Mp * Dout_p * 4                                 # f32 output
    )

    pin = lambda i: (0, 0)   # weights/scales/biases: fetched once, then
                             # VMEM-resident across all row tiles.

    out = pl.pallas_call(
        _encoder_kernel,
        out_shape=jax.ShapeDtypeStruct((Mp, Dout_p), jnp.float32),
        grid=(Mp // tm,),
        in_specs=[
            pl.BlockSpec((tm, Din_p), lambda i: (i, 0)),
            pl.BlockSpec((Din_p, H1), pin),
            pl.BlockSpec((1, H1), pin),
            pl.BlockSpec((1, H1), pin),
            pl.BlockSpec((H1, H2), pin),
            pl.BlockSpec((1, H2), pin),
            pl.BlockSpec((1, H2), pin),
            pl.BlockSpec((H2, H3), pin),
            pl.BlockSpec((1, H3), pin),
            pl.BlockSpec((1, H3), pin),
            pl.BlockSpec((H3, Dout_p), pin),
            pl.BlockSpec((1, Dout_p), pin),
            pl.BlockSpec((1, Dout_p), pin),
        ],
        out_specs=pl.BlockSpec((tm, Dout_p), lambda i: (i, 0)),
        compiler_params=pltpu.CompilerParams(
            dimension_semantics=("parallel",),        # v7x: split tiles over 2 TCs
            vmem_limit_bytes=32 * 1024 * 1024,
        ),
        cost_estimate=pl.CostEstimate(
            flops=flops, transcendentals=0, bytes_accessed=bytes_accessed),
    )(xp, *params)

    # Lane-dense (128-wide) output in HBM; slice to the logical width here,
    # inside the same jitted graph.
    return out[:M, :out_dim]


# One jitted forward for the whole encoder (single pallas dispatch inside).
encoder_forward = jax.jit(_forward_impl, static_argnums=2)


# ----------------------------------------------------------------------------
# Parameter construction (mirrors nn.Linear default init), then per-output-
# channel symmetric int8 weight quantization, zero-padded to 128-lane multiples.
# ----------------------------------------------------------------------------
def init_encoder(key, input_dim, feature_dim):
    dims = [input_dim, 500, 500, 2000, feature_dim]
    keys = jax.random.split(key, len(dims) - 1)
    packed = []
    reference = []
    for i, k in enumerate(keys):
        din, dout = dims[i], dims[i + 1]
        kw, kb = jax.random.split(k)
        bound = 1.0 / (din ** 0.5)
        w = jax.random.uniform(kw, (din, dout), jnp.float32, -bound, bound)
        b = jax.random.uniform(kb, (dout,), jnp.float32, -bound, bound)

        # Weight-only int8 quantization, per output channel.
        amax = jnp.max(jnp.abs(w), axis=0)
        scale = jnp.where(amax > 0, amax / 127.0, 1.0)
        w_q = jnp.clip(jnp.round(w / scale), -127, 127).astype(jnp.int8)

        din_p, dout_p = _ceil_to(din, LANE), _ceil_to(dout, LANE)
        wp = jnp.zeros((din_p, dout_p), jnp.int8).at[:din, :dout].set(w_q)
        # Padded channels keep scale=1 / bias=0 / weights=0 -> stay exactly 0.
        sp = jnp.ones((1, dout_p), jnp.float32).at[0, :dout].set(scale)
        bp = jnp.zeros((1, dout_p), jnp.float32).at[0, :dout].set(b)

        packed.extend([wp, sp, bp])
        # Reference uses the dequantized weights so the comparison isolates
        # kernel numerics (bf16 LHS rounding) from the quantization choice.
        reference.append((w_q.astype(jnp.float32) * scale[None, :], b))
    return tuple(packed), reference


def reference_forward(x, ref_params):
    h = x.astype(jnp.float32)
    n = len(ref_params)
    for i, (w, b) in enumerate(ref_params):
        h = h @ w + b
        if i < n - 1:
            h = jnp.maximum(h, 0.0)
    return h


# ----------------------------------------------------------------------------
# Main
# ----------------------------------------------------------------------------
if __name__ == "__main__":
    input_dim = 64
    feature_dim = 32

    root = jax.random.PRNGKey(0)
    k_params, k_x1, k_x2 = jax.random.split(root, 3)

    packed_params, ref_params = init_encoder(k_params, input_dim, feature_dim)

    ok = True
    # batch=8: single row tile (small-shape sanity check).
    # batch=300: pads to 512 rows -> 2 row tiles, exercises the batched grid.
    for k_x, batch in ((k_x1, 8), (k_x2, 300)):
        x = jax.random.normal(k_x, (batch, input_dim), jnp.float32)
        y = jax.block_until_ready(encoder_forward(x, packed_params, feature_dim))
        y_ref = reference_forward(x, ref_params)
        assert y.shape == (batch, feature_dim)
        assert bool(jnp.all(jnp.isfinite(y)))
        err = float(jnp.max(jnp.abs(y - y_ref)))
        ok &= bool(jnp.allclose(y, y_ref, rtol=5e-2, atol=5e-2))
        assert ok, f"batch={batch} max abs err={err}"

    print("KERNEL_OK")
</pallas_src>

<mosaic_0001>
module attributes {stable_mosaic.version = 11 : i64} {
  func.func @_encoder_kernel(%arg0: i32, %arg1: memref<16x128xbf16, #tpu.memory_space<vmem>>, %arg2: memref<128x512xi8, #tpu.memory_space<vmem>>, %arg3: memref<1x512xf32, #tpu.memory_space<vmem>>, %arg4: memref<1x512xf32, #tpu.memory_space<vmem>>, %arg5: memref<512x512xi8, #tpu.memory_space<vmem>>, %arg6: memref<1x512xf32, #tpu.memory_space<vmem>>, %arg7: memref<1x512xf32, #tpu.memory_space<vmem>>, %arg8: memref<512x2048xi8, #tpu.memory_space<vmem>>, %arg9: memref<1x2048xf32, #tpu.memory_space<vmem>>, %arg10: memref<1x2048xf32, #tpu.memory_space<vmem>>, %arg11: memref<2048x128xi8, #tpu.memory_space<vmem>>, %arg12: memref<1x128xf32, #tpu.memory_space<vmem>>, %arg13: memref<1x128xf32, #tpu.memory_space<vmem>>, %arg14: memref<16x128xf32, #tpu.memory_space<vmem>>) attributes {dimension_semantics = [#tpu.dimension_semantics<parallel>], iteration_bounds = array<i64: 1>, scalar_prefetch = 0 : i64, scratch_operands = 0 : i64, tpu.core_type = #tpu.core_type<tc>, window_params = [{transform_indices = @transform_0, window_bounds = array<i64: 16, 128>}, {pipeline_mode = #tpu.pipeline_mode<synchronous>, transform_indices = @transform_1, window_bounds = array<i64: 128, 512>}, {pipeline_mode = #tpu.pipeline_mode<synchronous>, transform_indices = @transform_2, window_bounds = array<i64: 1, 512>}, {pipeline_mode = #tpu.pipeline_mode<synchronous>, transform_indices = @transform_3, window_bounds = array<i64: 1, 512>}, {pipeline_mode = #tpu.pipeline_mode<synchronous>, transform_indices = @transform_4, window_bounds = array<i64: 512, 512>}, {pipeline_mode = #tpu.pipeline_mode<synchronous>, transform_indices = @transform_5, window_bounds = array<i64: 1, 512>}, {pipeline_mode = #tpu.pipeline_mode<synchronous>, transform_indices = @transform_6, window_bounds = array<i64: 1, 512>}, {pipeline_mode = #tpu.pipeline_mode<synchronous>, transform_indices = @transform_7, window_bounds = array<i64: 512, 2048>}, {pipeline_mode = #tpu.pipeline_mode<synchronous>, transform_indices = @transform_8, window_bounds = array<i64: 1, 2048>}, {pipeline_mode = #tpu.pipeline_mode<synchronous>, transform_indices = @transform_9, window_bounds = array<i64: 1, 2048>}, {pipeline_mode = #tpu.pipeline_mode<synchronous>, transform_indices = @transform_10, window_bounds = array<i64: 2048, 128>}, {pipeline_mode = #tpu.pipeline_mode<synchronous>, transform_indices = @transform_11, window_bounds = array<i64: 1, 128>}, {pipeline_mode = #tpu.pipeline_mode<synchronous>, transform_indices = @transform_12, window_bounds = array<i64: 1, 128>}, {transform_indices = @transform_13, window_bounds = array<i64: 16, 128>}]} {
    %c0 = arith.constant 0 : index
    %c0_0 = arith.constant 0 : index
    %0 = vector.load %arg1[%c0, %c0_0] : memref<16x128xbf16, #tpu.memory_space<vmem>>, vector<16x128xbf16>
    %c0_1 = arith.constant 0 : index
    %c0_2 = arith.constant 0 : index
    %1 = vector.load %arg2[%c0_1, %c0_2] : memref<128x512xi8, #tpu.memory_space<vmem>>, vector<128x512xi8>
    %2 = arith.sitofp %1 : vector<128x512xi8> to vector<128x512xbf16>
    %cst = arith.constant dense<0.000000e+00> : vector<16x512xf32>
    %3 = tpu.matmul %0, %2, %cst {dimension_numbers = #tpu.dot_dimension_numbers<[1], [0], [0], [1], [0, 0, 1, 1], [], []>} : vector<16x128xbf16>, vector<128x512xbf16>, vector<16x512xf32> -> vector<16x512xf32>
    %c0_3 = arith.constant 0 : index
    %c0_4 = arith.constant 0 : index
    %4 = vector.load %arg3[%c0_3, %c0_4] : memref<1x512xf32, #tpu.memory_space<vmem>>, vector<1x512xf32>
    %5 = vector.broadcast %4 : vector<1x512xf32> to vector<16x512xf32>
    %6 = arith.mulf %3, %5 : vector<16x512xf32>
    %c0_5 = arith.constant 0 : index
    %c0_6 = arith.constant 0 : index
    %7 = vector.load %arg4[%c0_5, %c0_6] : memref<1x512xf32, #tpu.memory_space<vmem>>, vector<1x512xf32>
    %8 = vector.broadcast %7 : vector<1x512xf32> to vector<16x512xf32>
    %9 = arith.addf %6, %8 : vector<16x512xf32>
    %cst_7 = arith.constant 0.000000e+00 : f32
    %10 = vector.broadcast %cst_7 : f32 to vector<16x512xf32>
    %11 = arith.maximumf %9, %10 : vector<16x512xf32>
    %12 = arith.truncf %11 : vector<16x512xf32> to vector<16x512xbf16>
    %c0_8 = arith.constant 0 : index
    %c0_9 = arith.constant 0 : index
    %13 = vector.load %arg5[%c0_8, %c0_9] : memref<512x512xi8, #tpu.memory_space<vmem>>, vector<512x512xi8>
    %14 = arith.sitofp %13 : vector<512x512xi8> to vector<512x512xbf16>
    %cst_10 = arith.constant dense<0.000000e+00> : vector<16x512xf32>
    %15 = tpu.matmul %12, %14, %cst_10 {dimension_numbers = #tpu.dot_dimension_numbers<[1], [0], [0], [1], [0, 0, 1, 1], [], []>} : vector<16x512xbf16>, vector<512x512xbf16>, vector<16x512xf32> -> vector<16x512xf32>
    %c0_11 = arith.constant 0 : index
    %c0_12 = arith.constant 0 : index
    %16 = vector.load %arg6[%c0_11, %c0_12] : memref<1x512xf32, #tpu.memory_space<vmem>>, vector<1x512xf32>
    %17 = vector.broadcast %16 : vector<1x512xf32> to vector<16x512xf32>
    %18 = arith.mulf %15, %17 : vector<16x512xf32>
    %c0_13 = arith.constant 0 : index
    %c0_14 = arith.constant 0 : index
    %19 = vector.load %arg7[%c0_13, %c0_14] : memref<1x512xf32, #tpu.memory_space<vmem>>, vector<1x512xf32>
    %20 = vector.broadcast %19 : vector<1x512xf32> to vector<16x512xf32>
    %21 = arith.addf %18, %20 : vector<16x512xf32>
    %cst_15 = arith.constant 0.000000e+00 : f32
    %22 = vector.broadcast %cst_15 : f32 to vector<16x512xf32>
    %23 = arith.maximumf %21, %22 : vector<16x512xf32>
    %24 = arith.truncf %23 : vector<16x512xf32> to vector<16x512xbf16>
    %c0_16 = arith.constant 0 : index
    %c0_17 = arith.constant 0 : index
    %25 = vector.load %arg8[%c0_16, %c0_17] : memref<512x2048xi8, #tpu.memory_space<vmem>>, vector<512x2048xi8>
    %26 = arith.sitofp %25 : vector<512x2048xi8> to vector<512x2048xbf16>
    %cst_18 = arith.constant dense<0.000000e+00> : vector<16x2048xf32>
    %27 = tpu.matmul %24, %26, %cst_18 {dimension_numbers = #tpu.dot_dimension_numbers<[1], [0], [0], [1], [0, 0, 1, 1], [], []>} : vector<16x512xbf16>, vector<512x2048xbf16>, vector<16x2048xf32> -> vector<16x2048xf32>
    %c0_19 = arith.constant 0 : index
    %c0_20 = arith.constant 0 : index
    %28 = vector.load %arg9[%c0_19, %c0_20] : memref<1x2048xf32, #tpu.memory_space<vmem>>, vector<1x2048xf32>
    %29 = vector.broadcast %28 : vector<1x2048xf32> to vector<16x2048xf32>
    %30 = arith.mulf %27, %29 : vector<16x2048xf32>
    %c0_21 = arith.constant 0 : index
    %c0_22 = arith.constant 0 : index
    %31 = vector.load %arg10[%c0_21, %c0_22] : memref<1x2048xf32, #tpu.memory_space<vmem>>, vector<1x2048xf32>
    %32 = vector.broadcast %31 : vector<1x2048xf32> to vector<16x2048xf32>
    %33 = arith.addf %30, %32 : vector<16x2048xf32>
    %cst_23 = arith.constant 0.000000e+00 : f32
    %34 = vector.broadcast %cst_23 : f32 to vector<16x2048xf32>
    %35 = arith.maximumf %33, %34 : vector<16x2048xf32>
    %36 = arith.truncf %35 : vector<16x2048xf32> to vector<16x2048xbf16>
    %c0_24 = arith.constant 0 : index
    %c0_25 = arith.constant 0 : index
    %37 = vector.load %arg11[%c0_24, %c0_25] : memref<2048x128xi8, #tpu.memory_space<vmem>>, vector<2048x128xi8>
    %38 = arith.sitofp %37 : vector<2048x128xi8> to vector<2048x128xbf16>
    %cst_26 = arith.constant dense<0.000000e+00> : vector<16x128xf32>
    %39 = tpu.matmul %36, %38, %cst_26 {dimension_numbers = #tpu.dot_dimension_numbers<[1], [0], [0], [1], [0, 0, 1, 1], [], []>} : vector<16x2048xbf16>, vector<2048x128xbf16>, vector<16x128xf32> -> vector<16x128xf32>
    %c0_27 = arith.constant 0 : index
    %c0_28 = arith.constant 0 : index
    %40 = vector.load %arg12[%c0_27, %c0_28] : memref<1x128xf32, #tpu.memory_space<vmem>>, vector<1x128xf32>
    %41 = vector.broadcast %40 : vector<1x128xf32> to vector<16x128xf32>
    %42 = arith.mulf %39, %41 : vector<16x128xf32>
    %c0_29 = arith.constant 0 : index
    %c0_30 = arith.constant 0 : index
    %43 = vector.load %arg13[%c0_29, %c0_30] : memref<1x128xf32, #tpu.memory_space<vmem>>, vector<1x128xf32>
    %44 = vector.broadcast %43 : vector<1x128xf32> to vector<16x128xf32>
    %45 = arith.addf %42, %44 : vector<16x128xf32>
    %c0_31 = arith.constant 0 : index
    %c0_32 = arith.constant 0 : index
    %46 = vector.load %arg14[%c0_31, %c0_32] : memref<16x128xf32, #tpu.memory_space<vmem>>, vector<16x128xf32>
    tpu.vector_store %arg14[%c0_31, %c0_32], %45 {strides = array<i32>} : memref<16x128xf32, #tpu.memory_space<vmem>>, vector<16x128xf32>,
    return
  }
  func.func @transform_0(%arg0: i32) -> (i32, i32) {
    %c0_i32 = arith.constant 0 : i32
    %c0_i32_0 = arith.constant 0 : i32
    return %arg0, %c0_i32 : i32, i32
  }
  func.func @transform_1(%arg0: i32) -> (i32, i32) {
    %c0_i32 = arith.constant 0 : i32
    %c0_i32_0 = arith.constant 0 : i32
    %c0_i32_1 = arith.constant 0 : i32
    return %c0_i32, %c0_i32_0 : i32, i32
  }
  func.func @transform_2(%arg0: i32) -> (i32, i32) {
    %c0_i32 = arith.constant 0 : i32
    %c0_i32_0 = arith.constant 0 : i32
    %c0_i32_1 = arith.constant 0 : i32
    return %c0_i32, %c0_i32_0 : i32, i32
  }
  func.func @transform_3(%arg0: i32) -> (i32, i32) {
    %c0_i32 = arith.constant 0 : i32
    %c0_i32_0 = arith.constant 0 : i32
    %c0_i32_1 = arith.constant 0 : i32
    return %c0_i32, %c0_i32_0 : i32, i32
  }
  func.func @transform_4(%arg0: i32) -> (i32, i32) {
    %c0_i32 = arith.constant 0 : i32
    %c0_i32_0 = arith.constant 0 : i32
    %c0_i32_1 = arith.constant 0 : i32
    return %c0_i32, %c0_i32_0 : i32, i32
  }
  func.func @transform_5(%arg0: i32) -> (i32, i32) {
    %c0_i32 = arith.constant 0 : i32
    %c0_i32_0 = arith.constant 0 : i32
    %c0_i32_1 = arith.constant 0 : i32
    return %c0_i32, %c0_i32_0 : i32, i32
  }
  func.func @transform_6(%arg0: i32) -> (i32, i32) {
    %c0_i32 = arith.constant 0 : i32
    %c0_i32_0 = arith.constant 0 : i32
    %c0_i32_1 = arith.constant 0 : i32
    return %c0_i32, %c0_i32_0 : i32, i32
  }
  func.func @transform_7(%arg0: i32) -> (i32, i32) {
    %c0_i32 = arith.constant 0 : i32
    %c0_i32_0 = arith.constant 0 : i32
    %c0_i32_1 = arith.constant 0 : i32
    return %c0_i32, %c0_i32_0 : i32, i32
  }
  func.func @transform_8(%arg0: i32) -> (i32, i32) {
    %c0_i32 = arith.constant 0 : i32
    %c0_i32_0 = arith.constant 0 : i32
    %c0_i32_1 = arith.constant 0 : i32
    return %c0_i32, %c0_i32_0 : i32, i32
  }
  func.func @transform_9(%arg0: i32) -> (i32, i32) {
    %c0_i32 = arith.constant 0 : i32
    %c0_i32_0 = arith.constant 0 : i32
    %c0_i32_1 = arith.constant 0 : i32
    return %c0_i32, %c0_i32_0 : i32, i32
  }
  func.func @transform_10(%arg0: i32) -> (i32, i32) {
    %c0_i32 = arith.constant 0 : i32
    %c0_i32_0 = arith.constant 0 : i32
    %c0_i32_1 = arith.constant 0 : i32
    return %c0_i32, %c0_i32_0 : i32, i32
  }
  func.func @transform_11(%arg0: i32) -> (i32, i32) {
    %c0_i32 = arith.constant 0 : i32
    %c0_i32_0 = arith.constant 0 : i32
    %c0_i32_1 = arith.constant 0 : i32
    return %c0_i32, %c0_i32_0 : i32, i32
  }
  func.func @transform_12(%arg0: i32) -> (i32, i32) {
    %c0_i32 = arith.constant 0 : i32
    %c0_i32_0 = arith.constant 0 : i32
    %c0_i32_1 = arith.constant 0 : i32
    return %c0_i32, %c0_i32_0 : i32, i32
  }
  func.func @transform_13(%arg0: i32) -> (i32, i32) {
    %c0_i32 = arith.constant 0 : i32
    %c0_i32_0 = arith.constant 0 : i32
    return %arg0, %c0_i32 : i32, i32
  }
}

</mosaic_0001>

<bundles_post_ra>
// kernel: _forward_impl.1
= control target key start
LH: loop header
LB: loop body
LE: loop exit
PB: predicated region body
PF: predicated region fallthrough
CT: control target
= control target key end

     0   :  { %18 = vsyncpa [#allocation3], 0  ;;  %s3804_s0 = inlined_call_operand.vmem [shape: bf16[16,128], index: 0, kind: input, shape index: {}]   ;;  %s3805_s1 = inlined_call_operand.hbm [shape: s8[128,512], index: 1, kind: input, shape index: {}]   ;;  %s3806_s2 = inlined_call_operand.hbm [shape: f32[1,512], index: 2, kind: input, shape index: {}]   ;;  %s3807_s3 = inlined_call_operand.vmem [shape: f32[1,512], index: 3, kind: input, shape index: {}]   ;;  %s3808_s4 = inlined_call_operand.hbm [shape: s8[512,512], index: 4, kind: input, shape index: {}]   ;;  %s3809_s5 = inlined_call_operand.vmem [shape: f32[1,512], index: 5, kind: input, shape index: {}]   ;;  %s3810_s6 = inlined_call_operand.vmem [shape: f32[1,512], index: 6, kind: input, shape index: {}]   ;;  %s3811_s7 = inlined_call_operand.hbm [shape: s8[512,2048], index: 7, kind: input, shape index: {}]   ;;  %s3812_s8 = inlined_call_operand.vmem [shape: f32[1,2048], index: 8, kind: input, shape index: {}]   ;;  %s3813_s9 = inlined_call_operand.vmem [shape: f32[1,2048], index: 9, kind: input, shape index: {}]   ;;  %s3814_s10 = inlined_call_operand.hbm [shape: s8[2048,128], index: 10, kind: input, shape index: {}]   ;;  %s3815_s11 = inlined_call_operand.vmem [shape: f32[1,128], index: 11, kind: input, shape index: {}]   ;;  %s3816_s12 = inlined_call_operand.vmem [shape: f32[1,128], index: 12, kind: input, shape index: {}]   ;;  %s3817_s13 = inlined_call_operand.vmem [shape: f32[16,128], index: 13, kind: output, shape index: {}]  }
   0x1   :  { %19 = vsyncpa [#allocation5], 0 }
   0x2   :  { %20 = vsyncpa [#allocation8], 0  ;;  %s3391_s25 = smov [#allocation4]   ;;  %s3392_s27 = smov [#allocation7]  }
   0x3   :  { %s41_s26 = sshll.u32 %s3391_s25, 4  ;;  %s68_s28 = sshll.u32 %s3392_s27, 4  ;;  %s42_s26 = int_to_ptr.vmem [resolvable:$true] %s41_s26  ;;  %s3472_s28 = int_to_ptr.vmem [resolvable:$true] %s68_s28 }
   0x4   :  { %s3275_s14 = scalar_lea.hbm %s3806_s2, 64 }
   0x5   :  { %p3276_p0 = scmp.ne.s32.totalorder %s3806_s2, %s3275_s14  ;;  %p3279_p1 = scmp.lt.u32.totalorder %s3275_s14, %s3806_s2 }
   0x7   :  { %p3281_p2 = pnand %p3279_p1, %p3276_p0 }
   0x9   :  { %3284 = shalt.err (!%p3281_p2)
}
   0xa   :  { %s3285_s19 = scalar_lea.vmem %s42_s26, 64  ;;  %p3290_p4 = scmp.lt.s32.totalorder %s42_s26, %s42_s26 }
   0xb   :  { %p3286_p3 = scmp.ne.s32.totalorder %s42_s26, %s3285_s19  ;;  %p3291_p5 = scmp.lt.s32.totalorder %s3285_s19, %s3285_s19 }
   0xd   :  { %p3292_p6 = por %p3291_p5, %p3290_p4 }
   0xf   :  { %p3293_p7 = pnand %p3292_p6, %p3286_p3 }
  0x11   :  { %3296 = shalt.err (!%p3293_p7)
}
  0x12   :  { %44 = dma.hbm_to_vmem [thread:$0]  %s3806_s2, 64, %s42_s26, [#allocation5]  }
  0x13   :  { %s3297_s24 = scalar_lea.hbm %s3811_s7, 32768 }
  0x14   :  { %p3298_p8 = scmp.ne.s32.totalorder %s3811_s7, %s3297_s24  ;;  %p3301_p9 = scmp.lt.u32.totalorder %s3297_s24, %s3811_s7 }
  0x16   :  { %p3303_p10 = pnand %p3301_p9, %p3298_p8 }
  0x18   :  { %3306 = shalt.err (!%p3303_p10)
}
  0x19   :  { %s3307_s14 = scalar_lea.vmem %s3472_s28, 32768  ;;  %p3312_p12 = scmp.lt.s32.totalorder %s3472_s28, %s3472_s28 }
  0x1a   :  { %p3308_p11 = scmp.ne.s32.totalorder %s3472_s28, %s3307_s14  ;;  %p3313_p13 = scmp.lt.s32.totalorder %s3307_s14, %s3307_s14 }
  0x1c   :  { %p3314_p0 = por %p3313_p13, %p3312_p12 }
  0x1e   :  { %p3315_p1 = pnand %p3314_p0, %p3308_p11 }
  0x20   :  { %3318 = shalt.err (!%p3315_p1)
}
  0x21   :  { %s3393_s2 = smov 2048   ;;  %s3394_s26 = smov 128  }
  0x22   :  { %74 = dma.hbm_to_vmem [thread:$0]  %s3811_s7, 32768, %s3472_s28, [#allocation8], %s3393_s2, %s3393_s2, %s3394_s26  }
  0x23   :  { %s3395_s17 = smov [#allocation2]   ;;  %s3319_s21 = scalar_lea.hbm %s3805_s1, 2048 }
  0x24   :  { %s28_s18 = sshll.u32 %s3395_s17, 4  ;;  %p3320_p2 = scmp.ne.s32.totalorder %s3805_s1, %s3319_s21  ;;  %s29_s18 = int_to_ptr.vmem [resolvable:$true] %s28_s18 }
  0x25   :  { %p3323_p3 = scmp.lt.u32.totalorder %s3319_s21, %s3805_s1 }
  0x27   :  { %p3325_p4 = pnand %p3323_p3, %p3320_p2 }
  0x29   :  { %3328 = shalt.err (!%p3325_p4)
}
  0x2a   :  { %s3329_s27 = scalar_lea.vmem %s29_s18, 2048  ;;  %p3334_p6 = scmp.lt.s32.totalorder %s29_s18, %s29_s18 }
  0x2b   :  { %p3330_p5 = scmp.ne.s32.totalorder %s29_s18, %s3329_s27  ;;  %p3335_p7 = scmp.lt.s32.totalorder %s3329_s27, %s3329_s27 }
  0x2d   :  { %p3336_p8 = por %p3335_p7, %p3334_p6 }
  0x2f   :  { %p3337_p9 = pnand %p3336_p8, %p3330_p5 }
  0x31   :  { %3340 = shalt.err (!%p3337_p9)
}
  0x32   :  { %s3396_s7 = smov 512   ;;  %s3397_s28 = smov 32  }
  0x33   :  { %34 = dma.hbm_to_vmem [thread:$0]  %s3805_s1, 2048, %s29_s18, [#allocation3], %s3396_s7, %s3396_s7, %s3397_s28  }
  0x34   :  { %s3398_s14 = smov [#allocation6]   ;;  %s3399_s15 = smov [#allocation9]  }
  0x35   :  { %s52_s2 = sshll.u32 %s3398_s14, 4  ;;  %s84_s16 = sshll.u32 %s3399_s15, 4  ;;  %s53_s2 = int_to_ptr.vmem [resolvable:$true] %s52_s2  ;;  %s85_s16 = int_to_ptr.vmem [resolvable:$true] %s84_s16 }
  0x36   :  { %s3341_s20 = scalar_lea.hbm %s3808_s4, 8192 }
  0x37   :  { %p3342_p10 = scmp.ne.s32.totalorder %s3808_s4, %s3341_s20  ;;  %p3345_p11 = scmp.lt.u32.totalorder %s3341_s20, %s3808_s4 }
  0x39   :  { %p3347_p12 = pnand %p3345_p11, %p3342_p10 }
  0x3b   :  { %3350 = shalt.err (!%p3347_p12)
}
  0x3c   :  { %s3351_s1 = scalar_lea.vmem %s53_s2, 8192  ;;  %p3356_p0 = scmp.lt.s32.totalorder %s53_s2, %s53_s2 }
  0x3d   :  { %p3352_p13 = scmp.ne.s32.totalorder %s53_s2, %s3351_s1  ;;  %p3357_p1 = scmp.lt.s32.totalorder %s3351_s1, %s3351_s1 }
  0x3f   :  { %p3358_p2 = por %p3357_p1, %p3356_p0 }
  0x41   :  { %p3359_p3 = pnand %p3358_p2, %p3352_p13 }
  0x43   :  { %3362 = shalt.err (!%p3359_p3)
}
  0x44   :  { %58 = dma.hbm_to_vmem [thread:$0]  %s3808_s4, 8192, %s53_s2, [#allocation5], %s3396_s7, %s3396_s7, %s3397_s28  }
  0x45   :  { %s3363_s30 = scalar_lea.hbm %s3814_s10, 8192 }
  0x46   :  { %p3364_p4 = scmp.ne.s32.totalorder %s3814_s10, %s3363_s30  ;;  %p3367_p5 = scmp.lt.u32.totalorder %s3363_s30, %s3814_s10 }
  0x48   :  { %p3369_p6 = pnand %p3367_p5, %p3364_p4 }
  0x4a   :  { %3372 = shalt.err (!%p3369_p6)
}
  0x4b   :  { %s3373_s20 = scalar_lea.vmem %s85_s16, 8192  ;;  %p3378_p8 = scmp.lt.s32.totalorder %s85_s16, %s85_s16 }
  0x4c   :  { %p3374_p7 = scmp.ne.s32.totalorder %s85_s16, %s3373_s20  ;;  %p3379_p9 = scmp.lt.s32.totalorder %s3373_s20, %s3373_s20 }
  0x4e   :  { %p3380_p10 = por %p3379_p9, %p3378_p8 }
  0x50   :  { %p3381_p11 = pnand %p3380_p10, %p3374_p7 }
  0x52   :  { %3384 = shalt.err (!%p3381_p11)
}
  0x53   :  { %s3400_s4 = smov 8  }
  0x54   :  { %90 = dma.hbm_to_vmem [thread:$0]  %s3814_s10, 8192, %s85_s16, [#allocation8], %s3394_s26, %s3394_s26, %s3400_s4  }
  0x55   :  { %3385 = dma.done.wait [#allocation3], 2048  }
  0x56   :  { %3386 = vsyncadd [#allocation3], 4294965248 }
  0x57   :  { %3387 = dma.done.wait [#allocation5], 8256  }
  0x58   :  { %3388 = vsyncadd [#allocation5], 4294959040 }
  0x59   :  { %3389 = dma.done.wait [#allocation8], 40960  }
  0x5a   :  { %3390 = vsyncadd [#allocation8], 4294926336  ;;  %v3401_v0 = vmov 0   ;;  %v114_v1 = vld [vmem:[#allocation2 + $0x8] sm:$0xff]  ;;  %v113_v2 = vld [vmem:[#allocation2] sm:$0xff] }
  0x5b   :  { %199 = vmatprep.mubr.bf16.mxu0 %v3401_v0  ;;  %242 = vmatprep.mubr.bf16.mxu1 %v3401_v0  ;;  %v130_v3 = vunpack.c.l.s8.bf16 %v114_v1  ;;  %v134_v4 = vunpack.c.h.s8.bf16 %v114_v1  ;;  %v129_v5 = vunpack.c.l.s8.bf16 %v113_v2  ;;  %v118_v6 = vld [vmem:[#allocation2 + $0x28] sm:$0xff]  ;;  %v116_v7 = vld [vmem:[#allocation2 + $0x18] sm:$0xff]  ;;  %v133_v8 = vunpack.c.h.s8.bf16 %v113_v2  ;;  %v115_v9 = vld [vmem:[#allocation2 + $0x10] sm:$0xff] }
  0x5c   :  { %v138_v10 = vunpack.c.l.s8.bf16 %v118_v6  ;;  %v117_v11 = vld [vmem:[#allocation2 + $0x20] sm:$0xff]  ;;  %v132_v12 = vunpack.c.l.s8.bf16 %v116_v7  ;;  %v136_v13 = vunpack.c.h.s8.bf16 %v116_v7  ;;  %v131_v14 = vunpack.c.l.s8.bf16 %v115_v9  ;;  %v120_v15 = vld [vmem:[#allocation2 + $0x38] sm:$0xff]  ;;  %v119_v20 = vld [vmem:[#allocation2 + $0x30] sm:$0xff] }
  0x5d   :  { %167 = vmatprep.subr.bf16.mxu0 %v130_v3  ;;  %v137_v16 = vunpack.c.l.s8.bf16 %v117_v11  ;;  %v135_v17 = vunpack.c.h.s8.bf16 %v115_v9  ;;  %v142_v18 = vunpack.c.h.s8.bf16 %v118_v6  ;;  %v140_v19 = vunpack.c.l.s8.bf16 %v120_v15  ;;  %v122_v21 = vld [vmem:[#allocation2 + $0x48] sm:$0xff]  ;;  %v121_v25 = vld [vmem:[#allocation2 + $0x40] sm:$0xff]  ;;  %v124_v27 = vld [vmem:[#allocation2 + $0x58] sm:$0xff] }
  0x5e   :  { %168 = vmatpush1.bf16.msra.mxu0 %v129_v5  ;;  %210 = vmatprep.subr.bf16.mxu1 %v132_v12  ;;  %v141_v22 = vunpack.c.h.s8.bf16 %v117_v11  ;;  %v139_v23 = vunpack.c.l.s8.bf16 %v119_v20  ;;  %v146_v24 = vunpack.c.l.s8.bf16 %v122_v21  ;;  %v144_v26 = vunpack.c.h.s8.bf16 %v120_v15  ;;  %v123_v32 = vld [vmem:[#allocation2 + $0x50] sm:$0xff]  ;;  %v126_v33 = vld [vmem:[#allocation2 + $0x68] sm:$0xff]  ;;  %v125_v37 = vld [vmem:[#allocation2 + $0x60] sm:$0xff] }
  0x5f   :  { %169 = vmatprep.subr.bf16.mxu0 %v134_v4  ;;  %211 = vmatpush1.bf16.msra.mxu1 %v131_v14  ;;  %v145_v28 = vunpack.c.l.s8.bf16 %v121_v25  ;;  %v143_v29 = vunpack.c.h.s8.bf16 %v119_v20  ;;  %v150_v30 = vunpack.c.h.s8.bf16 %v122_v21  ;;  %v148_v31 = vunpack.c.l.s8.bf16 %v124_v27  ;;  %v128_v39 = vld [vmem:[#allocation2 + $0x78] sm:$0xff]  ;;  %v127_v44 = vld [vmem:[#allocation2 + $0x70] sm:$0xff]  ;;  %v325_v50 = vld [vmem:[#allocation6] sm:$0xff] }
  0x60   :  { %212 = vmatprep.subr.bf16.mxu1 %v136_v13  ;;  %v149_v34 = vunpack.c.h.s8.bf16 %v121_v25  ;;  %v147_v35 = vunpack.c.l.s8.bf16 %v123_v32  ;;  %v154_v36 = vunpack.c.l.s8.bf16 %v126_v33  ;;  %v152_v38 = vunpack.c.h.s8.bf16 %v124_v27  ;;  %v326_v45 = vld [vmem:[#allocation6 + $0x8] sm:$0xff]  ;;  %v328_v51 = vld [vmem:[#allocation6 + $0x18] sm:$0xff]  ;;  %v327_v56 = vld [vmem:[#allocation6 + $0x10] sm:$0xff] }
  0x61   :  { %v153_v40 = vunpack.c.l.s8.bf16 %v125_v37  ;;  %v151_v41 = vunpack.c.h.s8.bf16 %v123_v32  ;;  %v158_v42 = vunpack.c.h.s8.bf16 %v126_v33  ;;  %v156_v43 = vunpack.c.l.s8.bf16 %v128_v39  ;;  %v3274_v52 = vld [vmem:[%s3804_s0] sm:$0xff]   ;;  %v330_v58 = vld [vmem:[#allocation6 + $0x28] sm:$0xff]  ;;  %v331_v4 = vld [vmem:[#allocation6 + $0x30] sm:$0xff] }
  0x62   :  { %170 = vmatpush1.bf16.msra.mxu0 %v133_v8  ;;  %v157_v46 = vunpack.c.h.s8.bf16 %v125_v37  ;;  %v155_v47 = vunpack.c.l.s8.bf16 %v127_v44  ;;  %v160_v48 = vunpack.c.h.s8.bf16 %v128_v39  ;;  %v390_v49 = vunpack.c.l.s8.bf16 %v326_v45  ;;  %v329_v63 = vld [vmem:[#allocation6 + $0x20] sm:$0xff]  ;;  %v332_v0 = vld [vmem:[#allocation6 + $0x38] sm:$0xff]  ;;  %v334_v6 = vld [vmem:[#allocation6 + $0x48] sm:$0xff] }
  0x63   :  { %171 = vmatprep.subr.bf16.mxu0 %v138_v10  ;;  %213 = vmatpush1.bf16.msra.mxu1 %v135_v17  ;;  %v159_v53 = vunpack.c.h.s8.bf16 %v127_v44  ;;  %v389_v54 = vunpack.c.l.s8.bf16 %v325_v50  ;;  %v392_v55 = vunpack.c.l.s8.bf16 %v328_v51  ;;  %v394_v57 = vunpack.c.h.s8.bf16 %v326_v45  ;;  %v333_v11 = vld [vmem:[#allocation6 + $0x40] sm:$0xff]  ;;  %v336_v12 = vld [vmem:[#allocation6 + $0x58] sm:$0xff] }
  0x64   :  { %214 = vmatprep.subr.bf16.mxu1 %v140_v19  ;;  %v391_v59 = vunpack.c.l.s8.bf16 %v327_v56  ;;  %v393_v60 = vunpack.c.h.s8.bf16 %v325_v50  ;;  %v396_v61 = vunpack.c.h.s8.bf16 %v328_v51  ;;  %v398_v62 = vunpack.c.l.s8.bf16 %v330_v58 }
  0x65   :  { %v395_v1 = vunpack.c.h.s8.bf16 %v327_v56  ;;  %v397_v2 = vunpack.c.l.s8.bf16 %v329_v63  ;;  %v400_v3 = vunpack.c.l.s8.bf16 %v332_v0  ;;  %v402_v5 = vunpack.c.h.s8.bf16 %v330_v58 }
  0x66   :  { %172 = vmatpush1.bf16.msra.mxu0 %v137_v16  ;;  %v399_v7 = vunpack.c.l.s8.bf16 %v331_v4  ;;  %v401_v8 = vunpack.c.h.s8.bf16 %v329_v63  ;;  %v404_v9 = vunpack.c.h.s8.bf16 %v332_v0  ;;  %v406_v10 = vunpack.c.l.s8.bf16 %v334_v6  ;;  %v335_v16 = vld [vmem:[#allocation6 + $0x50] sm:$0xff] }
  0x67   :  { %173 = vmatprep.subr.bf16.mxu0 %v142_v18  ;;  %215 = vmatpush1.bf16.msra.mxu1 %v139_v23  ;;  %v403_v13 = vunpack.c.h.s8.bf16 %v331_v4  ;;  %v405_v14 = vunpack.c.l.s8.bf16 %v333_v11  ;;  %v408_v15 = vunpack.c.l.s8.bf16 %v336_v12  ;;  %v410_v17 = vunpack.c.h.s8.bf16 %v334_v6  ;;  %v338_v18 = vld [vmem:[#allocation6 + $0x68] sm:$0xff]  ;;  %v337_v23 = vld [vmem:[#allocation6 + $0x60] sm:$0xff]  ;;  %v351_v0 = vld [vmem:[#allocation6 + $0xd0] sm:$0xff] }
  0x68   :  { %216 = vmatprep.subr.bf16.mxu1 %v144_v26  ;;  %v407_v19 = vunpack.c.l.s8.bf16 %v335_v16  ;;  %v409_v20 = vunpack.c.h.s8.bf16 %v333_v11  ;;  %v412_v21 = vunpack.c.h.s8.bf16 %v336_v12  ;;  %v411_v25 = vunpack.c.h.s8.bf16 %v335_v16  ;;  %v354_v6 = vld [vmem:[#allocation6 + $0xe8] sm:$0xff]  ;;  %v355_v11 = vld [vmem:[#allocation6 + $0xf0] sm:$0xff] }
  0x69   :  { %v413_v26 = vunpack.c.l.s8.bf16 %v337_v23  ;;  %v417_v32 = vunpack.c.h.s8.bf16 %v337_v23 }
  0x6a   :  { %174 = vmatpush1.bf16.msra.mxu0 %v141_v22  ;;  %v414_v22 = vunpack.c.l.s8.bf16 %v338_v18 }
  0x6b   :  { %175 = vmatprep.subr.bf16.mxu0 %v146_v24  ;;  %217 = vmatpush1.bf16.msra.mxu1 %v143_v29  ;;  %v340_v24 = vld [vmem:[#allocation6 + $0x78] sm:$0xff]  ;;  %v418_v29 = vunpack.c.h.s8.bf16 %v338_v18  ;;  %v3545_v18 = vld [vmem:[#allocation6 + $0x108] sm:$0xff] }
  0x6c   :  { %218 = vmatprep.subr.bf16.mxu1 %v148_v31  ;;  %v416_v27 = vunpack.c.l.s8.bf16 %v340_v24  ;;  %v420_v33 = vunpack.c.h.s8.bf16 %v340_v24 }
  0x6e   :  { %176 = vmatpush1.bf16.msra.mxu0 %v145_v28  ;;  %v339_v28 = vld [vmem:[#allocation6 + $0x70] sm:$0xff] }
  0x6f   :  { %177 = vmatprep.subr.bf16.mxu0 %v150_v30  ;;  %219 = vmatpush1.bf16.msra.mxu1 %v147_v35  ;;  %v342_v30 = vld [vmem:[#allocation6 + $0x88] sm:$0xff]  ;;  %v415_v31 = vunpack.c.l.s8.bf16 %v339_v28  ;;  %v341_v35 = vld [vmem:[#allocation6 + $0x80] sm:$0xff]  ;;  %v419_v37 = vunpack.c.h.s8.bf16 %v339_v28 }
  0x70   :  { %220 = vmatprep.subr.bf16.mxu1 %v152_v38  ;;  %v421_v38 = vunpack.c.l.s8.bf16 %v341_v35  ;;  %v425_v44 = vunpack.c.h.s8.bf16 %v341_v35 }
  0x72   :  { %178 = vmatpush1.bf16.msra.mxu0 %v149_v34  ;;  %v422_v34 = vunpack.c.l.s8.bf16 %v342_v30 }
  0x73   :  { %179 = vmatprep.subr.bf16.mxu0 %v154_v36  ;;  %221 = vmatpush1.bf16.msra.mxu1 %v151_v41  ;;  %v344_v36 = vld [vmem:[#allocation6 + $0x98] sm:$0xff]  ;;  %v426_v41 = vunpack.c.h.s8.bf16 %v342_v30 }
  0x74   :  { %222 = vmatprep.subr.bf16.mxu1 %v156_v43  ;;  %v424_v39 = vunpack.c.l.s8.bf16 %v344_v36  ;;  %v428_v45 = vunpack.c.h.s8.bf16 %v344_v36 }
  0x76   :  { %180 = vmatpush1.bf16.msra.mxu0 %v153_v40  ;;  %v343_v40 = vld [vmem:[#allocation6 + $0x90] sm:$0xff] }
  0x77   :  { %181 = vmatprep.subr.bf16.mxu0 %v158_v42  ;;  %223 = vmatpush1.bf16.msra.mxu1 %v155_v47  ;;  %v346_v42 = vld [vmem:[#allocation6 + $0xa8] sm:$0xff]  ;;  %v423_v43 = vunpack.c.l.s8.bf16 %v343_v40  ;;  %v345_v47 = vld [vmem:[#allocation6 + $0xa0] sm:$0xff] }
  0x78   :  { %224 = vmatprep.subr.bf16.mxu1 %v160_v48  ;;  %v348_v48 = vld [vmem:[#allocation6 + $0xb8] sm:$0xff]  ;;  %v429_v50 = vunpack.c.l.s8.bf16 %v345_v47  ;;  %v433_v56 = vunpack.c.h.s8.bf16 %v345_v47 }
  0x79   :  { %v432_v51 = vunpack.c.l.s8.bf16 %v348_v48 }
  0x7a   :  { %182 = vmatpush1.bf16.msra.mxu0 %v157_v46  ;;  %v430_v46 = vunpack.c.l.s8.bf16 %v346_v42 }
  0x7b   :  { %517 = vmatprep.subr.bf16.mxu0 %v390_v49  ;;  %225 = vmatpush1.bf16.msra.mxu1 %v159_v53  ;;  %v427_v49 = vunpack.c.h.s8.bf16 %v343_v40  ;;  %v434_v53 = vunpack.c.h.s8.bf16 %v346_v42 }
  0x7c   :  { %603 = vmatprep.subr.bf16.mxu1 %v392_v55 }
  0x7d   :  { %200 = vmatmul.mubr.bf16.vlgmr.msra.gmra.mrb[0].mxu0 %v3274_v52 }
  0x7e   :  { %518 = vmatpush1.bf16.msra.mxu0 %v389_v54  ;;  %243 = vmatmul.mubr.bf16.vlgmr.msra.gmra.mrb[0].mxu1 %v3274_v52  ;;  %v347_v52 = vld [vmem:[#allocation6 + $0xb0] sm:$0xff]  ;;  %v350_v54 = vld [vmem:[#allocation6 + $0xc8] sm:$0xff] }
  0x7f   :  { %519 = vmatprep.subr.bf16.mxu0 %v394_v57  ;;  %604 = vmatpush1.bf16.msra.mxu1 %v391_v59  ;;  %v431_v55 = vunpack.c.l.s8.bf16 %v347_v52  ;;  %v436_v57 = vunpack.c.h.s8.bf16 %v348_v48  ;;  %v438_v58 = vunpack.c.l.s8.bf16 %v350_v54  ;;  %v349_v59 = vld [vmem:[#allocation6 + $0xc0] sm:$0xff] }
  0x80   :  { %605 = vmatprep.subr.bf16.mxu1 %v396_v61  ;;  %v435_v61 = vunpack.c.h.s8.bf16 %v347_v52  ;;  %v441_v4 = vunpack.c.h.s8.bf16 %v349_v59 }
  0x82   :  { %520 = vmatpush1.bf16.msra.mxu0 %v393_v60  ;;  %v352_v60 = vld [vmem:[#allocation6 + $0xd8] sm:$0xff] }
  0x83   :  { %521 = vmatprep.subr.bf16.mxu0 %v398_v62  ;;  %606 = vmatpush1.bf16.msra.mxu1 %v395_v1  ;;  %v437_v62 = vunpack.c.l.s8.bf16 %v349_v59  ;;  %v440_v63 = vunpack.c.l.s8.bf16 %v352_v60  ;;  %v439_v1 = vunpack.c.l.s8.bf16 %v351_v0 }
  0x84   :  { %607 = vmatprep.subr.bf16.mxu1 %v400_v3  ;;  %v444_v3 = vunpack.c.h.s8.bf16 %v352_v60 }
  0x86   :  { %522 = vmatpush1.bf16.msra.mxu0 %v397_v2  ;;  %v442_v2 = vunpack.c.h.s8.bf16 %v350_v54 }
  0x87   :  { %523 = vmatprep.subr.bf16.mxu0 %v402_v5  ;;  %608 = vmatpush1.bf16.msra.mxu1 %v399_v7  ;;  %v443_v5 = vunpack.c.h.s8.bf16 %v351_v0  ;;  %v356_v7 = vld [vmem:[#allocation6 + $0xf8] sm:$0xff] }
  0x88   :  { %609 = vmatprep.subr.bf16.mxu1 %v404_v9  ;;  %v448_v9 = vunpack.c.l.s8.bf16 %v356_v7 }
  0x8a   :  { %524 = vmatpush1.bf16.msra.mxu0 %v401_v8  ;;  %v446_v8 = vunpack.c.l.s8.bf16 %v354_v6 }
  0x8b   :  { %525 = vmatprep.subr.bf16.mxu0 %v406_v10  ;;  %610 = vmatpush1.bf16.msra.mxu1 %v403_v13  ;;  %v353_v10 = vld [vmem:[#allocation6 + $0xe0] sm:$0xff]  ;;  %v447_v13 = vunpack.c.l.s8.bf16 %v355_v11 }
  0x8c   :  { %611 = vmatprep.subr.bf16.mxu1 %v408_v15  ;;  %v445_v12 = vunpack.c.l.s8.bf16 %v353_v10  ;;  %v452_v15 = vunpack.c.h.s8.bf16 %v356_v7  ;;  %v449_v16 = vunpack.c.h.s8.bf16 %v353_v10  ;;  %v458_v10 = vunpack.c.h.s8.bf16 %v3545_v18 }
  0x8e   :  { %526 = vmatpush1.bf16.msra.mxu0 %v405_v14  ;;  %v450_v14 = vunpack.c.h.s8.bf16 %v354_v6 }
  0x8f   :  { %527 = vmatprep.subr.bf16.mxu0 %v410_v17  ;;  %612 = vmatpush1.bf16.msra.mxu1 %v407_v19  ;;  %v451_v17 = vunpack.c.h.s8.bf16 %v355_v11  ;;  %v3547_v19 = vld [vmem:[#allocation6 + $0x118] sm:$0xff] }
  0x90   :  { %613 = vmatprep.subr.bf16.mxu1 %v412_v21  ;;  %v456_v21 = vunpack.c.l.s8.bf16 %v3547_v19  ;;  %v460_v11 = vunpack.c.h.s8.bf16 %v3547_v19  ;;  %v361_v19 = vld [vmem:[#allocation6 + $0x120] sm:$0xff] }
  0x92   :  { %528 = vmatpush1.bf16.msra.mxu0 %v409_v20  ;;  %v454_v20 = vunpack.c.l.s8.bf16 %v3545_v18 }
  0x93   :  { %529 = vmatprep.subr.bf16.mxu0 %v414_v22  ;;  %614 = vmatpush1.bf16.msra.mxu1 %v411_v25  ;;  %v255_v22 = vlaneseq  ;;  %v253_v25 = vld [vmem:[#allocation4] sm:$0xf] }
  0x94   :  { %615 = vmatprep.subr.bf16.mxu1 %v416_v27  ;;  %v283_v27 = vld [vmem:[%s3807_s3] sm:$0xf] }
  0x95   :  { %v3551_v23 = vshrl.u32 %v255_v22, 7 }
  0x96   :  { %530 = vmatpush1.bf16.msra.mxu0 %v413_v26 }
  0x97   :  { %531 = vmatprep.subr.bf16.mxu0 %v418_v29  ;;  %616 = vmatpush1.bf16.msra.mxu1 %v415_v31  ;;  %v3554_v24 = vsub.s32 0, %v3551_v23  ;;  %v3557_v26 = vsub.s32 1, %v3551_v23  ;;  %v3564_v29 = vsub.s32 2, %v3551_v23  ;;  %v3568_v31 = vsub.s32 3, %v3551_v23 }
  0x98   :  { %617 = vmatprep.subr.bf16.mxu1 %v420_v33 }
  0x99   :  { %v258_v28 = vrot.slane %v253_v25, %v3554_v24  ;;  %v262_v30 = vrot.slane %v253_v25, %v3557_v26  ;;  %v270_v40 = vrot.slane %v253_v25, %v3568_v31  ;;  %v300_v48 = vrot.slane %v283_v27, %v3568_v31 }
  0x9a   :  { %532 = vmatpush1.bf16.msra.mxu0 %v417_v32  ;;  %v288_v32 = vrot.slane %v283_v27, %v3554_v24 }
  0x9b   :  { %533 = vmatprep.subr.bf16.mxu0 %v422_v34  ;;  %618 = vmatpush1.bf16.msra.mxu1 %v419_v37  ;;  %v292_v34 = vrot.slane %v283_v27, %v3557_v26  ;;  %v266_v37 = vrot.slane %v253_v25, %v3564_v29  ;;  %v363_v25 = vld [vmem:[#allocation6 + $0x130] sm:$0xff] }
  0x9c   :  { %619 = vmatprep.subr.bf16.mxu1 %v424_v39 }
  0x9e   :  { %534 = vmatpush1.bf16.msra.mxu0 %v421_v38 }
  0x9f   :  { %535 = vmatprep.subr.bf16.mxu0 %v426_v41  ;;  %620 = vmatpush1.bf16.msra.mxu1 %v423_v43 }
  0xa0   :  { %621 = vmatprep.subr.bf16.mxu1 %v428_v45 }
  0xa2   :  { %536 = vmatpush1.bf16.msra.mxu0 %v425_v44  ;;  %v296_v44 = vrot.slane %v283_v27, %v3564_v29  ;;  %v461_v27 = vunpack.c.l.s8.bf16 %v361_v19 }
  0xa3   :  { %537 = vmatprep.subr.bf16.mxu0 %v430_v46  ;;  %622 = vmatpush1.bf16.msra.mxu1 %v427_v49 }
  0xa4   :  { %623 = vmatprep.subr.bf16.mxu1 %v432_v51 }
  0xa6   :  { %538 = vmatpush1.bf16.msra.mxu0 %v429_v50 }
  0xa7   :  { %539 = vmatprep.subr.bf16.mxu0 %v434_v53  ;;  %624 = vmatpush1.bf16.msra.mxu1 %v431_v55  ;;  %v357_v53 = vld [vmem:[#allocation6 + $0x100] sm:$0xff] }
  0xa8   :  { %625 = vmatprep.subr.bf16.mxu1 %v436_v57 }
  0xaa   :  { %540 = vmatpush1.bf16.msra.mxu0 %v433_v56 }
  0xab   :  { %541 = vmatprep.subr.bf16.mxu0 %v438_v58  ;;  %626 = vmatpush1.bf16.msra.mxu1 %v435_v61  ;;  %v359_v58 = vld [vmem:[#allocation6 + $0x110] sm:$0xff] }
  0xac   :  { %627 = vmatprep.subr.bf16.mxu1 %v440_v63  ;;  %v455_v7 = vunpack.c.l.s8.bf16 %v359_v58 }
  0xae   :  { %542 = vmatpush1.bf16.msra.mxu0 %v437_v62 }
  0xaf   :  { %628 = vmatpush1.bf16.msra.mxu1 %v439_v1  ;;  %543 = vmatprep.subr.bf16.mxu0 %v442_v2 }
  0xb0   :  { %629 = vmatprep.subr.bf16.mxu1 %v444_v3  ;;  %v453_v3 = vunpack.c.l.s8.bf16 %v357_v53 }
  0xb2   :  { %544 = vmatpush1.bf16.msra.mxu0 %v441_v4 }
  0xb3   :  { %630 = vmatpush1.bf16.msra.mxu1 %v443_v5  ;;  %545 = vmatprep.subr.bf16.mxu0 %v446_v8 }
  0xb4   :  { %631 = vmatprep.subr.bf16.mxu1 %v448_v9 }
  0xb6   :  { %546 = vmatpush1.bf16.msra.mxu0 %v445_v12 }
  0xb7   :  { %632 = vmatpush1.bf16.msra.mxu1 %v447_v13  ;;  %547 = vmatprep.subr.bf16.mxu0 %v450_v14  ;;  %v362_v13 = vld [vmem:[#allocation6 + $0x128] sm:$0xff]  ;;  %v364_v14 = vld [vmem:[#allocation6 + $0x138] sm:$0xff] }
  0xb8   :  { %633 = vmatprep.subr.bf16.mxu1 %v452_v15  ;;  %v462_v18 = vunpack.c.l.s8.bf16 %v362_v13  ;;  %v464_v22 = vunpack.c.l.s8.bf16 %v364_v14 }
  0xba   :  { %548 = vmatpush1.bf16.msra.mxu0 %v449_v16 }
  0xbb   :  { %634 = vmatpush1.bf16.msra.mxu1 %v451_v17  ;;  %560 = vmatprep.subr.bf16.mxu0 %v454_v20  ;;  %v457_v17 = vunpack.c.h.s8.bf16 %v357_v53  ;;  %v459_v20 = vunpack.c.h.s8.bf16 %v359_v58  ;;  %v376_v58 = vld [vmem:[#allocation6 + $0x198] sm:$0xff] }
  0xbc   :  { %646 = vmatprep.subr.bf16.mxu1 %v456_v21 }
 0x150   :  { %v201_v33 = vpop.f32.mrb[0].mxu0 }
 0x151   :  { %v275_v35 = vmul.f32 %v258_v28, %v201_v33  ;;  %v203_v36 = vpop.f32.mrb[1].mxu0  ;;  %v244_v47 = vpop.f32.mrb[0].mxu1  ;;  %v366_v33 = vld [vmem:[#allocation6 + $0x148] sm:$0xff] }
 0x152   :  { %v276_v38 = vmul.f32 %v262_v30, %v203_v36  ;;  %v205_v39 = vpop.f32.mrb[2].mxu0  ;;  %v277_v50 = vmul.f32 %v266_v37, %v244_v47  ;;  %v246_v51 = vpop.f32.mrb[1].mxu1  ;;  %v467_v36 = vunpack.c.h.s8.bf16 %v363_v25 }
 0x153   :  { %v305_v41 = vadd.f32 %v288_v32, %v275_v35  ;;  %v279_v42 = vmul.f32 %v258_v28, %v205_v39  ;;  %v207_v43 = vpop.f32.mrb[3].mxu0  ;;  %v278_v54 = vmul.f32 %v270_v40, %v246_v51  ;;  %v248_v55 = vpop.f32.mrb[2].mxu1  ;;  %v463_v28 = vunpack.c.l.s8.bf16 %v363_v25  ;;  %v365_v39 = vld [vmem:[#allocation6 + $0x140] sm:$0xff] }
 0x154   :  { %v306_v45 = vadd.f32 %v292_v34, %v276_v38  ;;  %v280_v46 = vmul.f32 %v262_v30, %v207_v43  ;;  %v307_v59 = vadd.f32 %v296_v44, %v277_v50  ;;  %v281_v60 = vmul.f32 %v266_v37, %v248_v55  ;;  %v250_v61 = vpop.f32.mrb[3].mxu1  ;;  %v369_v51 = vld [vmem:[#allocation6 + $0x160] sm:$0xff] }
 0x155   :  { %v309_v49 = vadd.f32 %v288_v32, %v279_v42  ;;  %v313_v56 = vmax.f32 %v305_v41, 0.0  ;;  %v308_v0 = vadd.f32 %v300_v48, %v278_v54  ;;  %v282_v1 = vmul.f32 %v270_v40, %v250_v61  ;;  %v367_v40 = vld [vmem:[#allocation6 + $0x150] sm:$0xff] }
 0x156   :  { %v310_v52 = vadd.f32 %v292_v34, %v280_v46  ;;  %v314_v62 = vmax.f32 %v306_v45, 0.0  ;;  %v315_v4 = vmax.f32 %v307_v59, 0.0  ;;  %v311_v5 = vadd.f32 %v296_v44, %v281_v60  ;;  %v368_v34 = vld [vmem:[#allocation6 + $0x158] sm:$0xff]  ;;  %v370_v45 = vld [vmem:[#allocation6 + $0x168] sm:$0xff] }
 0x157   :  { %v317_v57 = vmax.f32 %v309_v49, 0.0  ;;  %v316_v8 = vmax.f32 %v308_v0, 0.0  ;;  %v312_v9 = vadd.f32 %v300_v48, %v282_v1  ;;  %v466_v30 = vunpack.c.h.s8.bf16 %v362_v13  ;;  %v372_v46 = vld [vmem:[#allocation6 + $0x178] sm:$0xff]  ;;  %v375_v0 = vld [vmem:[#allocation6 + $0x190] sm:$0xff] }
 0x158   :  { %v318_v63 = vmax.f32 %v310_v52, 0.0  ;;  %v319_v12 = vmax.f32 %v311_v5, 0.0  ;;  %v468_v32 = vunpack.c.h.s8.bf16 %v364_v14  ;;  %v465_v35 = vunpack.c.h.s8.bf16 %v361_v19  ;;  %v371_v52 = vld [vmem:[#allocation6 + $0x170] sm:$0xff]  ;;  %v378_v5 = vld [vmem:[#allocation6 + $0x1a8] sm:$0xff] }
 0x159   :  { %v321_v2 = vpack.c.bf16 %v317_v57, %v313_v56  ;;  %v320_v15 = vmax.f32 %v312_v9, 0.0  ;;  %v470_v37 = vunpack.c.l.s8.bf16 %v366_v33  ;;  %v472_v38 = vunpack.c.l.s8.bf16 %v368_v34  ;;  %v374_v57 = vld [vmem:[#allocation6 + $0x188] sm:$0xff] }
 0x15a   :  { %v322_v6 = vpack.c.bf16 %v318_v63, %v314_v62  ;;  %v3578_v16 = vpack.c.bf16 %v319_v12, %v315_v4  ;;  %v469_v41 = vunpack.c.l.s8.bf16 %v365_v39  ;;  %v471_v42 = vunpack.c.l.s8.bf16 %v367_v40  ;;  %v373_v63 = vld [vmem:[#allocation6 + $0x180] sm:$0xff]  ;;  %v379_v12 = vld [vmem:[#allocation6 + $0x1b0] sm:$0xff] }
 0x15b   :  { %v324_v21 = vpack.c.bf16 %v320_v15, %v316_v8  ;;  %v474_v43 = vunpack.c.h.s8.bf16 %v366_v33  ;;  %v476_v44 = vunpack.c.h.s8.bf16 %v368_v34  ;;  %v473_v47 = vunpack.c.h.s8.bf16 %v365_v39 }
 0x15c   :  { %549 = vmatprep.mubr.bf16.mxu0 %v322_v6  ;;  %635 = vmatprep.mubr.bf16.mxu1 %v322_v6  ;;  %v475_v48 = vunpack.c.h.s8.bf16 %v367_v40  ;;  %v478_v49 = vunpack.c.l.s8.bf16 %v370_v45  ;;  %v480_v50 = vunpack.c.l.s8.bf16 %v372_v46  ;;  %v477_v53 = vunpack.c.l.s8.bf16 %v369_v51  ;;  %v380_v6 = vld [vmem:[#allocation6 + $0x1b8] sm:$0xff] }
 0x15d   :  { %550 = vmatmul.mubr.bf16.vlgmr.msra.gmra.mrb[4].mxu0 %v321_v2  ;;  %636 = vmatmul.mubr.bf16.vlgmr.msra.gmra.mrb[4].mxu1 %v321_v2  ;;  %v479_v54 = vunpack.c.l.s8.bf16 %v371_v52  ;;  %v482_v55 = vunpack.c.h.s8.bf16 %v370_v45  ;;  %v484_v56 = vunpack.c.h.s8.bf16 %v372_v46  ;;  %v481_v59 = vunpack.c.h.s8.bf16 %v369_v51 }
 0x15e   :  { %561 = vmatpush1.bf16.msra.mxu0 %v453_v3  ;;  %647 = vmatpush1.bf16.msra.mxu1 %v455_v7  ;;  %v483_v60 = vunpack.c.h.s8.bf16 %v371_v52  ;;  %v486_v61 = vunpack.c.l.s8.bf16 %v374_v57  ;;  %v488_v62 = vunpack.c.l.s8.bf16 %v376_v58  ;;  %v485_v1 = vunpack.c.l.s8.bf16 %v373_v63 }
 0x15f   :  { %562 = vmatprep.subr.bf16.mxu0 %v458_v10  ;;  %648 = vmatprep.subr.bf16.mxu1 %v460_v11  ;;  %v487_v2 = vunpack.c.l.s8.bf16 %v375_v0  ;;  %v490_v3 = vunpack.c.h.s8.bf16 %v374_v57  ;;  %v492_v4 = vunpack.c.h.s8.bf16 %v376_v58  ;;  %v489_v7 = vunpack.c.h.s8.bf16 %v373_v63  ;;  %v377_v11 = vld [vmem:[#allocation6 + $0x1a0] sm:$0xff] }
 0x160   :  { %592 = vmatprep.mubr.bf16.mxu0 %v324_v21  ;;  %678 = vmatprep.mubr.bf16.mxu1 %v324_v21  ;;  %v491_v8 = vunpack.c.h.s8.bf16 %v375_v0  ;;  %v494_v9 = vunpack.c.l.s8.bf16 %v378_v5  ;;  %v496_v10 = vunpack.c.l.s8.bf16 %v380_v6  ;;  %v493_v13 = vunpack.c.l.s8.bf16 %v377_v11  ;;  %v384_v21 = vld [vmem:[#allocation6 + $0x1d8] sm:$0xff] }
 0x161   :  { %v495_v14 = vunpack.c.l.s8.bf16 %v379_v12  ;;  %v498_v15 = vunpack.c.h.s8.bf16 %v378_v5  ;;  %v504_v25 = vunpack.c.l.s8.bf16 %v384_v21  ;;  %v508_v34 = vunpack.c.h.s8.bf16 %v384_v21  ;;  %v810_v21 = vld [vmem:[#allocation7 + $0x188] sm:$0xff] }
 0x162   :  { %563 = vmatpush1.bf16.msra.mxu0 %v457_v17  ;;  %649 = vmatpush1.bf16.msra.mxu1 %v459_v20  ;;  %v500_v17 = vunpack.c.h.s8.bf16 %v380_v6  ;;  %v382_v20 = vld [vmem:[#allocation6 + $0x1c8] sm:$0xff] }
 0x163   :  { %564 = vmatprep.subr.bf16.mxu0 %v462_v18  ;;  %650 = vmatprep.subr.bf16.mxu1 %v464_v22  ;;  %v497_v18 = vunpack.c.h.s8.bf16 %v377_v11  ;;  %v499_v22 = vunpack.c.h.s8.bf16 %v379_v12  ;;  %v502_v19 = vunpack.c.l.s8.bf16 %v382_v20  ;;  %v506_v33 = vunpack.c.h.s8.bf16 %v382_v20  ;;  %v793_v12 = vld [vmem:[#allocation7 + $0x100] sm:$0xff] }
 0x166   :  { %565 = vmatpush1.bf16.msra.mxu0 %v461_v27  ;;  %651 = vmatpush1.bf16.msra.mxu1 %v463_v28  ;;  %v381_v27 = vld [vmem:[#allocation6 + $0x1c0] sm:$0xff]  ;;  %v383_v28 = vld [vmem:[#allocation6 + $0x1d0] sm:$0xff] }
 0x167   :  { %566 = vmatprep.subr.bf16.mxu0 %v466_v30  ;;  %652 = vmatprep.subr.bf16.mxu1 %v468_v32  ;;  %v501_v30 = vunpack.c.l.s8.bf16 %v381_v27  ;;  %v503_v32 = vunpack.c.l.s8.bf16 %v383_v28 }
 0x16a   :  { %567 = vmatpush1.bf16.msra.mxu0 %v465_v35  ;;  %653 = vmatpush1.bf16.msra.mxu1 %v467_v36  ;;  %v386_v35 = vld [vmem:[#allocation6 + $0x1e8] sm:$0xff]  ;;  %v388_v36 = vld [vmem:[#allocation6 + $0x1f8] sm:$0xff] }
 0x16b   :  { %568 = vmatprep.subr.bf16.mxu0 %v470_v37  ;;  %654 = vmatprep.subr.bf16.mxu1 %v472_v38  ;;  %v505_v37 = vunpack.c.h.s8.bf16 %v381_v27  ;;  %v507_v38 = vunpack.c.h.s8.bf16 %v383_v28  ;;  %v510_v39 = vunpack.c.l.s8.bf16 %v386_v35  ;;  %v512_v40 = vunpack.c.l.s8.bf16 %v388_v36  ;;  %v809_v28 = vld [vmem:[#allocation7 + $0x180] sm:$0xff] }
 0x16c   :  { %v514_v45 = vunpack.c.h.s8.bf16 %v386_v35  ;;  %v516_v46 = vunpack.c.h.s8.bf16 %v388_v36  ;;  %v826_v36 = vld [vmem:[#allocation7 + $0x208] sm:$0xff] }
 0x16e   :  { %569 = vmatpush1.bf16.msra.mxu0 %v469_v41  ;;  %655 = vmatpush1.bf16.msra.mxu1 %v471_v42  ;;  %v385_v41 = vld [vmem:[#allocation6 + $0x1e0] sm:$0xff]  ;;  %v387_v42 = vld [vmem:[#allocation6 + $0x1f0] sm:$0xff] }
 0x16f   :  { %570 = vmatprep.subr.bf16.mxu0 %v474_v43  ;;  %656 = vmatprep.subr.bf16.mxu1 %v476_v44  ;;  %v509_v43 = vunpack.c.l.s8.bf16 %v385_v41  ;;  %v511_v44 = vunpack.c.l.s8.bf16 %v387_v42 }
 0x172   :  { %571 = vmatpush1.bf16.msra.mxu0 %v473_v47  ;;  %657 = vmatpush1.bf16.msra.mxu1 %v475_v48  ;;  %v762_v47 = vld [vmem:[#allocation7 + $0x8] sm:$0xff]  ;;  %v764_v48 = vld [vmem:[#allocation7 + $0x18] sm:$0xff] }
 0x173   :  { %572 = vmatprep.subr.bf16.mxu0 %v478_v49  ;;  %658 = vmatprep.subr.bf16.mxu1 %v480_v50  ;;  %v513_v49 = vunpack.c.h.s8.bf16 %v385_v41  ;;  %v515_v50 = vunpack.c.h.s8.bf16 %v387_v42  ;;  %v1018_v51 = vunpack.c.l.s8.bf16 %v762_v47  ;;  %v1020_v52 = vunpack.c.l.s8.bf16 %v764_v48  ;;  %v825_v42 = vld [vmem:[#allocation7 + $0x200] sm:$0xff] }
 0x174   :  { %v1034_v57 = vunpack.c.h.s8.bf16 %v762_v47  ;;  %v1036_v58 = vunpack.c.h.s8.bf16 %v764_v48  ;;  %v842_v48 = vld [vmem:[#allocation7 + $0x288] sm:$0xff] }
 0x176   :  { %573 = vmatpush1.bf16.msra.mxu0 %v477_v53  ;;  %659 = vmatpush1.bf16.msra.mxu1 %v479_v54  ;;  %v761_v53 = vld [vmem:[#allocation7] sm:$0xff]  ;;  %v763_v54 = vld [vmem:[#allocation7 + $0x10] sm:$0xff] }
 0x177   :  { %574 = vmatprep.subr.bf16.mxu0 %v482_v55  ;;  %660 = vmatprep.subr.bf16.mxu1 %v484_v56  ;;  %v1017_v55 = vunpack.c.l.s8.bf16 %v761_v53  ;;  %v1019_v56 = vunpack.c.l.s8.bf16 %v763_v54 }
 0x17a   :  { %575 = vmatpush1.bf16.msra.mxu0 %v481_v59  ;;  %661 = vmatpush1.bf16.msra.mxu1 %v483_v60  ;;  %v778_v59 = vld [vmem:[#allocation7 + $0x88] sm:$0xff]  ;;  %v780_v60 = vld [vmem:[#allocation7 + $0x98] sm:$0xff] }
 0x17b   :  { %576 = vmatprep.subr.bf16.mxu0 %v486_v61  ;;  %662 = vmatprep.subr.bf16.mxu1 %v488_v62  ;;  %v1033_v61 = vunpack.c.h.s8.bf16 %v761_v53  ;;  %v1035_v62 = vunpack.c.h.s8.bf16 %v763_v54  ;;  %v1050_v63 = vunpack.c.l.s8.bf16 %v778_v59  ;;  %v1052_v0 = vunpack.c.l.s8.bf16 %v780_v60  ;;  %v841_v54 = vld [vmem:[#allocation7 + $0x280] sm:$0xff] }
 0x17c   :  { %v1066_v5 = vunpack.c.h.s8.bf16 %v778_v59  ;;  %v1068_v6 = vunpack.c.h.s8.bf16 %v780_v60  ;;  %v858_v60 = vld [vmem:[#allocation7 + $0x308] sm:$0xff] }
 0x17e   :  { %577 = vmatpush1.bf16.msra.mxu0 %v485_v1  ;;  %663 = vmatpush1.bf16.msra.mxu1 %v487_v2  ;;  %v777_v1 = vld [vmem:[#allocation7 + $0x80] sm:$0xff]  ;;  %v779_v2 = vld [vmem:[#allocation7 + $0x90] sm:$0xff] }
 0x17f   :  { %578 = vmatprep.subr.bf16.mxu0 %v490_v3  ;;  %664 = vmatprep.subr.bf16.mxu1 %v492_v4  ;;  %v1049_v3 = vunpack.c.l.s8.bf16 %v777_v1  ;;  %v1051_v4 = vunpack.c.l.s8.bf16 %v779_v2 }
 0x182   :  { %579 = vmatpush1.bf16.msra.mxu0 %v489_v7  ;;  %665 = vmatpush1.bf16.msra.mxu1 %v491_v8  ;;  %v794_v7 = vld [vmem:[#allocation7 + $0x108] sm:$0xff]  ;;  %v1065_v8 = vunpack.c.h.s8.bf16 %v777_v1 }
 0x183   :  { %580 = vmatprep.subr.bf16.mxu0 %v494_v9  ;;  %666 = vmatprep.subr.bf16.mxu1 %v496_v10  ;;  %v1067_v9 = vunpack.c.h.s8.bf16 %v779_v2  ;;  %v1082_v10 = vunpack.c.l.s8.bf16 %v794_v7  ;;  %v857_v2 = vld [vmem:[#allocation7 + $0x300] sm:$0xff] }
 0x186   :  { %581 = vmatpush1.bf16.msra.mxu0 %v493_v13  ;;  %667 = vmatpush1.bf16.msra.mxu1 %v495_v14  ;;  %v795_v13 = vld [vmem:[#allocation7 + $0x110] sm:$0xff]  ;;  %v1081_v14 = vunpack.c.l.s8.bf16 %v793_v12 }
 0x187   :  { %582 = vmatprep.subr.bf16.mxu0 %v498_v15  ;;  %668 = vmatprep.subr.bf16.mxu1 %v500_v17  ;;  %v1083_v15 = vunpack.c.l.s8.bf16 %v795_v13  ;;  %v1098_v17 = vunpack.c.h.s8.bf16 %v794_v7 }
 0x18a   :  { %583 = vmatpush1.bf16.msra.mxu0 %v497_v18  ;;  %669 = vmatpush1.bf16.msra.mxu1 %v499_v22  ;;  %v812_v18 = vld [vmem:[#allocation7 + $0x198] sm:$0xff]  ;;  %v1097_v22 = vunpack.c.h.s8.bf16 %v793_v12 }
 0x18b   :  { %584 = vmatprep.subr.bf16.mxu0 %v502_v19  ;;  %670 = vmatprep.subr.bf16.mxu1 %v504_v25  ;;  %v1099_v19 = vunpack.c.h.s8.bf16 %v795_v13  ;;  %v1114_v25 = vunpack.c.l.s8.bf16 %v810_v21  ;;  %v1116_v27 = vunpack.c.l.s8.bf16 %v812_v18  ;;  %v1132_v35 = vunpack.c.h.s8.bf16 %v812_v18  ;;  %v873_v13 = vld [vmem:[#allocation7 + $0x380] sm:$0xff] }
 0x18c   :  { %v1257_v18 = vunpack.c.h.s8.bf16 %v873_v13 }
 0x18e   :  { %585 = vmatpush1.bf16.msra.mxu0 %v501_v30  ;;  %671 = vmatpush1.bf16.msra.mxu1 %v503_v32  ;;  %v811_v30 = vld [vmem:[#allocation7 + $0x190] sm:$0xff]  ;;  %v1113_v32 = vunpack.c.l.s8.bf16 %v809_v28 }
 0x18f   :  { %586 = vmatprep.subr.bf16.mxu0 %v506_v33  ;;  %672 = vmatprep.subr.bf16.mxu1 %v508_v34  ;;  %v1115_v33 = vunpack.c.l.s8.bf16 %v811_v30  ;;  %v1130_v34 = vunpack.c.h.s8.bf16 %v810_v21 }
 0x192   :  { %587 = vmatpush1.bf16.msra.mxu0 %v505_v37  ;;  %673 = vmatpush1.bf16.msra.mxu1 %v507_v38  ;;  %v828_v37 = vld [vmem:[#allocation7 + $0x218] sm:$0xff]  ;;  %v1129_v38 = vunpack.c.h.s8.bf16 %v809_v28 }
 0x193   :  { %588 = vmatprep.subr.bf16.mxu0 %v510_v39  ;;  %674 = vmatprep.subr.bf16.mxu1 %v512_v40  ;;  %v1131_v39 = vunpack.c.h.s8.bf16 %v811_v30  ;;  %v1146_v40 = vunpack.c.l.s8.bf16 %v826_v36  ;;  %v1148_v41 = vunpack.c.l.s8.bf16 %v828_v37  ;;  %v1164_v47 = vunpack.c.h.s8.bf16 %v828_v37  ;;  %v689_v30 = vld [vmem:[%s3809_s5] sm:$0xf] }
 0x196   :  { %589 = vmatpush1.bf16.msra.mxu0 %v509_v43  ;;  %675 = vmatpush1.bf16.msra.mxu1 %v511_v44  ;;  %v827_v43 = vld [vmem:[#allocation7 + $0x210] sm:$0xff]  ;;  %v1145_v44 = vunpack.c.l.s8.bf16 %v825_v42 }
 0x197   :  { %590 = vmatprep.subr.bf16.mxu0 %v514_v45  ;;  %676 = vmatprep.subr.bf16.mxu1 %v516_v46  ;;  %v1147_v45 = vunpack.c.l.s8.bf16 %v827_v43  ;;  %v1162_v46 = vunpack.c.h.s8.bf16 %v826_v36  ;;  %v706_v36 = vrot.slane %v689_v30, %v3568_v31 }
 0x19a   :  { %591 = vmatpush1.bf16.msra.mxu0 %v513_v49  ;;  %677 = vmatpush1.bf16.msra.mxu1 %v515_v50  ;;  %v844_v49 = vld [vmem:[#allocation7 + $0x298] sm:$0xff]  ;;  %v1161_v50 = vunpack.c.h.s8.bf16 %v825_v42 }
 0x19b   :  { %1529 = vmatprep.subr.bf16.mxu0 %v1018_v51  ;;  %1615 = vmatprep.subr.bf16.mxu1 %v1020_v52  ;;  %v1163_v51 = vunpack.c.h.s8.bf16 %v827_v43  ;;  %v1178_v52 = vunpack.c.l.s8.bf16 %v842_v48  ;;  %v1180_v53 = vunpack.c.l.s8.bf16 %v844_v49  ;;  %v1196_v59 = vunpack.c.h.s8.bf16 %v844_v49 }
 0x19d   :  { %593 = vmatmul.mubr.bf16.vlgmr.msra.gmra.mrb[4].mxu0 %v3578_v16  ;;  %679 = vmatmul.mubr.bf16.vlgmr.msra.gmra.mrb[4].mxu1 %v3578_v16  ;;  %v796_v16 = vld [vmem:[#allocation7 + $0x118] sm:$0xff] }
 0x19e   :  { %1530 = vmatpush1.bf16.msra.mxu0 %v1017_v55  ;;  %1616 = vmatpush1.bf16.msra.mxu1 %v1019_v56  ;;  %v1084_v11 = vunpack.c.l.s8.bf16 %v796_v16  ;;  %v1100_v20 = vunpack.c.h.s8.bf16 %v796_v16  ;;  %v843_v55 = vld [vmem:[#allocation7 + $0x290] sm:$0xff]  ;;  %v1177_v56 = vunpack.c.l.s8.bf16 %v841_v54  ;;  %v1225_v16 = vunpack.c.h.s8.bf16 %v857_v2 }
 0x19f   :  { %1531 = vmatprep.subr.bf16.mxu0 %v1034_v57  ;;  %1617 = vmatprep.subr.bf16.mxu1 %v1036_v58  ;;  %v1179_v57 = vunpack.c.l.s8.bf16 %v843_v55  ;;  %v1194_v58 = vunpack.c.h.s8.bf16 %v842_v48 }
 0x1a2   :  { %1532 = vmatpush1.bf16.msra.mxu0 %v1033_v61  ;;  %1618 = vmatpush1.bf16.msra.mxu1 %v1035_v62  ;;  %v860_v61 = vld [vmem:[#allocation7 + $0x318] sm:$0xff]  ;;  %v1193_v62 = vunpack.c.h.s8.bf16 %v841_v54 }
 0x1a3   :  { %1533 = vmatprep.subr.bf16.mxu0 %v1050_v63  ;;  %1619 = vmatprep.subr.bf16.mxu1 %v1052_v0  ;;  %v1195_v63 = vunpack.c.h.s8.bf16 %v843_v55  ;;  %v1210_v0 = vunpack.c.l.s8.bf16 %v858_v60  ;;  %v1212_v1 = vunpack.c.l.s8.bf16 %v860_v61  ;;  %v1228_v7 = vunpack.c.h.s8.bf16 %v860_v61 }
 0x1a6   :  { %1534 = vmatpush1.bf16.msra.mxu0 %v1049_v3  ;;  %1620 = vmatpush1.bf16.msra.mxu1 %v1051_v4  ;;  %v859_v3 = vld [vmem:[#allocation7 + $0x310] sm:$0xff]  ;;  %v1209_v4 = vunpack.c.l.s8.bf16 %v857_v2 }
 0x1a7   :  { %1535 = vmatprep.subr.bf16.mxu0 %v1066_v5  ;;  %1621 = vmatprep.subr.bf16.mxu1 %v1068_v6  ;;  %v1211_v5 = vunpack.c.l.s8.bf16 %v859_v3  ;;  %v1226_v6 = vunpack.c.h.s8.bf16 %v858_v60 }
 0x1aa   :  { %1536 = vmatpush1.bf16.msra.mxu0 %v1065_v8  ;;  %1622 = vmatpush1.bf16.msra.mxu1 %v1067_v9  ;;  %v1227_v8 = vunpack.c.h.s8.bf16 %v859_v3  ;;  %v874_v9 = vld [vmem:[#allocation7 + $0x388] sm:$0xff] }
 0x1ab   :  { %1537 = vmatprep.subr.bf16.mxu0 %v1082_v10  ;;  %1623 = vmatprep.subr.bf16.mxu1 %v1084_v11  ;;  %v876_v10 = vld [vmem:[#allocation7 + $0x398] sm:$0xff]  ;;  %v1242_v11 = vunpack.c.l.s8.bf16 %v874_v9 }
 0x1ac   :  { %v1244_v12 = vunpack.c.l.s8.bf16 %v876_v10  ;;  %v1260_v21 = vunpack.c.h.s8.bf16 %v876_v10 }
 0x1ae   :  { %1538 = vmatpush1.bf16.msra.mxu0 %v1081_v14  ;;  %1624 = vmatpush1.bf16.msra.mxu1 %v1083_v15  ;;  %v875_v14 = vld [vmem:[#allocation7 + $0x390] sm:$0xff]  ;;  %v1241_v15 = vunpack.c.l.s8.bf16 %v873_v13 }
 0x1af   :  { %1539 = vmatprep.subr.bf16.mxu0 %v1098_v17  ;;  %1625 = vmatprep.subr.bf16.mxu1 %v1100_v20  ;;  %v1243_v17 = vunpack.c.l.s8.bf16 %v875_v14  ;;  %v1258_v20 = vunpack.c.h.s8.bf16 %v874_v9 }
 0x1b2   :  { %1540 = vmatpush1.bf16.msra.mxu0 %v1097_v22  ;;  %1626 = vmatpush1.bf16.msra.mxu1 %v1099_v19  ;;  %v1259_v22 = vunpack.c.h.s8.bf16 %v875_v14  ;;  %v3582_v19 = vld [vmem:[#allocation7 + $0x408] sm:$0xff] }
 0x1b3   :  { %1541 = vmatprep.subr.bf16.mxu0 %v1114_v25  ;;  %1627 = vmatprep.subr.bf16.mxu1 %v1116_v27  ;;  %v3584_v25 = vld [vmem:[#allocation7 + $0x418] sm:$0xff]  ;;  %v1274_v27 = vunpack.c.l.s8.bf16 %v3582_v19 }
 0x1b4   :  { %v1276_v28 = vunpack.c.l.s8.bf16 %v3584_v25 }
 0x1b6   :  { %1542 = vmatpush1.bf16.msra.mxu0 %v1113_v32  ;;  %1628 = vmatpush1.bf16.msra.mxu1 %v1115_v33  ;;  %v719_v32 = vld [vmem:[%s3810_s6] sm:$0xf]  ;;  %v694_v33 = vrot.slane %v689_v30, %v3554_v24 }
 0x1b7   :  { %1543 = vmatprep.subr.bf16.mxu0 %v1130_v34  ;;  %1629 = vmatprep.subr.bf16.mxu1 %v1132_v35  ;;  %v702_v34 = vrot.slane %v689_v30, %v3564_v29  ;;  %v698_v35 = vrot.slane %v689_v30, %v3557_v26  ;;  %v724_v37 = vrot.slane %v719_v32, %v3554_v24 }
 0x1b8   :  { %v736_v42 = vrot.slane %v719_v32, %v3568_v31 }
 0x1ba   :  { %1544 = vmatpush1.bf16.msra.mxu0 %v1129_v38  ;;  %1630 = vmatpush1.bf16.msra.mxu1 %v1131_v39  ;;  %v732_v38 = vrot.slane %v719_v32, %v3564_v29 }
 0x1bb   :  { %1545 = vmatprep.subr.bf16.mxu0 %v1146_v40  ;;  %1631 = vmatprep.subr.bf16.mxu1 %v1148_v41  ;;  %v728_v41 = vrot.slane %v719_v32, %v3557_v26  ;;  %v905_v32 = vld [vmem:[#allocation7 + $0x480] sm:$0xff] }
 0x1be   :  { %1546 = vmatpush1.bf16.msra.mxu0 %v1145_v44  ;;  %1632 = vmatpush1.bf16.msra.mxu1 %v1147_v45 }
 0x1bf   :  { %1547 = vmatprep.subr.bf16.mxu0 %v1162_v46  ;;  %1633 = vmatprep.subr.bf16.mxu1 %v1164_v47 }
 0x1c2   :  { %1548 = vmatpush1.bf16.msra.mxu0 %v1161_v50  ;;  %1634 = vmatpush1.bf16.msra.mxu1 %v1163_v51 }
 0x1c3   :  { %1549 = vmatprep.subr.bf16.mxu0 %v1178_v52  ;;  %1635 = vmatprep.subr.bf16.mxu1 %v1180_v53 }
 0x1c6   :  { %1550 = vmatpush1.bf16.msra.mxu0 %v1177_v56  ;;  %1636 = vmatpush1.bf16.msra.mxu1 %v1179_v57 }
 0x1c7   :  { %1551 = vmatprep.subr.bf16.mxu0 %v1194_v58  ;;  %1637 = vmatprep.subr.bf16.mxu1 %v1196_v59 }
 0x1ca   :  { %1552 = vmatpush1.bf16.msra.mxu0 %v1193_v62  ;;  %1638 = vmatpush1.bf16.msra.mxu1 %v1195_v63 }
 0x1cb   :  { %1553 = vmatprep.subr.bf16.mxu0 %v1210_v0  ;;  %1639 = vmatprep.subr.bf16.mxu1 %v1212_v1 }
 0x1ce   :  { %1554 = vmatpush1.bf16.msra.mxu0 %v1209_v4  ;;  %1640 = vmatpush1.bf16.msra.mxu1 %v1211_v5  ;;  %v889_v5 = vld [vmem:[#allocation7 + $0x400] sm:$0xff] }
 0x1cf   :  { %1555 = vmatprep.subr.bf16.mxu0 %v1226_v6  ;;  %1641 = vmatprep.subr.bf16.mxu1 %v1228_v7  ;;  %v891_v6 = vld [vmem:[#allocation7 + $0x410] sm:$0xff]  ;;  %v1273_v14 = vunpack.c.l.s8.bf16 %v889_v5 }
 0x1d2   :  { %1556 = vmatpush1.bf16.msra.mxu0 %v1225_v16  ;;  %1642 = vmatpush1.bf16.msra.mxu1 %v1227_v8 }
 0x1d3   :  { %1557 = vmatprep.subr.bf16.mxu0 %v1242_v11  ;;  %1643 = vmatprep.subr.bf16.mxu1 %v1244_v12 }
 0x1d6   :  { %1558 = vmatpush1.bf16.msra.mxu0 %v1241_v15  ;;  %1644 = vmatpush1.bf16.msra.mxu1 %v1243_v17  ;;  %v1275_v15 = vunpack.c.l.s8.bf16 %v891_v6  ;;  %v1290_v17 = vunpack.c.h.s8.bf16 %v3582_v19  ;;  %v907_v19 = vld [vmem:[#allocation7 + $0x490] sm:$0xff] }
 0x1d7   :  { %1559 = vmatprep.subr.bf16.mxu0 %v1258_v20  ;;  %1645 = vmatprep.subr.bf16.mxu1 %v1260_v21  ;;  %v1292_v20 = vunpack.c.h.s8.bf16 %v3584_v25  ;;  %v906_v21 = vld [vmem:[#allocation7 + $0x488] sm:$0xff]  ;;  %v1305_v25 = vunpack.c.l.s8.bf16 %v905_v32 }
 0x1da   :  { %1560 = vmatpush1.bf16.msra.mxu0 %v1257_v18  ;;  %1646 = vmatpush1.bf16.msra.mxu1 %v1259_v22  ;;  %v908_v18 = vld [vmem:[#allocation7 + $0x498] sm:$0xff]  ;;  %v1289_v22 = vunpack.c.h.s8.bf16 %v889_v5 }
 0x1db   :  { %1572 = vmatprep.subr.bf16.mxu0 %v1274_v27  ;;  %1658 = vmatprep.subr.bf16.mxu1 %v1276_v28  ;;  %v1291_v27 = vunpack.c.h.s8.bf16 %v891_v6  ;;  %v1306_v28 = vunpack.c.l.s8.bf16 %v906_v21  ;;  %v1308_v30 = vunpack.c.l.s8.bf16 %v908_v18 }
 0x270   :  { %v594_v39 = vpop.f32.mrb[4].mxu0  ;;  %v680_v40 = vpop.f32.mrb[4].mxu1 }
 0x271   :  { %v711_v43 = vmul.f32 %v694_v33, %v594_v39  ;;  %v713_v44 = vmul.f32 %v702_v34, %v680_v40  ;;  %v596_v45 = vpop.f32.mrb[5].mxu0  ;;  %v682_v46 = vpop.f32.mrb[5].mxu1  ;;  %v1323_v39 = vunpack.c.h.s8.bf16 %v907_v19 }
 0x272   :  { %v712_v47 = vmul.f32 %v698_v35, %v596_v45  ;;  %v714_v48 = vmul.f32 %v706_v36, %v682_v46  ;;  %v598_v49 = vpop.f32.mrb[6].mxu0  ;;  %v684_v50 = vpop.f32.mrb[6].mxu1 }
 0x273   :  { %v741_v51 = vadd.f32 %v724_v37, %v711_v43  ;;  %v743_v52 = vadd.f32 %v732_v38, %v713_v44  ;;  %v715_v53 = vmul.f32 %v694_v33, %v598_v49  ;;  %v717_v54 = vmul.f32 %v702_v34, %v684_v50  ;;  %v600_v55 = vpop.f32.mrb[7].mxu0  ;;  %v686_v56 = vpop.f32.mrb[7].mxu1  ;;  %v923_v43 = vld [vmem:[#allocation7 + $0x510] sm:$0xff]  ;;  %v940_v49 = vld [vmem:[#allocation7 + $0x598] sm:$0xff] }
 0x274   :  { %v742_v57 = vadd.f32 %v728_v41, %v712_v47  ;;  %v744_v58 = vadd.f32 %v736_v42, %v714_v48  ;;  %v716_v59 = vmul.f32 %v698_v35, %v600_v55  ;;  %v718_v60 = vmul.f32 %v706_v36, %v686_v56  ;;  %v922_v36 = vld [vmem:[#allocation7 + $0x508] sm:$0xff]  ;;  %v939_v55 = vld [vmem:[#allocation7 + $0x590] sm:$0xff] }
 0x275   :  { %v745_v61 = vadd.f32 %v724_v37, %v715_v53  ;;  %v747_v62 = vadd.f32 %v732_v38, %v717_v54  ;;  %v749_v1 = vmax.f32 %v741_v51, 0.0  ;;  %v751_v2 = vmax.f32 %v743_v52, 0.0  ;;  %v924_v37 = vld [vmem:[#allocation7 + $0x518] sm:$0xff]  ;;  %v938_v48 = vld [vmem:[#allocation7 + $0x588] sm:$0xff]  ;;  %v937_v54 = vld [vmem:[#allocation7 + $0x580] sm:$0xff] }
 0x276   :  { %v746_v63 = vadd.f32 %v728_v41, %v716_v59  ;;  %v748_v0 = vadd.f32 %v736_v42, %v718_v60  ;;  %v750_v7 = vmax.f32 %v742_v57, 0.0  ;;  %v752_v16 = vmax.f32 %v744_v58, 0.0  ;;  %v921_v42 = vld [vmem:[#allocation7 + $0x500] sm:$0xff]  ;;  %v954_v60 = vld [vmem:[#allocation7 + $0x608] sm:$0xff] }
 0x277   :  { %v753_v3 = vmax.f32 %v745_v61, 0.0  ;;  %v755_v4 = vmax.f32 %v747_v62, 0.0  ;;  %v1307_v33 = vunpack.c.l.s8.bf16 %v907_v19  ;;  %v1322_v34 = vunpack.c.h.s8.bf16 %v906_v21  ;;  %v956_v61 = vld [vmem:[#allocation7 + $0x618] sm:$0xff]  ;;  %v971_v21 = vld [vmem:[#allocation7 + $0x690] sm:$0xff] }
 0x278   :  { %v754_v8 = vmax.f32 %v746_v63, 0.0  ;;  %v756_v9 = vmax.f32 %v748_v0, 0.0  ;;  %v1324_v35 = vunpack.c.h.s8.bf16 %v908_v18  ;;  %v1321_v38 = vunpack.c.h.s8.bf16 %v905_v32  ;;  %v988_v32 = vld [vmem:[#allocation7 + $0x718] sm:$0xff] }
 0x279   :  { %v3602_v10 = vpack.c.bf16 %v753_v3, %v749_v1  ;;  %v3604_v11 = vpack.c.bf16 %v755_v4, %v751_v2  ;;  %v1338_v40 = vunpack.c.l.s8.bf16 %v922_v36  ;;  %v1340_v41 = vunpack.c.l.s8.bf16 %v924_v37  ;;  %v953_v2 = vld [vmem:[#allocation7 + $0x600] sm:$0xff]  ;;  %v955_v3 = vld [vmem:[#allocation7 + $0x610] sm:$0xff] }
 0x27a   :  { %v3606_v12 = vpack.c.bf16 %v754_v8, %v750_v7  ;;  %v3608_v13 = vpack.c.bf16 %v756_v9, %v752_v16  ;;  %v1337_v44 = vunpack.c.l.s8.bf16 %v921_v42  ;;  %v1339_v45 = vunpack.c.l.s8.bf16 %v923_v43  ;;  %v970_v16 = vld [vmem:[#allocation7 + $0x688] sm:$0xff]  ;;  %v972_v8 = vld [vmem:[#allocation7 + $0x698] sm:$0xff] }
 0x27b   :  { %v1354_v46 = vunpack.c.h.s8.bf16 %v922_v36  ;;  %v1356_v47 = vunpack.c.h.s8.bf16 %v924_v37  ;;  %v1353_v50 = vunpack.c.h.s8.bf16 %v921_v42  ;;  %v1355_v51 = vunpack.c.h.s8.bf16 %v923_v43  ;;  %v987_v36 = vld [vmem:[#allocation7 + $0x710] sm:$0xff]  ;;  %v1004_v42 = vld [vmem:[#allocation7 + $0x798] sm:$0xff] }
 0x27c   :  { %1561 = vmatprep.mubr.bf16.mxu0 %v3606_v12  ;;  %1647 = vmatprep.mubr.bf16.mxu1 %v3606_v12  ;;  %v1370_v52 = vunpack.c.l.s8.bf16 %v938_v48  ;;  %v1372_v53 = vunpack.c.l.s8.bf16 %v940_v49  ;;  %v1369_v56 = vunpack.c.l.s8.bf16 %v937_v54  ;;  %v1371_v57 = vunpack.c.l.s8.bf16 %v939_v55 }
 0x27d   :  { %1562 = vmatmul.mubr.bf16.vlgmr.msra.gmra.mrb[8].mxu0 %v3602_v10  ;;  %1648 = vmatmul.mubr.bf16.vlgmr.msra.gmra.mrb[8].mxu1 %v3602_v10  ;;  %v1386_v58 = vunpack.c.h.s8.bf16 %v938_v48  ;;  %v1388_v59 = vunpack.c.h.s8.bf16 %v940_v49  ;;  %v1385_v62 = vunpack.c.h.s8.bf16 %v937_v54  ;;  %v1387_v63 = vunpack.c.h.s8.bf16 %v939_v55  ;;  %v1003_v48 = vld [vmem:[#allocation7 + $0x790] sm:$0xff]  ;;  %v768_v54 = vld [vmem:[#allocation7 + $0x38] sm:$0xff] }
 0x27e   :  { %1573 = vmatpush1.bf16.msra.mxu0 %v1273_v14  ;;  %1659 = vmatpush1.bf16.msra.mxu1 %v1275_v15  ;;  %v1402_v0 = vunpack.c.l.s8.bf16 %v954_v60  ;;  %v1404_v1 = vunpack.c.l.s8.bf16 %v956_v61  ;;  %v1401_v4 = vunpack.c.l.s8.bf16 %v953_v2  ;;  %v1403_v5 = vunpack.c.l.s8.bf16 %v955_v3 }
 0x27f   :  { %1604 = vmatprep.mubr.bf16.mxu0 %v3608_v13  ;;  %1690 = vmatprep.mubr.bf16.mxu1 %v3608_v13  ;;  %v1418_v6 = vunpack.c.h.s8.bf16 %v954_v60  ;;  %v1420_v7 = vunpack.c.h.s8.bf16 %v956_v61  ;;  %v1417_v9 = vunpack.c.h.s8.bf16 %v953_v2  ;;  %v1419_v14 = vunpack.c.h.s8.bf16 %v955_v3  ;;  %v767_v60 = vld [vmem:[#allocation7 + $0x30] sm:$0xff]  ;;  %v784_v2 = vld [vmem:[#allocation7 + $0xb8] sm:$0xff] }
 0x280   :  { %1574 = vmatprep.subr.bf16.mxu0 %v1290_v17  ;;  %1660 = vmatprep.subr.bf16.mxu1 %v1292_v20  ;;  %v1434_v15 = vunpack.c.l.s8.bf16 %v970_v16  ;;  %v1436_v17 = vunpack.c.l.s8.bf16 %v972_v8  ;;  %v969_v20 = vld [vmem:[#allocation7 + $0x680] sm:$0xff] }
 0x281   :  { %v1433_v18 = vunpack.c.l.s8.bf16 %v969_v20  ;;  %v1449_v19 = vunpack.c.h.s8.bf16 %v969_v20  ;;  %v800_v20 = vld [vmem:[#allocation7 + $0x138] sm:$0xff] }
 0x282   :  { %1575 = vmatpush1.bf16.msra.mxu0 %v1289_v22  ;;  %1661 = vmatpush1.bf16.msra.mxu1 %v1291_v27  ;;  %v1435_v22 = vunpack.c.l.s8.bf16 %v971_v21  ;;  %v1450_v27 = vunpack.c.h.s8.bf16 %v970_v16  ;;  %v783_v16 = vld [vmem:[#allocation7 + $0xb0] sm:$0xff] }
 0x283   :  { %1576 = vmatprep.subr.bf16.mxu0 %v1306_v28  ;;  %1662 = vmatprep.subr.bf16.mxu1 %v1308_v30  ;;  %v1452_v28 = vunpack.c.h.s8.bf16 %v972_v8  ;;  %v986_v30 = vld [vmem:[#allocation7 + $0x708] sm:$0xff] }
 0x286   :  { %1577 = vmatpush1.bf16.msra.mxu0 %v1305_v25  ;;  %1663 = vmatpush1.bf16.msra.mxu1 %v1307_v33  ;;  %v1451_v25 = vunpack.c.h.s8.bf16 %v971_v21  ;;  %v1466_v33 = vunpack.c.l.s8.bf16 %v986_v30 }
 0x287   :  { %1578 = vmatprep.subr.bf16.mxu0 %v1322_v34  ;;  %1664 = vmatprep.subr.bf16.mxu1 %v1324_v35  ;;  %v1468_v34 = vunpack.c.l.s8.bf16 %v988_v32  ;;  %v985_v35 = vld [vmem:[#allocation7 + $0x700] sm:$0xff] }
 0x288   :  { %v1465_v37 = vunpack.c.l.s8.bf16 %v985_v35  ;;  %v1481_v43 = vunpack.c.h.s8.bf16 %v985_v35  ;;  %v816_v35 = vld [vmem:[#allocation7 + $0x1b8] sm:$0xff] }
 0x28a   :  { %1579 = vmatpush1.bf16.msra.mxu0 %v1321_v38  ;;  %1665 = vmatpush1.bf16.msra.mxu1 %v1323_v39  ;;  %v1467_v38 = vunpack.c.l.s8.bf16 %v987_v36  ;;  %v1482_v39 = vunpack.c.h.s8.bf16 %v986_v30  ;;  %v799_v30 = vld [vmem:[#allocation7 + $0x130] sm:$0xff] }
 0x28b   :  { %1580 = vmatprep.subr.bf16.mxu0 %v1338_v40  ;;  %1666 = vmatprep.subr.bf16.mxu1 %v1340_v41  ;;  %v1484_v40 = vunpack.c.h.s8.bf16 %v988_v32  ;;  %v1002_v41 = vld [vmem:[#allocation7 + $0x788] sm:$0xff] }
 0x28e   :  { %1581 = vmatpush1.bf16.msra.mxu0 %v1337_v44  ;;  %1667 = vmatpush1.bf16.msra.mxu1 %v1339_v45  ;;  %v1483_v44 = vunpack.c.h.s8.bf16 %v987_v36  ;;  %v1498_v45 = vunpack.c.l.s8.bf16 %v1002_v41 }
 0x28f   :  { %1582 = vmatprep.subr.bf16.mxu0 %v1354_v46  ;;  %1668 = vmatprep.subr.bf16.mxu1 %v1356_v47  ;;  %v1500_v46 = vunpack.c.l.s8.bf16 %v1004_v42  ;;  %v1001_v47 = vld [vmem:[#allocation7 + $0x780] sm:$0xff] }
 0x290   :  { %v1497_v49 = vunpack.c.l.s8.bf16 %v1001_v47  ;;  %v1513_v55 = vunpack.c.h.s8.bf16 %v1001_v47  ;;  %v832_v47 = vld [vmem:[#allocation7 + $0x238] sm:$0xff] }
 0x292   :  { %1583 = vmatpush1.bf16.msra.mxu0 %v1353_v50  ;;  %1669 = vmatpush1.bf16.msra.mxu1 %v1355_v51  ;;  %v1499_v50 = vunpack.c.l.s8.bf16 %v1003_v48  ;;  %v1514_v51 = vunpack.c.h.s8.bf16 %v1002_v41  ;;  %v815_v41 = vld [vmem:[#allocation7 + $0x1b0] sm:$0xff] }
 0x293   :  { %1584 = vmatprep.subr.bf16.mxu0 %v1370_v52  ;;  %1670 = vmatprep.subr.bf16.mxu1 %v1372_v53  ;;  %v1516_v52 = vunpack.c.h.s8.bf16 %v1004_v42  ;;  %v766_v53 = vld [vmem:[#allocation7 + $0x28] sm:$0xff] }
 0x296   :  { %1585 = vmatpush1.bf16.msra.mxu0 %v1369_v56  ;;  %1671 = vmatpush1.bf16.msra.mxu1 %v1371_v57  ;;  %v1515_v56 = vunpack.c.h.s8.bf16 %v1003_v48  ;;  %v1022_v57 = vunpack.c.l.s8.bf16 %v766_v53 }
 0x297   :  { %1586 = vmatprep.subr.bf16.mxu0 %v1386_v58  ;;  %1672 = vmatprep.subr.bf16.mxu1 %v1388_v59  ;;  %v1024_v58 = vunpack.c.l.s8.bf16 %v768_v54  ;;  %v765_v59 = vld [vmem:[#allocation7 + $0x20] sm:$0xff] }
 0x298   :  { %v1021_v61 = vunpack.c.l.s8.bf16 %v765_v59  ;;  %v1037_v3 = vunpack.c.h.s8.bf16 %v765_v59  ;;  %v848_v59 = vld [vmem:[#allocation7 + $0x2b8] sm:$0xff] }
 0x29a   :  { %1587 = vmatpush1.bf16.msra.mxu0 %v1385_v62  ;;  %1673 = vmatpush1.bf16.msra.mxu1 %v1387_v63  ;;  %v1023_v62 = vunpack.c.l.s8.bf16 %v767_v60  ;;  %v1038_v63 = vunpack.c.h.s8.bf16 %v766_v53  ;;  %v831_v53 = vld [vmem:[#allocation7 + $0x230] sm:$0xff] }
 0x29b   :  { %1588 = vmatprep.subr.bf16.mxu0 %v1402_v0  ;;  %1674 = vmatprep.subr.bf16.mxu1 %v1404_v1  ;;  %v1040_v0 = vunpack.c.h.s8.bf16 %v768_v54  ;;  %v782_v1 = vld [vmem:[#allocation7 + $0xa8] sm:$0xff] }
 0x29e   :  { %1589 = vmatpush1.bf16.msra.mxu0 %v1401_v4  ;;  %1675 = vmatpush1.bf16.msra.mxu1 %v1403_v5  ;;  %v1039_v4 = vunpack.c.h.s8.bf16 %v767_v60  ;;  %v1054_v5 = vunpack.c.l.s8.bf16 %v782_v1 }
 0x29f   :  { %1590 = vmatprep.subr.bf16.mxu0 %v1418_v6  ;;  %1676 = vmatprep.subr.bf16.mxu1 %v1420_v7  ;;  %v781_v6 = vld [vmem:[#allocation7 + $0xa0] sm:$0xff]  ;;  %v1056_v7 = vunpack.c.l.s8.bf16 %v784_v2 }
 0x2a0   :  { %v1053_v8 = vunpack.c.l.s8.bf16 %v781_v6  ;;  %v1069_v21 = vunpack.c.h.s8.bf16 %v781_v6  ;;  %v862_v6 = vld [vmem:[#allocation7 + $0x328] sm:$0xff] }
 0x2a2   :  { %1591 = vmatpush1.bf16.msra.mxu0 %v1417_v9  ;;  %1677 = vmatpush1.bf16.msra.mxu1 %v1419_v14  ;;  %v1055_v9 = vunpack.c.l.s8.bf16 %v783_v16  ;;  %v1070_v14 = vunpack.c.h.s8.bf16 %v782_v1  ;;  %v847_v1 = vld [vmem:[#allocation7 + $0x2b0] sm:$0xff] }
 0x2a3   :  { %1592 = vmatprep.subr.bf16.mxu0 %v1434_v15  ;;  %1678 = vmatprep.subr.bf16.mxu1 %v1436_v17  ;;  %v1072_v15 = vunpack.c.h.s8.bf16 %v784_v2  ;;  %v798_v17 = vld [vmem:[#allocation7 + $0x128] sm:$0xff] }
 0x2a6   :  { %1593 = vmatpush1.bf16.msra.mxu0 %v1433_v18  ;;  %1679 = vmatpush1.bf16.msra.mxu1 %v1435_v22  ;;  %v1071_v18 = vunpack.c.h.s8.bf16 %v783_v16  ;;  %v1086_v22 = vunpack.c.l.s8.bf16 %v798_v17 }
 0x2a7   :  { %1594 = vmatprep.subr.bf16.mxu0 %v1450_v27  ;;  %1680 = vmatprep.subr.bf16.mxu1 %v1452_v28  ;;  %v797_v27 = vld [vmem:[#allocation7 + $0x120] sm:$0xff]  ;;  %v1088_v28 = vunpack.c.l.s8.bf16 %v800_v20 }
 0x2a8   :  { %v1085_v32 = vunpack.c.l.s8.bf16 %v797_v27  ;;  %v1101_v36 = vunpack.c.h.s8.bf16 %v797_v27  ;;  %v878_v27 = vld [vmem:[#allocation7 + $0x3a8] sm:$0xff] }
 0x2aa   :  { %1595 = vmatpush1.bf16.msra.mxu0 %v1449_v19  ;;  %1681 = vmatpush1.bf16.msra.mxu1 %v1451_v25  ;;  %v1087_v19 = vunpack.c.l.s8.bf16 %v799_v30  ;;  %v1102_v25 = vunpack.c.h.s8.bf16 %v798_v17  ;;  %v863_v17 = vld [vmem:[#allocation7 + $0x330] sm:$0xff] }
 0x2ab   :  { %1596 = vmatprep.subr.bf16.mxu0 %v1466_v33  ;;  %1682 = vmatprep.subr.bf16.mxu1 %v1468_v34  ;;  %v1104_v33 = vunpack.c.h.s8.bf16 %v800_v20  ;;  %v814_v34 = vld [vmem:[#allocation7 + $0x1a8] sm:$0xff] }
 0x2ae   :  { %1597 = vmatpush1.bf16.msra.mxu0 %v1465_v37  ;;  %1683 = vmatpush1.bf16.msra.mxu1 %v1467_v38  ;;  %v1103_v37 = vunpack.c.h.s8.bf16 %v799_v30  ;;  %v1118_v38 = vunpack.c.l.s8.bf16 %v814_v34 }
 0x2af   :  { %1598 = vmatprep.subr.bf16.mxu0 %v1482_v39  ;;  %1684 = vmatprep.subr.bf16.mxu1 %v1484_v40  ;;  %v813_v39 = vld [vmem:[#allocation7 + $0x1a0] sm:$0xff]  ;;  %v1120_v40 = vunpack.c.l.s8.bf16 %v816_v35 }
 0x2b0   :  { %v1117_v42 = vunpack.c.l.s8.bf16 %v813_v39  ;;  %v1133_v48 = vunpack.c.h.s8.bf16 %v813_v39  ;;  %v894_v39 = vld [vmem:[#allocation7 + $0x428] sm:$0xff] }
 0x2b2   :  { %1599 = vmatpush1.bf16.msra.mxu0 %v1481_v43  ;;  %1685 = vmatpush1.bf16.msra.mxu1 %v1483_v44  ;;  %v1119_v43 = vunpack.c.l.s8.bf16 %v815_v41  ;;  %v1134_v44 = vunpack.c.h.s8.bf16 %v814_v34  ;;  %v879_v34 = vld [vmem:[#allocation7 + $0x3b0] sm:$0xff] }
 0x2b3   :  { %1600 = vmatprep.subr.bf16.mxu0 %v1498_v45  ;;  %1686 = vmatprep.subr.bf16.mxu1 %v1500_v46  ;;  %v1136_v45 = vunpack.c.h.s8.bf16 %v816_v35  ;;  %v830_v46 = vld [vmem:[#allocation7 + $0x228] sm:$0xff] }
 0x2b6   :  { %1601 = vmatpush1.bf16.msra.mxu0 %v1497_v49  ;;  %1687 = vmatpush1.bf16.msra.mxu1 %v1499_v50  ;;  %v1135_v49 = vunpack.c.h.s8.bf16 %v815_v41  ;;  %v1150_v50 = vunpack.c.l.s8.bf16 %v830_v46 }
 0x2b7   :  { %1602 = vmatprep.subr.bf16.mxu0 %v1514_v51  ;;  %1688 = vmatprep.subr.bf16.mxu1 %v1516_v52  ;;  %v829_v51 = vld [vmem:[#allocation7 + $0x220] sm:$0xff]  ;;  %v1152_v52 = vunpack.c.l.s8.bf16 %v832_v47 }
 0x2b8   :  { %v1149_v54 = vunpack.c.l.s8.bf16 %v829_v51  ;;  %v1165_v60 = vunpack.c.h.s8.bf16 %v829_v51 }
 0x2ba   :  { %1603 = vmatpush1.bf16.msra.mxu0 %v1513_v55  ;;  %1689 = vmatpush1.bf16.msra.mxu1 %v1515_v56  ;;  %v1151_v55 = vunpack.c.l.s8.bf16 %v831_v53  ;;  %v1166_v56 = vunpack.c.h.s8.bf16 %v830_v46  ;;  %v895_v46 = vld [vmem:[#allocation7 + $0x430] sm:$0xff] }
 0x2bb   :  { %1701 = vmatprep.subr.bf16.mxu0 %v1022_v57  ;;  %1787 = vmatprep.subr.bf16.mxu1 %v1024_v58  ;;  %v1168_v57 = vunpack.c.h.s8.bf16 %v832_v47  ;;  %v846_v58 = vld [vmem:[#allocation7 + $0x2a8] sm:$0xff] }
 0x2bd   :  { %1605 = vmatmul.mubr.bf16.vlgmr.msra.gmra.mrb[8].mxu0 %v3604_v11  ;;  %1691 = vmatmul.mubr.bf16.vlgmr.msra.gmra.mrb[8].mxu1 %v3604_v11 }
 0x2be   :  { %1702 = vmatpush1.bf16.msra.mxu0 %v1021_v61  ;;  %1733 = vmatprep.mubr.bf16.mxu0 %v3606_v12  ;;  %v1167_v61 = vunpack.c.h.s8.bf16 %v831_v53 }
 0x2bf   :  { %1788 = vmatpush1.bf16.msra.mxu1 %v1023_v62  ;;  %1819 = vmatprep.mubr.bf16.mxu1 %v3606_v12  ;;  %v1182_v62 = vunpack.c.l.s8.bf16 %v846_v58 }
 0x2c0   :  { %1703 = vmatprep.subr.bf16.mxu0 %v1038_v63  ;;  %1789 = vmatprep.subr.bf16.mxu1 %v1040_v0  ;;  %v845_v63 = vld [vmem:[#allocation7 + $0x2a0] sm:$0xff]  ;;  %v1184_v0 = vunpack.c.l.s8.bf16 %v848_v59 }
 0x2c1   :  { %v1181_v2 = vunpack.c.l.s8.bf16 %v845_v63  ;;  %v1197_v16 = vunpack.c.h.s8.bf16 %v845_v63  ;;  %v926_v63 = vld [vmem:[#allocation7 + $0x528] sm:$0xff] }
 0x2c2   :  { %1704 = vmatpush1.bf16.msra.mxu0 %v1037_v3  ;;  %v1183_v3 = vunpack.c.l.s8.bf16 %v847_v1 }
 0x2c3   :  { %1790 = vmatpush1.bf16.msra.mxu1 %v1039_v4  ;;  %1705 = vmatprep.subr.bf16.mxu0 %v1054_v5  ;;  %v1198_v4 = vunpack.c.h.s8.bf16 %v846_v58  ;;  %v1200_v5 = vunpack.c.h.s8.bf16 %v848_v59  ;;  %v911_v58 = vld [vmem:[#allocation7 + $0x4b0] sm:$0xff] }
 0x2c4   :  { %1791 = vmatprep.subr.bf16.mxu1 %v1056_v7  ;;  %v864_v7 = vld [vmem:[#allocation7 + $0x338] sm:$0xff] }
 0x2c6   :  { %1706 = vmatpush1.bf16.msra.mxu0 %v1053_v8  ;;  %v1199_v8 = vunpack.c.h.s8.bf16 %v847_v1 }
 0x2c7   :  { %1792 = vmatpush1.bf16.msra.mxu1 %v1055_v9  ;;  %1707 = vmatprep.subr.bf16.mxu0 %v1070_v14  ;;  %v1214_v9 = vunpack.c.l.s8.bf16 %v862_v6  ;;  %v861_v14 = vld [vmem:[#allocation7 + $0x320] sm:$0xff] }
 0x2c8   :  { %1793 = vmatprep.subr.bf16.mxu1 %v1072_v15  ;;  %v1216_v15 = vunpack.c.l.s8.bf16 %v864_v7  ;;  %v1213_v20 = vunpack.c.l.s8.bf16 %v861_v14  ;;  %v1229_v30 = vunpack.c.h.s8.bf16 %v861_v14  ;;  %v942_v14 = vld [vmem:[#allocation7 + $0x5a8] sm:$0xff] }
 0x2ca   :  { %1708 = vmatpush1.bf16.msra.mxu0 %v1069_v21  ;;  %v1215_v21 = vunpack.c.l.s8.bf16 %v863_v17 }
 0x2cb   :  { %1794 = vmatpush1.bf16.msra.mxu1 %v1071_v18  ;;  %1709 = vmatprep.subr.bf16.mxu0 %v1086_v22  ;;  %v1230_v18 = vunpack.c.h.s8.bf16 %v862_v6  ;;  %v1232_v22 = vunpack.c.h.s8.bf16 %v864_v7  ;;  %v927_v6 = vld [vmem:[#allocation7 + $0x530] sm:$0xff] }
 0x2cc   :  { %1795 = vmatprep.subr.bf16.mxu1 %v1088_v28  ;;  %v880_v28 = vld [vmem:[#allocation7 + $0x3b8] sm:$0xff] }
 0x2ce   :  { %1710 = vmatpush1.bf16.msra.mxu0 %v1085_v32  ;;  %v1231_v32 = vunpack.c.h.s8.bf16 %v863_v17 }
 0x2cf   :  { %1796 = vmatpush1.bf16.msra.mxu1 %v1087_v19  ;;  %1711 = vmatprep.subr.bf16.mxu0 %v1102_v25  ;;  %v1246_v19 = vunpack.c.l.s8.bf16 %v878_v27  ;;  %v877_v25 = vld [vmem:[#allocation7 + $0x3a0] sm:$0xff] }
 0x2d0   :  { %1797 = vmatprep.subr.bf16.mxu1 %v1104_v33  ;;  %v1248_v33 = vunpack.c.l.s8.bf16 %v880_v28  ;;  %v1245_v35 = vunpack.c.l.s8.bf16 %v877_v25  ;;  %v1261_v41 = vunpack.c.h.s8.bf16 %v877_v25  ;;  %v958_v25 = vld [vmem:[#allocation7 + $0x628] sm:$0xff] }
 0x2d2   :  { %1712 = vmatpush1.bf16.msra.mxu0 %v1101_v36  ;;  %v1247_v36 = vunpack.c.l.s8.bf16 %v879_v34 }
 0x2d3   :  { %1798 = vmatpush1.bf16.msra.mxu1 %v1103_v37  ;;  %1713 = vmatprep.subr.bf16.mxu0 %v1118_v38  ;;  %v1262_v37 = vunpack.c.h.s8.bf16 %v878_v27  ;;  %v1264_v38 = vunpack.c.h.s8.bf16 %v880_v28  ;;  %v943_v27 = vld [vmem:[#allocation7 + $0x5b0] sm:$0xff] }
 0x2d4   :  { %1799 = vmatprep.subr.bf16.mxu1 %v1120_v40  ;;  %v896_v40 = vld [vmem:[#allocation7 + $0x438] sm:$0xff] }
 0x2d5   :  { %v1296_v51 = vunpack.c.h.s8.bf16 %v896_v40 }
 0x2d6   :  { %1714 = vmatpush1.bf16.msra.mxu0 %v1117_v42  ;;  %v1263_v42 = vunpack.c.h.s8.bf16 %v879_v34 }
 0x2d7   :  { %1800 = vmatpush1.bf16.msra.mxu1 %v1119_v43  ;;  %1715 = vmatprep.subr.bf16.mxu0 %v1134_v44  ;;  %v1278_v43 = vunpack.c.l.s8.bf16 %v894_v39  ;;  %v893_v44 = vld [vmem:[#allocation7 + $0x420] sm:$0xff] }
 0x2d8   :  { %1801 = vmatprep.subr.bf16.mxu1 %v1136_v45  ;;  %v1280_v45 = vunpack.c.l.s8.bf16 %v896_v40  ;;  %v1277_v47 = vunpack.c.l.s8.bf16 %v893_v44  ;;  %v1293_v53 = vunpack.c.h.s8.bf16 %v893_v44  ;;  %v974_v44 = vld [vmem:[#allocation7 + $0x6a8] sm:$0xff] }
 0x2da   :  { %1716 = vmatpush1.bf16.msra.mxu0 %v1133_v48  ;;  %v1279_v48 = vunpack.c.l.s8.bf16 %v895_v46 }
 0x2db   :  { %1802 = vmatpush1.bf16.msra.mxu1 %v1135_v49  ;;  %1717 = vmatprep.subr.bf16.mxu0 %v1150_v50  ;;  %v1294_v49 = vunpack.c.h.s8.bf16 %v894_v39  ;;  %v910_v50 = vld [vmem:[#allocation7 + $0x4a8] sm:$0xff]  ;;  %v959_v39 = vld [vmem:[#allocation7 + $0x630] sm:$0xff] }
 0x2dc   :  { %1803 = vmatprep.subr.bf16.mxu1 %v1152_v52  ;;  %v912_v52 = vld [vmem:[#allocation7 + $0x4b8] sm:$0xff] }
 0x2de   :  { %1718 = vmatpush1.bf16.msra.mxu0 %v1149_v54  ;;  %v1295_v54 = vunpack.c.h.s8.bf16 %v895_v46 }
 0x2df   :  { %1804 = vmatpush1.bf16.msra.mxu1 %v1151_v55  ;;  %1719 = vmatprep.subr.bf16.mxu0 %v1166_v56  ;;  %v1310_v55 = vunpack.c.l.s8.bf16 %v910_v50  ;;  %v909_v56 = vld [vmem:[#allocation7 + $0x4a0] sm:$0xff] }
 0x2e0   :  { %1805 = vmatprep.subr.bf16.mxu1 %v1168_v57  ;;  %v1312_v57 = vunpack.c.l.s8.bf16 %v912_v52  ;;  %v1309_v59 = vunpack.c.l.s8.bf16 %v909_v56  ;;  %v1325_v1 = vunpack.c.h.s8.bf16 %v909_v56  ;;  %v990_v56 = vld [vmem:[#allocation7 + $0x728] sm:$0xff] }
 0x2e2   :  { %1720 = vmatpush1.bf16.msra.mxu0 %v1165_v60  ;;  %v1311_v60 = vunpack.c.l.s8.bf16 %v911_v58 }
 0x2e3   :  { %1806 = vmatpush1.bf16.msra.mxu1 %v1167_v61  ;;  %1721 = vmatprep.subr.bf16.mxu0 %v1182_v62  ;;  %v1326_v61 = vunpack.c.h.s8.bf16 %v910_v50  ;;  %v1328_v62 = vunpack.c.h.s8.bf16 %v912_v52 }
 0x2e4   :  { %1807 = vmatprep.subr.bf16.mxu1 %v1184_v0  ;;  %v928_v0 = vld [vmem:[#allocation7 + $0x538] sm:$0xff] }
 0x2e6   :  { %1722 = vmatpush1.bf16.msra.mxu0 %v1181_v2  ;;  %v1327_v2 = vunpack.c.h.s8.bf16 %v911_v58 }
 0x2e7   :  { %1808 = vmatpush1.bf16.msra.mxu1 %v1183_v3  ;;  %1723 = vmatprep.subr.bf16.mxu0 %v1198_v4  ;;  %v1342_v3 = vunpack.c.l.s8.bf16 %v926_v63  ;;  %v925_v4 = vld [vmem:[#allocation7 + $0x520] sm:$0xff] }
 0x2e8   :  { %1809 = vmatprep.subr.bf16.mxu1 %v1200_v5  ;;  %v1344_v5 = vunpack.c.l.s8.bf16 %v928_v0  ;;  %v1341_v7 = vunpack.c.l.s8.bf16 %v925_v4  ;;  %v1357_v17 = vunpack.c.h.s8.bf16 %v925_v4  ;;  %v1006_v4 = vld [vmem:[#allocation7 + $0x7a8] sm:$0xff] }
 0x2ea   :  { %1724 = vmatpush1.bf16.msra.mxu0 %v1197_v16  ;;  %v1343_v16 = vunpack.c.l.s8.bf16 %v927_v6 }
 0x2eb   :  { %1810 = vmatpush1.bf16.msra.mxu1 %v1199_v8  ;;  %1725 = vmatprep.subr.bf16.mxu0 %v1214_v9  ;;  %v1358_v8 = vunpack.c.h.s8.bf16 %v926_v63  ;;  %v1360_v9 = vunpack.c.h.s8.bf16 %v928_v0  ;;  %v991_v63 = vld [vmem:[#allocation7 + $0x730] sm:$0xff] }
 0x2ec   :  { %1811 = vmatprep.subr.bf16.mxu1 %v1216_v15  ;;  %v944_v15 = vld [vmem:[#allocation7 + $0x5b8] sm:$0xff] }
 0x2ee   :  { %1726 = vmatpush1.bf16.msra.mxu0 %v1213_v20  ;;  %v1359_v20 = vunpack.c.h.s8.bf16 %v927_v6 }
 0x2ef   :  { %1812 = vmatpush1.bf16.msra.mxu1 %v1215_v21  ;;  %1727 = vmatprep.subr.bf16.mxu0 %v1230_v18  ;;  %v1374_v21 = vunpack.c.l.s8.bf16 %v942_v14  ;;  %v941_v18 = vld [vmem:[#allocation7 + $0x5a0] sm:$0xff] }
 0x2f0   :  { %1813 = vmatprep.subr.bf16.mxu1 %v1232_v22  ;;  %v1376_v22 = vunpack.c.l.s8.bf16 %v944_v15  ;;  %v1373_v28 = vunpack.c.l.s8.bf16 %v941_v18  ;;  %v1389_v34 = vunpack.c.h.s8.bf16 %v941_v18  ;;  %v770_v18 = vld [vmem:[#allocation7 + $0x48] sm:$0xff] }
 0x2f2   :  { %1728 = vmatpush1.bf16.msra.mxu0 %v1229_v30  ;;  %v1375_v30 = vunpack.c.l.s8.bf16 %v943_v27 }
 0x2f3   :  { %1814 = vmatpush1.bf16.msra.mxu1 %v1231_v32  ;;  %1729 = vmatprep.subr.bf16.mxu0 %v1246_v19  ;;  %v1390_v32 = vunpack.c.h.s8.bf16 %v942_v14  ;;  %v1392_v19 = vunpack.c.h.s8.bf16 %v944_v15  ;;  %v1007_v14 = vld [vmem:[#allocation7 + $0x7b0] sm:$0xff] }
 0x2f4   :  { %1815 = vmatprep.subr.bf16.mxu1 %v1248_v33  ;;  %v960_v33 = vld [vmem:[#allocation7 + $0x638] sm:$0xff] }
 0x2f6   :  { %1730 = vmatpush1.bf16.msra.mxu0 %v1245_v35  ;;  %v1391_v35 = vunpack.c.h.s8.bf16 %v943_v27 }
 0x2f7   :  { %1816 = vmatpush1.bf16.msra.mxu1 %v1247_v36  ;;  %1731 = vmatprep.subr.bf16.mxu0 %v1262_v37  ;;  %v1406_v36 = vunpack.c.l.s8.bf16 %v958_v25  ;;  %v957_v37 = vld [vmem:[#allocation7 + $0x620] sm:$0xff] }
 0x2f8   :  { %1817 = vmatprep.subr.bf16.mxu1 %v1264_v38  ;;  %v1408_v38 = vunpack.c.l.s8.bf16 %v960_v33  ;;  %v1405_v40 = vunpack.c.l.s8.bf16 %v957_v37  ;;  %v1421_v46 = vunpack.c.h.s8.bf16 %v957_v37 }
 0x2fa   :  { %1732 = vmatpush1.bf16.msra.mxu0 %v1261_v41  ;;  %v1407_v41 = vunpack.c.l.s8.bf16 %v959_v39 }
 0x2fb   :  { %1818 = vmatpush1.bf16.msra.mxu1 %v1263_v42  ;;  %1744 = vmatprep.subr.bf16.mxu0 %v1278_v43  ;;  %v1422_v42 = vunpack.c.h.s8.bf16 %v958_v25  ;;  %v1424_v43 = vunpack.c.h.s8.bf16 %v960_v33  ;;  %v771_v25 = vld [vmem:[#allocation7 + $0x50] sm:$0xff] }
 0x2fc   :  { %1830 = vmatprep.subr.bf16.mxu1 %v1280_v45  ;;  %v976_v45 = vld [vmem:[#allocation7 + $0x6b8] sm:$0xff] }
 0x2fd   :  { %1734 = vmatmul.mubr.bf16.vlgmr.msra.gmra.mrb[12].mxu0 %v3602_v10  ;;  %v1440_v50 = vunpack.c.l.s8.bf16 %v976_v45 }
 0x2fe   :  { %1820 = vmatmul.mubr.bf16.vlgmr.msra.gmra.mrb[12].mxu1 %v3602_v10  ;;  %1745 = vmatpush1.bf16.msra.mxu0 %v1277_v47  ;;  %v1423_v47 = vunpack.c.h.s8.bf16 %v959_v39 }
 0x2ff   :  { %1776 = vmatprep.mubr.bf16.mxu0 %v3608_v13  ;;  %1831 = vmatpush1.bf16.msra.mxu1 %v1279_v48  ;;  %v1438_v48 = vunpack.c.l.s8.bf16 %v974_v44 }
 0x300   :  { %1862 = vmatprep.mubr.bf16.mxu1 %v3608_v13  ;;  %1746 = vmatprep.subr.bf16.mxu0 %v1294_v49  ;;  %v973_v49 = vld [vmem:[#allocation7 + $0x6a0] sm:$0xff] }
 0x301   :  { %1832 = vmatprep.subr.bf16.mxu1 %v1296_v51  ;;  %v975_v51 = vld [vmem:[#allocation7 + $0x6b0] sm:$0xff]  ;;  %v1437_v52 = vunpack.c.l.s8.bf16 %v973_v49  ;;  %v1453_v58 = vunpack.c.h.s8.bf16 %v973_v49  ;;  %v802_v49 = vld [vmem:[#allocation7 + $0x148] sm:$0xff] }
 0x302   :  { %1747 = vmatpush1.bf16.msra.mxu0 %v1293_v53  ;;  %v1439_v53 = vunpack.c.l.s8.bf16 %v975_v51 }
 0x303   :  { %1833 = vmatpush1.bf16.msra.mxu1 %v1295_v54  ;;  %1748 = vmatprep.subr.bf16.mxu0 %v1310_v55  ;;  %v1454_v54 = vunpack.c.h.s8.bf16 %v974_v44  ;;  %v1456_v55 = vunpack.c.h.s8.bf16 %v976_v45  ;;  %v787_v44 = vld [vmem:[#allocation7 + $0xd0] sm:$0xff] }
 0x304   :  { %1834 = vmatprep.subr.bf16.mxu1 %v1312_v57  ;;  %v992_v57 = vld [vmem:[#allocation7 + $0x738] sm:$0xff] }
 0x306   :  { %1749 = vmatpush1.bf16.msra.mxu0 %v1309_v59  ;;  %v1455_v59 = vunpack.c.h.s8.bf16 %v975_v51 }
 0x307   :  { %1835 = vmatpush1.bf16.msra.mxu1 %v1311_v60  ;;  %1750 = vmatprep.subr.bf16.mxu0 %v1326_v61  ;;  %v1470_v60 = vunpack.c.l.s8.bf16 %v990_v56  ;;  %v989_v61 = vld [vmem:[#allocation7 + $0x720] sm:$0xff] }
 0x308   :  { %1836 = vmatprep.subr.bf16.mxu1 %v1328_v62  ;;  %v1472_v62 = vunpack.c.l.s8.bf16 %v992_v57  ;;  %v1469_v0 = vunpack.c.l.s8.bf16 %v989_v61  ;;  %v1485_v6 = vunpack.c.h.s8.bf16 %v989_v61  ;;  %v818_v61 = vld [vmem:[#allocation7 + $0x1c8] sm:$0xff] }
 0x30a   :  { %1751 = vmatpush1.bf16.msra.mxu0 %v1325_v1  ;;  %v1471_v1 = vunpack.c.l.s8.bf16 %v991_v63 }
 0x30b   :  { %1837 = vmatpush1.bf16.msra.mxu1 %v1327_v2  ;;  %1752 = vmatprep.subr.bf16.mxu0 %v1342_v3  ;;  %v1486_v2 = vunpack.c.h.s8.bf16 %v990_v56  ;;  %v1488_v3 = vunpack.c.h.s8.bf16 %v992_v57  ;;  %v803_v56 = vld [vmem:[#allocation7 + $0x150] sm:$0xff] }
 0x30c   :  { %1838 = vmatprep.subr.bf16.mxu1 %v1344_v5  ;;  %v1008_v5 = vld [vmem:[#allocation7 + $0x7b8] sm:$0xff] }
 0x30e   :  { %1753 = vmatpush1.bf16.msra.mxu0 %v1341_v7  ;;  %v1487_v7 = vunpack.c.h.s8.bf16 %v991_v63 }
 0x30f   :  { %1839 = vmatpush1.bf16.msra.mxu1 %v1343_v16  ;;  %1754 = vmatprep.subr.bf16.mxu0 %v1358_v8  ;;  %v1502_v16 = vunpack.c.l.s8.bf16 %v1006_v4  ;;  %v1005_v8 = vld [vmem:[#allocation7 + $0x7a0] sm:$0xff] }
 0x310   :  { %1840 = vmatprep.subr.bf16.mxu1 %v1360_v9  ;;  %v1504_v9 = vunpack.c.l.s8.bf16 %v1008_v5  ;;  %v1501_v15 = vunpack.c.l.s8.bf16 %v1005_v8  ;;  %v1517_v27 = vunpack.c.h.s8.bf16 %v1005_v8  ;;  %v834_v8 = vld [vmem:[#allocation7 + $0x248] sm:$0xff] }
 0x312   :  { %1755 = vmatpush1.bf16.msra.mxu0 %v1357_v17  ;;  %v1503_v17 = vunpack.c.l.s8.bf16 %v1007_v14 }
 0x313   :  { %1841 = vmatpush1.bf16.msra.mxu1 %v1359_v20  ;;  %1756 = vmatprep.subr.bf16.mxu0 %v1374_v21  ;;  %v1518_v20 = vunpack.c.h.s8.bf16 %v1006_v4  ;;  %v1520_v21 = vunpack.c.h.s8.bf16 %v1008_v5  ;;  %v819_v4 = vld [vmem:[#allocation7 + $0x1d0] sm:$0xff] }
 0x314   :  { %1842 = vmatprep.subr.bf16.mxu1 %v1376_v22  ;;  %v772_v22 = vld [vmem:[#allocation7 + $0x58] sm:$0xff] }
 0x315   :  { %v1044_v37 = vunpack.c.h.s8.bf16 %v772_v22 }
 0x316   :  { %1757 = vmatpush1.bf16.msra.mxu0 %v1373_v28  ;;  %v1519_v28 = vunpack.c.h.s8.bf16 %v1007_v14 }
 0x317   :  { %1843 = vmatpush1.bf16.msra.mxu1 %v1375_v30  ;;  %1758 = vmatprep.subr.bf16.mxu0 %v1390_v32  ;;  %v1026_v30 = vunpack.c.l.s8.bf16 %v770_v18  ;;  %v769_v32 = vld [vmem:[#allocation7 + $0x40] sm:$0xff] }
 0x318   :  { %1844 = vmatprep.subr.bf16.mxu1 %v1392_v19  ;;  %v1028_v19 = vunpack.c.l.s8.bf16 %v772_v22  ;;  %v1025_v33 = vunpack.c.l.s8.bf16 %v769_v32  ;;  %v1041_v39 = vunpack.c.h.s8.bf16 %v769_v32  ;;  %v850_v32 = vld [vmem:[#allocation7 + $0x2c8] sm:$0xff] }
 0x31a   :  { %1759 = vmatpush1.bf16.msra.mxu0 %v1389_v34  ;;  %v1027_v34 = vunpack.c.l.s8.bf16 %v771_v25 }
 0x31b   :  { %1845 = vmatpush1.bf16.msra.mxu1 %v1391_v35  ;;  %1760 = vmatprep.subr.bf16.mxu0 %v1406_v36  ;;  %v1042_v35 = vunpack.c.h.s8.bf16 %v770_v18  ;;  %v786_v36 = vld [vmem:[#allocation7 + $0xc8] sm:$0xff]  ;;  %v835_v18 = vld [vmem:[#allocation7 + $0x250] sm:$0xff] }
 0x31c   :  { %1846 = vmatprep.subr.bf16.mxu1 %v1408_v38  ;;  %v788_v38 = vld [vmem:[#allocation7 + $0xd8] sm:$0xff] }
 0x31e   :  { %1761 = vmatpush1.bf16.msra.mxu0 %v1405_v40  ;;  %v1043_v40 = vunpack.c.h.s8.bf16 %v771_v25 }
 0x31f   :  { %1847 = vmatpush1.bf16.msra.mxu1 %v1407_v41  ;;  %1762 = vmatprep.subr.bf16.mxu0 %v1422_v42  ;;  %v1058_v41 = vunpack.c.l.s8.bf16 %v786_v36  ;;  %v785_v42 = vld [vmem:[#allocation7 + $0xc0] sm:$0xff] }
 0x320   :  { %1848 = vmatprep.subr.bf16.mxu1 %v1424_v43  ;;  %v1060_v43 = vunpack.c.l.s8.bf16 %v788_v38  ;;  %v1057_v45 = vunpack.c.l.s8.bf16 %v785_v42  ;;  %v1073_v51 = vunpack.c.h.s8.bf16 %v785_v42  ;;  %v866_v42 = vld [vmem:[#allocation7 + $0x348] sm:$0xff] }
 0x322   :  { %1763 = vmatpush1.bf16.msra.mxu0 %v1421_v46  ;;  %v1059_v46 = vunpack.c.l.s8.bf16 %v787_v44 }
 0x323   :  { %1849 = vmatpush1.bf16.msra.mxu1 %v1423_v47  ;;  %1764 = vmatprep.subr.bf16.mxu0 %v1438_v48  ;;  %v1074_v47 = vunpack.c.h.s8.bf16 %v786_v36  ;;  %v1076_v48 = vunpack.c.h.s8.bf16 %v788_v38 }
 0x324   :  { %1850 = vmatprep.subr.bf16.mxu1 %v1440_v50  ;;  %v804_v50 = vld [vmem:[#allocation7 + $0x158] sm:$0xff] }
 0x326   :  { %1765 = vmatpush1.bf16.msra.mxu0 %v1437_v52  ;;  %v1075_v52 = vunpack.c.h.s8.bf16 %v787_v44 }
 0x327   :  { %1851 = vmatpush1.bf16.msra.mxu1 %v1439_v53  ;;  %1766 = vmatprep.subr.bf16.mxu0 %v1454_v54  ;;  %v1090_v53 = vunpack.c.l.s8.bf16 %v802_v49  ;;  %v801_v54 = vld [vmem:[#allocation7 + $0x140] sm:$0xff] }
 0x328   :  { %1852 = vmatprep.subr.bf16.mxu1 %v1456_v55  ;;  %v1092_v55 = vunpack.c.l.s8.bf16 %v804_v50  ;;  %v1089_v57 = vunpack.c.l.s8.bf16 %v801_v54  ;;  %v1105_v63 = vunpack.c.h.s8.bf16 %v801_v54  ;;  %v882_v54 = vld [vmem:[#allocation7 + $0x3c8] sm:$0xff] }
 0x32a   :  { %1767 = vmatpush1.bf16.msra.mxu0 %v1453_v58  ;;  %v1091_v58 = vunpack.c.l.s8.bf16 %v803_v56 }
 0x32b   :  { %1853 = vmatpush1.bf16.msra.mxu1 %v1455_v59  ;;  %1768 = vmatprep.subr.bf16.mxu0 %v1470_v60  ;;  %v1106_v59 = vunpack.c.h.s8.bf16 %v802_v49  ;;  %v1108_v60 = vunpack.c.h.s8.bf16 %v804_v50  ;;  %v867_v49 = vld [vmem:[#allocation7 + $0x350] sm:$0xff] }
 0x32c   :  { %1854 = vmatprep.subr.bf16.mxu1 %v1472_v62  ;;  %v820_v62 = vld [vmem:[#allocation7 + $0x1d8] sm:$0xff] }
 0x32e   :  { %1769 = vmatpush1.bf16.msra.mxu0 %v1469_v0  ;;  %v1107_v0 = vunpack.c.h.s8.bf16 %v803_v56 }
 0x32f   :  { %1855 = vmatpush1.bf16.msra.mxu1 %v1471_v1  ;;  %1770 = vmatprep.subr.bf16.mxu0 %v1486_v2  ;;  %v1122_v1 = vunpack.c.l.s8.bf16 %v818_v61  ;;  %v817_v2 = vld [vmem:[#allocation7 + $0x1c0] sm:$0xff] }
 0x330   :  { %1856 = vmatprep.subr.bf16.mxu1 %v1488_v3  ;;  %v1124_v3 = vunpack.c.l.s8.bf16 %v820_v62  ;;  %v1121_v5 = vunpack.c.l.s8.bf16 %v817_v2  ;;  %v1137_v14 = vunpack.c.h.s8.bf16 %v817_v2  ;;  %v898_v2 = vld [vmem:[#allocation7 + $0x448] sm:$0xff] }
 0x332   :  { %1771 = vmatpush1.bf16.msra.mxu0 %v1485_v6  ;;  %v1123_v6 = vunpack.c.l.s8.bf16 %v819_v4 }
 0x333   :  { %1857 = vmatpush1.bf16.msra.mxu1 %v1487_v7  ;;  %1772 = vmatprep.subr.bf16.mxu0 %v1502_v16  ;;  %v1138_v7 = vunpack.c.h.s8.bf16 %v818_v61  ;;  %v1140_v16 = vunpack.c.h.s8.bf16 %v820_v62  ;;  %v883_v61 = vld [vmem:[#allocation7 + $0x3d0] sm:$0xff] }
 0x334   :  { %1858 = vmatprep.subr.bf16.mxu1 %v1504_v9  ;;  %v836_v9 = vld [vmem:[#allocation7 + $0x258] sm:$0xff] }
 0x336   :  { %1773 = vmatpush1.bf16.msra.mxu0 %v1501_v15  ;;  %v1139_v15 = vunpack.c.h.s8.bf16 %v819_v4 }
 0x337   :  { %1859 = vmatpush1.bf16.msra.mxu1 %v1503_v17  ;;  %1774 = vmatprep.subr.bf16.mxu0 %v1518_v20  ;;  %v1154_v17 = vunpack.c.l.s8.bf16 %v834_v8  ;;  %v833_v20 = vld [vmem:[#allocation7 + $0x240] sm:$0xff] }
 0x338   :  { %1860 = vmatprep.subr.bf16.mxu1 %v1520_v21  ;;  %v1156_v21 = vunpack.c.l.s8.bf16 %v836_v9  ;;  %v1153_v22 = vunpack.c.l.s8.bf16 %v833_v20  ;;  %v1169_v25 = vunpack.c.h.s8.bf16 %v833_v20 }
 0x33a   :  { %1775 = vmatpush1.bf16.msra.mxu0 %v1517_v27  ;;  %v1155_v27 = vunpack.c.l.s8.bf16 %v835_v18 }
 0x33b   :  { %1861 = vmatpush1.bf16.msra.mxu1 %v1519_v28  ;;  %1873 = vmatprep.subr.bf16.mxu0 %v1026_v30  ;;  %v1170_v28 = vunpack.c.h.s8.bf16 %v834_v8  ;;  %v1172_v30 = vunpack.c.h.s8.bf16 %v836_v9  ;;  %v899_v8 = vld [vmem:[#allocation7 + $0x450] sm:$0xff] }
 0x33c   :  { %1959 = vmatprep.subr.bf16.mxu1 %v1028_v19  ;;  %v852_v19 = vld [vmem:[#allocation7 + $0x2d8] sm:$0xff] }
 0x33d   :  { %1777 = vmatmul.mubr.bf16.vlgmr.msra.gmra.mrb[12].mxu0 %v3604_v11  ;;  %v1188_v36 = vunpack.c.l.s8.bf16 %v852_v19 }
 0x33e   :  { %1863 = vmatmul.mubr.bf16.vlgmr.msra.gmra.mrb[12].mxu1 %v3604_v11  ;;  %1874 = vmatpush1.bf16.msra.mxu0 %v1025_v33  ;;  %v1171_v33 = vunpack.c.h.s8.bf16 %v835_v18 }
 0x33f   :  { %1905 = vmatprep.mubr.bf16.mxu0 %v3606_v12  ;;  %1960 = vmatpush1.bf16.msra.mxu1 %v1027_v34  ;;  %v1186_v34 = vunpack.c.l.s8.bf16 %v850_v32 }
 0x340   :  { %1991 = vmatprep.mubr.bf16.mxu1 %v3606_v12  ;;  %1875 = vmatprep.subr.bf16.mxu0 %v1042_v35  ;;  %v849_v35 = vld [vmem:[#allocation7 + $0x2c0] sm:$0xff] }
 0x341   :  { %1961 = vmatprep.subr.bf16.mxu1 %v1044_v37  ;;  %v851_v37 = vld [vmem:[#allocation7 + $0x2d0] sm:$0xff]  ;;  %v1185_v38 = vunpack.c.l.s8.bf16 %v849_v35  ;;  %v1201_v44 = vunpack.c.h.s8.bf16 %v849_v35  ;;  %v930_v35 = vld [vmem:[#allocation7 + $0x548] sm:$0xff] }
 0x342   :  { %1876 = vmatpush1.bf16.msra.mxu0 %v1041_v39  ;;  %v1187_v39 = vunpack.c.l.s8.bf16 %v851_v37 }
 0x343   :  { %1962 = vmatpush1.bf16.msra.mxu1 %v1043_v40  ;;  %1877 = vmatprep.subr.bf16.mxu0 %v1058_v41  ;;  %v1202_v40 = vunpack.c.h.s8.bf16 %v850_v32  ;;  %v1204_v41 = vunpack.c.h.s8.bf16 %v852_v19  ;;  %v915_v32 = vld [vmem:[#allocation7 + $0x4d0] sm:$0xff] }
 0x344   :  { %1963 = vmatprep.subr.bf16.mxu1 %v1060_v43  ;;  %v868_v43 = vld [vmem:[#allocation7 + $0x358] sm:$0xff] }
 0x346   :  { %1878 = vmatpush1.bf16.msra.mxu0 %v1057_v45  ;;  %v1203_v45 = vunpack.c.h.s8.bf16 %v851_v37 }
 0x347   :  { %1964 = vmatpush1.bf16.msra.mxu1 %v1059_v46  ;;  %1879 = vmatprep.subr.bf16.mxu0 %v1074_v47  ;;  %v1218_v46 = vunpack.c.l.s8.bf16 %v866_v42  ;;  %v865_v47 = vld [vmem:[#allocation7 + $0x340] sm:$0xff] }
 0x348   :  { %1965 = vmatprep.subr.bf16.mxu1 %v1076_v48  ;;  %v1220_v48 = vunpack.c.l.s8.bf16 %v868_v43  ;;  %v1217_v50 = vunpack.c.l.s8.bf16 %v865_v47  ;;  %v1233_v56 = vunpack.c.h.s8.bf16 %v865_v47  ;;  %v3642_v47 = vld [vmem:[%s3813_s9] sm:$0xff] }
 0x34a   :  { %1880 = vmatpush1.bf16.msra.mxu0 %v1073_v51  ;;  %v1219_v51 = vunpack.c.l.s8.bf16 %v867_v49 }
 0x34b   :  { %1966 = vmatpush1.bf16.msra.mxu1 %v1075_v52  ;;  %1881 = vmatprep.subr.bf16.mxu0 %v1090_v53  ;;  %v1234_v52 = vunpack.c.h.s8.bf16 %v866_v42  ;;  %v1236_v53 = vunpack.c.h.s8.bf16 %v868_v43  ;;  %v931_v42 = vld [vmem:[#allocation7 + $0x550] sm:$0xff] }
 0x34c   :  { %1967 = vmatprep.subr.bf16.mxu1 %v1092_v55  ;;  %v884_v55 = vld [vmem:[#allocation7 + $0x3d8] sm:$0xff] }
 0x34e   :  { %1882 = vmatpush1.bf16.msra.mxu0 %v1089_v57  ;;  %v1235_v57 = vunpack.c.h.s8.bf16 %v867_v49 }
 0x34f   :  { %1968 = vmatpush1.bf16.msra.mxu1 %v1091_v58  ;;  %1883 = vmatprep.subr.bf16.mxu0 %v1106_v59  ;;  %v1250_v58 = vunpack.c.l.s8.bf16 %v882_v54  ;;  %v881_v59 = vld [vmem:[#allocation7 + $0x3c0] sm:$0xff] }
 0x350   :  { %1969 = vmatprep.subr.bf16.mxu1 %v1108_v60  ;;  %v1252_v60 = vunpack.c.l.s8.bf16 %v884_v55  ;;  %v1249_v62 = vunpack.c.l.s8.bf16 %v881_v59  ;;  %v1265_v4 = vunpack.c.h.s8.bf16 %v881_v59  ;;  %v1363_v59 = vunpack.c.h.s8.bf16 %v931_v42 }
 0x352   :  { %1884 = vmatpush1.bf16.msra.mxu0 %v1105_v63  ;;  %v1251_v63 = vunpack.c.l.s8.bf16 %v883_v61 }
 0x353   :  { %1970 = vmatpush1.bf16.msra.mxu1 %v1107_v0  ;;  %1885 = vmatprep.subr.bf16.mxu0 %v1122_v1  ;;  %v1266_v0 = vunpack.c.h.s8.bf16 %v882_v54  ;;  %v1268_v1 = vunpack.c.h.s8.bf16 %v884_v55  ;;  %v948_v55 = vld [vmem:[#allocation7 + $0x5d8] sm:$0xff] }
 0x354   :  { %1971 = vmatprep.subr.bf16.mxu1 %v1124_v3  ;;  %v900_v3 = vld [vmem:[#allocation7 + $0x458] sm:$0xff] }
 0x355   :  { %v1300_v20 = vunpack.c.h.s8.bf16 %v900_v3 }
 0x356   :  { %1886 = vmatpush1.bf16.msra.mxu0 %v1121_v5  ;;  %v1267_v5 = vunpack.c.h.s8.bf16 %v883_v61 }
 0x357   :  { %1972 = vmatpush1.bf16.msra.mxu1 %v1123_v6  ;;  %1887 = vmatprep.subr.bf16.mxu0 %v1138_v7  ;;  %v1282_v6 = vunpack.c.l.s8.bf16 %v898_v2  ;;  %v897_v7 = vld [vmem:[#allocation7 + $0x440] sm:$0xff] }
 0x358   :  { %1973 = vmatprep.subr.bf16.mxu1 %v1140_v16  ;;  %v1284_v16 = vunpack.c.l.s8.bf16 %v900_v3  ;;  %v1281_v9 = vunpack.c.l.s8.bf16 %v897_v7  ;;  %v1297_v18 = vunpack.c.h.s8.bf16 %v897_v7 }
 0x35a   :  { %1888 = vmatpush1.bf16.msra.mxu0 %v1137_v14  ;;  %v1283_v14 = vunpack.c.l.s8.bf16 %v899_v8 }
 0x35b   :  { %1974 = vmatpush1.bf16.msra.mxu1 %v1139_v15  ;;  %1889 = vmatprep.subr.bf16.mxu0 %v1154_v17  ;;  %v1298_v15 = vunpack.c.h.s8.bf16 %v898_v2  ;;  %v914_v17 = vld [vmem:[#allocation7 + $0x4c8] sm:$0xff] }
 0x35c   :  { %1975 = vmatprep.subr.bf16.mxu1 %v1156_v21  ;;  %v916_v21 = vld [vmem:[#allocation7 + $0x4d8] sm:$0xff] }
 0x35e   :  { %1890 = vmatpush1.bf16.msra.mxu0 %v1153_v22  ;;  %v1299_v22 = vunpack.c.h.s8.bf16 %v899_v8 }
 0x35f   :  { %1976 = vmatpush1.bf16.msra.mxu1 %v1155_v27  ;;  %1891 = vmatprep.subr.bf16.mxu0 %v1170_v28  ;;  %v1314_v27 = vunpack.c.l.s8.bf16 %v914_v17  ;;  %v913_v28 = vld [vmem:[#allocation7 + $0x4c0] sm:$0xff] }
 0x360   :  { %1977 = vmatprep.subr.bf16.mxu1 %v1172_v30  ;;  %v1316_v30 = vunpack.c.l.s8.bf16 %v916_v21  ;;  %v1313_v19 = vunpack.c.l.s8.bf16 %v913_v28  ;;  %v1329_v37 = vunpack.c.h.s8.bf16 %v913_v28 }
 0x362   :  { %1892 = vmatpush1.bf16.msra.mxu0 %v1169_v25  ;;  %v1315_v25 = vunpack.c.l.s8.bf16 %v915_v32 }
 0x363   :  { %1978 = vmatpush1.bf16.msra.mxu1 %v1171_v33  ;;  %1893 = vmatprep.subr.bf16.mxu0 %v1186_v34  ;;  %v1330_v33 = vunpack.c.h.s8.bf16 %v914_v17  ;;  %v1332_v34 = vunpack.c.h.s8.bf16 %v916_v21 }
 0x364   :  { %1979 = vmatprep.subr.bf16.mxu1 %v1188_v36  ;;  %v932_v36 = vld [vmem:[#allocation7 + $0x558] sm:$0xff] }
 0x366   :  { %1894 = vmatpush1.bf16.msra.mxu0 %v1185_v38  ;;  %v1331_v38 = vunpack.c.h.s8.bf16 %v915_v32 }
 0x367   :  { %1980 = vmatpush1.bf16.msra.mxu1 %v1187_v39  ;;  %1895 = vmatprep.subr.bf16.mxu0 %v1202_v40  ;;  %v1346_v39 = vunpack.c.l.s8.bf16 %v930_v35  ;;  %v929_v40 = vld [vmem:[#allocation7 + $0x540] sm:$0xff] }
 0x368   :  { %1981 = vmatprep.subr.bf16.mxu1 %v1204_v41  ;;  %v1348_v41 = vunpack.c.l.s8.bf16 %v932_v36  ;;  %v1345_v43 = vunpack.c.l.s8.bf16 %v929_v40  ;;  %v1361_v54 = vunpack.c.h.s8.bf16 %v929_v40 }
 0x36a   :  { %1896 = vmatpush1.bf16.msra.mxu0 %v1201_v44  ;;  %v3637_v44 = vld [vmem:[%s3812_s8] sm:$0xff] }
 0x36b   :  { %1982 = vmatpush1.bf16.msra.mxu1 %v1203_v45  ;;  %1897 = vmatprep.subr.bf16.mxu0 %v1218_v46  ;;  %v1347_v45 = vunpack.c.l.s8.bf16 %v931_v42  ;;  %v1362_v46 = vunpack.c.h.s8.bf16 %v930_v35  ;;  %v2224_v49 = vrot.slane %v3637_v44, %v3554_v24 }
 0x36c   :  { %1983 = vmatprep.subr.bf16.mxu1 %v1220_v48  ;;  %v1364_v48 = vunpack.c.h.s8.bf16 %v932_v36 }
 0x36e   :  { %1898 = vmatpush1.bf16.msra.mxu0 %v1217_v50  ;;  %v2232_v50 = vrot.slane %v3637_v44, %v3564_v29 }
 0x36f   :  { %1984 = vmatpush1.bf16.msra.mxu1 %v1219_v51  ;;  %1899 = vmatprep.subr.bf16.mxu0 %v1234_v52  ;;  %v946_v51 = vld [vmem:[#allocation7 + $0x5c8] sm:$0xff]  ;;  %v2228_v52 = vrot.slane %v3637_v44, %v3557_v26 }
 0x370   :  { %1985 = vmatprep.subr.bf16.mxu1 %v1236_v53  ;;  %v2236_v53 = vrot.slane %v3637_v44, %v3568_v31  ;;  %v1394_v17 = vunpack.c.h.s8.bf16 %v946_v51 }
 0x372   :  { %1900 = vmatpush1.bf16.msra.mxu0 %v1233_v56  ;;  %v3652_v56 = vld [vmem:[#allocation7 + $0x5c0] sm:$0xff] }
 0x373   :  { %1986 = vmatpush1.bf16.msra.mxu1 %v1235_v57  ;;  %1901 = vmatprep.subr.bf16.mxu0 %v1250_v58  ;;  %v2340_v57 = vrot.slane %v3642_v47, %v3554_v24  ;;  %v2348_v58 = vrot.slane %v3642_v47, %v3564_v29  ;;  %v1377_v7 = vunpack.c.l.s8.bf16 %v3652_v56 }
 0x374   :  { %1987 = vmatprep.subr.bf16.mxu1 %v1252_v60  ;;  %v947_v60 = vld [vmem:[#allocation7 + $0x5d0] sm:$0xff] }
 0x375   :  { %v1395_v36 = vunpack.c.h.s8.bf16 %v947_v60 }
 0x376   :  { %1902 = vmatpush1.bf16.msra.mxu0 %v1249_v62 }
 0x377   :  { %1988 = vmatpush1.bf16.msra.mxu1 %v1251_v63  ;;  %1903 = vmatprep.subr.bf16.mxu0 %v1266_v0  ;;  %v2344_v63 = vrot.slane %v3642_v47, %v3557_v26  ;;  %v2352_v0 = vrot.slane %v3642_v47, %v3568_v31 }
 0x378   :  { %1989 = vmatprep.subr.bf16.mxu1 %v1268_v1  ;;  %v1378_v1 = vunpack.c.l.s8.bf16 %v946_v51  ;;  %v963_v51 = vld [vmem:[#allocation7 + $0x650] sm:$0xff] }
 0x37a   :  { %1904 = vmatpush1.bf16.msra.mxu0 %v1265_v4 }
 0x37b   :  { %1990 = vmatpush1.bf16.msra.mxu1 %v1267_v5  ;;  %1916 = vmatprep.subr.bf16.mxu0 %v1282_v6  ;;  %v1380_v6 = vunpack.c.l.s8.bf16 %v948_v55 }
 0x37c   :  { %2002 = vmatprep.subr.bf16.mxu1 %v1284_v16 }
 0x37d   :  { %1906 = vmatmul.mubr.bf16.vlgmr.msra.gmra.mrb[16].mxu0 %v3602_v10 }
 0x37e   :  { %1992 = vmatmul.mubr.bf16.vlgmr.msra.gmra.mrb[16].mxu1 %v3602_v10  ;;  %1917 = vmatpush1.bf16.msra.mxu0 %v1281_v9 }
 0x37f   :  { %1948 = vmatprep.mubr.bf16.mxu0 %v3608_v13  ;;  %2003 = vmatpush1.bf16.msra.mxu1 %v1283_v14 }
 0x380   :  { %2034 = vmatprep.mubr.bf16.mxu1 %v3608_v13  ;;  %1918 = vmatprep.subr.bf16.mxu0 %v1298_v15  ;;  %v1379_v15 = vunpack.c.l.s8.bf16 %v947_v60 }
 0x381   :  { %2004 = vmatprep.subr.bf16.mxu1 %v1300_v20  ;;  %v962_v20 = vld [vmem:[#allocation7 + $0x648] sm:$0xff] }
 0x382   :  { %1919 = vmatpush1.bf16.msra.mxu0 %v1297_v18  ;;  %v1426_v60 = vunpack.c.h.s8.bf16 %v962_v20 }
 0x383   :  { %2005 = vmatpush1.bf16.msra.mxu1 %v1299_v22  ;;  %1920 = vmatprep.subr.bf16.mxu0 %v1314_v27 }
 0x384   :  { %2006 = vmatprep.subr.bf16.mxu1 %v1316_v30 }
 0x386   :  { %1921 = vmatpush1.bf16.msra.mxu0 %v1313_v19 }
 0x387   :  { %2007 = vmatpush1.bf16.msra.mxu1 %v1315_v25  ;;  %1922 = vmatprep.subr.bf16.mxu0 %v1330_v33  ;;  %v1396_v25 = vunpack.c.h.s8.bf16 %v948_v55  ;;  %v1393_v33 = vunpack.c.h.s8.bf16 %v3652_v56 }
 0x388   :  { %2008 = vmatprep.subr.bf16.mxu1 %v1332_v34 }
 0x38a   :  { %1923 = vmatpush1.bf16.msra.mxu0 %v1329_v37  ;;  %v1410_v37 = vunpack.c.l.s8.bf16 %v962_v20 }
 0x38b   :  { %2009 = vmatpush1.bf16.msra.mxu1 %v1331_v38  ;;  %1924 = vmatprep.subr.bf16.mxu0 %v1346_v39  ;;  %v964_v38 = vld [vmem:[#allocation7 + $0x658] sm:$0xff] }
 0x38c   :  { %2010 = vmatprep.subr.bf16.mxu1 %v1348_v41 }
 0x38e   :  { %1925 = vmatpush1.bf16.msra.mxu0 %v1345_v43 }
 0x38f   :  { %2011 = vmatpush1.bf16.msra.mxu1 %v1347_v45  ;;  %1926 = vmatprep.subr.bf16.mxu0 %v1362_v46 }
 0x390   :  { %v1606_v61 = vpop.f32.mrb[8].mxu0  ;;  %v1692_v62 = vpop.f32.mrb[8].mxu1  ;;  %2012 = vmatprep.subr.bf16.mxu1 %v1364_v48 }
 0x391   :  { %v2301_v2 = vmul.f32 %v2224_v49, %v1606_v61  ;;  %v2303_v3 = vmul.f32 %v2232_v50, %v1692_v62  ;;  %v1608_v4 = vpop.f32.mrb[9].mxu0  ;;  %v1694_v5 = vpop.f32.mrb[9].mxu1  ;;  %v1428_v61 = vunpack.c.h.s8.bf16 %v964_v38  ;;  %v978_v62 = vld [vmem:[#allocation7 + $0x6c8] sm:$0xff] }
 0x392   :  { %v2302_v16 = vmul.f32 %v2228_v52, %v1608_v4  ;;  %v2304_v8 = vmul.f32 %v2236_v53, %v1694_v5  ;;  %v1610_v9 = vpop.f32.mrb[10].mxu0  ;;  %v1696_v14 = vpop.f32.mrb[10].mxu1  ;;  %1927 = vmatpush1.bf16.msra.mxu0 %v1361_v54  ;;  %v1442_v4 = vunpack.c.l.s8.bf16 %v978_v62  ;;  %v977_v5 = vld [vmem:[#allocation7 + $0x6c0] sm:$0xff] }
 0x393   :  { %v2417_v21 = vadd.f32 %v2340_v57, %v2301_v2  ;;  %v2419_v18 = vadd.f32 %v2348_v58, %v2303_v3  ;;  %v2317_v22 = vmul.f32 %v2224_v49, %v1610_v9  ;;  %v2319_v27 = vmul.f32 %v2232_v50, %v1696_v14  ;;  %2013 = vmatpush1.bf16.msra.mxu1 %v1363_v59  ;;  %v1612_v28 = vpop.f32.mrb[11].mxu0  ;;  %v1698_v30 = vpop.f32.mrb[11].mxu1  ;;  %v961_v49 = vld [vmem:[#allocation7 + $0x640] sm:$0xff] }
 0x394   :  { %v2318_v32 = vmul.f32 %v2228_v52, %v1612_v28  ;;  %v2320_v19 = vmul.f32 %v2236_v53, %v1698_v30  ;;  %1928 = vmatprep.subr.bf16.mxu0 %v1378_v1  ;;  %2014 = vmatprep.subr.bf16.mxu1 %v1380_v6  ;;  %v2418_v39 = vadd.f32 %v2344_v63, %v2302_v16  ;;  %v1412_v50 = vunpack.c.l.s8.bf16 %v964_v38  ;;  %v995_v28 = vld [vmem:[#allocation7 + $0x750] sm:$0xff]  ;;  %v1009_v38 = vld [vmem:[#allocation7 + $0x7c0] sm:$0xff] }
 0x395   :  { %v2433_v34 = vadd.f32 %v2340_v57, %v2317_v22  ;;  %v2435_v35 = vadd.f32 %v2348_v58, %v2319_v27  ;;  %v2420_v40 = vadd.f32 %v2352_v0, %v2304_v8  ;;  %v2449_v43 = vmax.f32 %v2417_v21, 0.0  ;;  %v993_v22 = vld [vmem:[#allocation7 + $0x740] sm:$0xff] }
 0x396   :  { %v2434_v41 = vadd.f32 %v2344_v63, %v2318_v32  ;;  %v2436_v42 = vadd.f32 %v2352_v0, %v2320_v19  ;;  %1929 = vmatpush1.bf16.msra.mxu0 %v1377_v7  ;;  %v2451_v45 = vmax.f32 %v2419_v18, 0.0  ;;  %v1409_v56 = vunpack.c.l.s8.bf16 %v961_v49  ;;  %v980_v63 = vld [vmem:[#allocation7 + $0x6d8] sm:$0xff]  ;;  %v979_v7 = vld [vmem:[#allocation7 + $0x6d0] sm:$0xff] }
 0x397   :  { %v2465_v46 = vmax.f32 %v2433_v34, 0.0  ;;  %v2467_v48 = vmax.f32 %v2435_v35, 0.0  ;;  %2015 = vmatpush1.bf16.msra.mxu1 %v1379_v15  ;;  %1930 = vmatprep.subr.bf16.mxu0 %v1394_v17  ;;  %v2450_v57 = vmax.f32 %v2418_v39, 0.0  ;;  %v2452_v58 = vmax.f32 %v2420_v40, 0.0  ;;  %v994_v15 = vld [vmem:[#allocation7 + $0x748] sm:$0xff]  ;;  %v996_v17 = vld [vmem:[#allocation7 + $0x758] sm:$0xff] }
 0x398   :  { %2016 = vmatprep.subr.bf16.mxu1 %v1396_v25  ;;  %v2466_v54 = vmax.f32 %v2434_v41, 0.0  ;;  %v2468_v55 = vmax.f32 %v2436_v42, 0.0  ;;  %v1411_v59 = vunpack.c.l.s8.bf16 %v963_v51  ;;  %v1425_v2 = vunpack.c.h.s8.bf16 %v961_v49  ;;  %v1012_v34 = vld [vmem:[#allocation7 + $0x7d8] sm:$0xff]  ;;  %v1011_v40 = vld [vmem:[#allocation7 + $0x7d0] sm:$0xff] }
 0x399   :  { %v3664_v52 = vpack.c.bf16 %v2465_v46, %v2449_v43  ;;  %v3666_v53 = vpack.c.bf16 %v2467_v48, %v2451_v45  ;;  %v1427_v3 = vunpack.c.h.s8.bf16 %v963_v51  ;;  %v1444_v6 = vunpack.c.l.s8.bf16 %v980_v63  ;;  %v774_v46 = vld [vmem:[#allocation7 + $0x68] sm:$0xff]  ;;  %v776_v48 = vld [vmem:[#allocation7 + $0x78] sm:$0xff] }
 0x39a   :  { %1931 = vmatpush1.bf16.msra.mxu0 %v1393_v33  ;;  %v3668_v0 = vpack.c.bf16 %v2466_v54, %v2450_v57  ;;  %v3670_v1 = vpack.c.bf16 %v2468_v55, %v2452_v58  ;;  %v1441_v16 = vunpack.c.l.s8.bf16 %v977_v5  ;;  %v1443_v8 = vunpack.c.l.s8.bf16 %v979_v7  ;;  %v1010_v33 = vld [vmem:[#allocation7 + $0x7c8] sm:$0xff]  ;;  %v773_v54 = vld [vmem:[#allocation7 + $0x60] sm:$0xff] }
 0x39b   :  { %2017 = vmatpush1.bf16.msra.mxu1 %v1395_v36  ;;  %1932 = vmatprep.subr.bf16.mxu0 %v1410_v37  ;;  %v1458_v9 = vunpack.c.h.s8.bf16 %v978_v62  ;;  %v1460_v14 = vunpack.c.h.s8.bf16 %v980_v63  ;;  %v1457_v20 = vunpack.c.h.s8.bf16 %v977_v5  ;;  %v1459_v21 = vunpack.c.h.s8.bf16 %v979_v7  ;;  %v792_v62 = vld [vmem:[#allocation7 + $0xf8] sm:$0xff] }
 0x39c   :  { %2018 = vmatprep.subr.bf16.mxu1 %v1412_v50  ;;  %v1474_v18 = vunpack.c.l.s8.bf16 %v994_v15  ;;  %v1476_v27 = vunpack.c.l.s8.bf16 %v996_v17  ;;  %v1473_v30 = vunpack.c.l.s8.bf16 %v993_v22  ;;  %v1475_v32 = vunpack.c.l.s8.bf16 %v995_v28 }
 0x39d   :  { %v1490_v19 = vunpack.c.h.s8.bf16 %v994_v15  ;;  %v1492_v25 = vunpack.c.h.s8.bf16 %v996_v17  ;;  %v1489_v35 = vunpack.c.h.s8.bf16 %v993_v22  ;;  %v1491_v36 = vunpack.c.h.s8.bf16 %v995_v28  ;;  %v808_v15 = vld [vmem:[#allocation7 + $0x178] sm:$0xff]  ;;  %v807_v22 = vld [vmem:[#allocation7 + $0x170] sm:$0xff] }
 0x39e   :  { %1933 = vmatpush1.bf16.msra.mxu0 %v1409_v56  ;;  %v1506_v37 = vunpack.c.l.s8.bf16 %v1010_v33  ;;  %v1508_v39 = vunpack.c.l.s8.bf16 %v1012_v34  ;;  %v1505_v41 = vunpack.c.l.s8.bf16 %v1009_v38  ;;  %v1507_v42 = vunpack.c.l.s8.bf16 %v1011_v40  ;;  %v775_v56 = vld [vmem:[#allocation7 + $0x70] sm:$0xff] }
 0x39f   :  { %2019 = vmatpush1.bf16.msra.mxu1 %v1411_v59  ;;  %1934 = vmatprep.subr.bf16.mxu0 %v1426_v60  ;;  %v1522_v43 = vunpack.c.h.s8.bf16 %v1010_v33  ;;  %v1524_v45 = vunpack.c.h.s8.bf16 %v1012_v34  ;;  %v1521_v49 = vunpack.c.h.s8.bf16 %v1009_v38  ;;  %v1523_v50 = vunpack.c.h.s8.bf16 %v1011_v40  ;;  %v790_v60 = vld [vmem:[#allocation7 + $0xe8] sm:$0xff]  ;;  %v823_v38 = vld [vmem:[#allocation7 + $0x1f0] sm:$0xff] }
 0x3a0   :  { %2020 = vmatprep.subr.bf16.mxu1 %v1428_v61  ;;  %v1030_v51 = vunpack.c.l.s8.bf16 %v774_v46  ;;  %v1032_v55 = vunpack.c.l.s8.bf16 %v776_v48  ;;  %v1029_v57 = vunpack.c.l.s8.bf16 %v773_v54  ;;  %v1031_v58 = vunpack.c.l.s8.bf16 %v775_v56 }
 0x3a1   :  { %v1046_v59 = vunpack.c.h.s8.bf16 %v774_v46  ;;  %v1048_v61 = vunpack.c.h.s8.bf16 %v776_v48  ;;  %v1045_v63 = vunpack.c.h.s8.bf16 %v773_v54  ;;  %v1064_v5 = vunpack.c.l.s8.bf16 %v792_v62  ;;  %v839_v54 = vld [vmem:[#allocation7 + $0x270] sm:$0xff] }
 0x3a2   :  { %1935 = vmatpush1.bf16.msra.mxu0 %v1425_v2  ;;  %v1047_v2 = vunpack.c.h.s8.bf16 %v775_v56  ;;  %v1095_v28 = vunpack.c.l.s8.bf16 %v807_v22  ;;  %v1111_v34 = vunpack.c.h.s8.bf16 %v807_v22  ;;  %v1127_v40 = vunpack.c.l.s8.bf16 %v823_v38 }
 0x3a3   :  { %2021 = vmatpush1.bf16.msra.mxu1 %v1427_v3  ;;  %1936 = vmatprep.subr.bf16.mxu0 %v1442_v4  ;;  %v1062_v3 = vunpack.c.l.s8.bf16 %v790_v60  ;;  %v789_v4 = vld [vmem:[#allocation7 + $0xe0] sm:$0xff]  ;;  %v1143_v48 = vunpack.c.h.s8.bf16 %v823_v38  ;;  %v1159_v56 = vunpack.c.l.s8.bf16 %v839_v54 }
 0x3a4   :  { %2022 = vmatprep.subr.bf16.mxu1 %v1444_v6  ;;  %v791_v6 = vld [vmem:[#allocation7 + $0xf0] sm:$0xff]  ;;  %v1061_v7 = vunpack.c.l.s8.bf16 %v789_v4  ;;  %v1077_v17 = vunpack.c.h.s8.bf16 %v789_v4 }
 0x3a5   :  { %v855_v4 = vld [vmem:[#allocation7 + $0x2f0] sm:$0xff] }
 0x3a6   :  { %1937 = vmatpush1.bf16.msra.mxu0 %v1441_v16  ;;  %v1063_v16 = vunpack.c.l.s8.bf16 %v791_v6 }
 0x3a7   :  { %2023 = vmatpush1.bf16.msra.mxu1 %v1443_v8  ;;  %1938 = vmatprep.subr.bf16.mxu0 %v1458_v9  ;;  %v1078_v8 = vunpack.c.h.s8.bf16 %v790_v60  ;;  %v1080_v9 = vunpack.c.h.s8.bf16 %v792_v62  ;;  %v856_v60 = vld [vmem:[#allocation7 + $0x2f8] sm:$0xff]  ;;  %v1175_v62 = vunpack.c.h.s8.bf16 %v839_v54 }
 0x3a8   :  { %2024 = vmatprep.subr.bf16.mxu1 %v1460_v14  ;;  %v806_v14 = vld [vmem:[#allocation7 + $0x168] sm:$0xff] }
 0x3aa   :  { %1939 = vmatpush1.bf16.msra.mxu0 %v1457_v20  ;;  %v1079_v20 = vunpack.c.h.s8.bf16 %v791_v6  ;;  %v1191_v6 = vunpack.c.l.s8.bf16 %v855_v4 }
 0x3ab   :  { %2025 = vmatpush1.bf16.msra.mxu1 %v1459_v21  ;;  %1940 = vmatprep.subr.bf16.mxu0 %v1474_v18  ;;  %v805_v21 = vld [vmem:[#allocation7 + $0x160] sm:$0xff]  ;;  %v1096_v18 = vunpack.c.l.s8.bf16 %v808_v15 }
 0x3ac   :  { %2026 = vmatprep.subr.bf16.mxu1 %v1476_v27  ;;  %v1093_v27 = vunpack.c.l.s8.bf16 %v805_v21  ;;  %v1109_v33 = vunpack.c.h.s8.bf16 %v805_v21  ;;  %v871_v21 = vld [vmem:[#allocation7 + $0x370] sm:$0xff] }
 0x3ad   :  { %v1223_v22 = vunpack.c.l.s8.bf16 %v871_v21 }
 0x3ae   :  { %1941 = vmatpush1.bf16.msra.mxu0 %v1473_v30  ;;  %v1110_v30 = vunpack.c.h.s8.bf16 %v806_v14 }
 0x3af   :  { %2027 = vmatpush1.bf16.msra.mxu1 %v1475_v32  ;;  %1942 = vmatprep.subr.bf16.mxu0 %v1490_v19  ;;  %v1112_v32 = vunpack.c.h.s8.bf16 %v808_v15  ;;  %v822_v19 = vld [vmem:[#allocation7 + $0x1e8] sm:$0xff]  ;;  %v1207_v15 = vunpack.c.h.s8.bf16 %v855_v4 }
 0x3b0   :  { %2028 = vmatprep.subr.bf16.mxu1 %v1492_v25  ;;  %v824_v25 = vld [vmem:[#allocation7 + $0x1f8] sm:$0xff] }
 0x3b2   :  { %1943 = vmatpush1.bf16.msra.mxu0 %v1489_v35  ;;  %v1126_v35 = vunpack.c.l.s8.bf16 %v822_v19 }
 0x3b3   :  { %2029 = vmatpush1.bf16.msra.mxu1 %v1491_v36  ;;  %1944 = vmatprep.subr.bf16.mxu0 %v1506_v37  ;;  %v821_v36 = vld [vmem:[#allocation7 + $0x1e0] sm:$0xff]  ;;  %v1128_v37 = vunpack.c.l.s8.bf16 %v824_v25 }
 0x3b4   :  { %2030 = vmatprep.subr.bf16.mxu1 %v1508_v39  ;;  %v1125_v39 = vunpack.c.l.s8.bf16 %v821_v36  ;;  %v1141_v46 = vunpack.c.h.s8.bf16 %v821_v36  ;;  %v887_v36 = vld [vmem:[#allocation7 + $0x3f0] sm:$0xff] }
 0x3b5   :  { %v1255_v38 = vunpack.c.l.s8.bf16 %v887_v36 }
 0x3b6   :  { %1945 = vmatpush1.bf16.msra.mxu0 %v1505_v41  ;;  %v1142_v41 = vunpack.c.h.s8.bf16 %v822_v19 }
 0x3b7   :  { %2031 = vmatpush1.bf16.msra.mxu1 %v1507_v42  ;;  %1946 = vmatprep.subr.bf16.mxu0 %v1522_v43  ;;  %v1144_v42 = vunpack.c.h.s8.bf16 %v824_v25  ;;  %v838_v43 = vld [vmem:[#allocation7 + $0x268] sm:$0xff]  ;;  %v1239_v25 = vunpack.c.h.s8.bf16 %v871_v21  ;;  %v3687_v21 = vsub.s32 5, %v3551_v23 }
 0x3b8   :  { %2032 = vmatprep.subr.bf16.mxu1 %v1524_v45  ;;  %v840_v45 = vld [vmem:[#allocation7 + $0x278] sm:$0xff] }
 0x3ba   :  { %1947 = vmatpush1.bf16.msra.mxu0 %v1521_v49  ;;  %v1158_v49 = vunpack.c.l.s8.bf16 %v838_v43 }
 0x3bb   :  { %2033 = vmatpush1.bf16.msra.mxu1 %v1523_v50  ;;  %2045 = vmatprep.subr.bf16.mxu0 %v1030_v51  ;;  %v837_v50 = vld [vmem:[#allocation7 + $0x260] sm:$0xff]  ;;  %v1160_v51 = vunpack.c.l.s8.bf16 %v840_v45 }
 0x3bc   :  { %2131 = vmatprep.subr.bf16.mxu1 %v1032_v55  ;;  %v1157_v55 = vunpack.c.l.s8.bf16 %v837_v50 }
 0x3bd   :  { %1949 = vmatmul.mubr.bf16.vlgmr.msra.gmra.mrb[16].mxu0 %v3604_v11 }
 0x3be   :  { %2035 = vmatmul.mubr.bf16.vlgmr.msra.gmra.mrb[16].mxu1 %v3604_v11  ;;  %2046 = vmatpush1.bf16.msra.mxu0 %v1029_v57  ;;  %v1174_v57 = vunpack.c.h.s8.bf16 %v838_v43 }
 0x3bf   :  { %2077 = vmatprep.mubr.bf16.mxu0 %v3606_v12  ;;  %2132 = vmatpush1.bf16.msra.mxu1 %v1031_v58  ;;  %v1176_v58 = vunpack.c.h.s8.bf16 %v840_v45  ;;  %v1271_v45 = vunpack.c.h.s8.bf16 %v887_v36 }
 0x3c0   :  { %2163 = vmatprep.mubr.bf16.mxu1 %v3606_v12  ;;  %2047 = vmatprep.subr.bf16.mxu0 %v1046_v59  ;;  %v1094_v12 = vunpack.c.l.s8.bf16 %v806_v14  ;;  %v854_v59 = vld [vmem:[#allocation7 + $0x2e8] sm:$0xff] }
 0x3c1   :  { %2133 = vmatprep.subr.bf16.mxu1 %v1048_v61  ;;  %v1173_v61 = vunpack.c.h.s8.bf16 %v837_v50  ;;  %v903_v50 = vld [vmem:[#allocation7 + $0x470] sm:$0xff] }
 0x3c2   :  { %2048 = vmatpush1.bf16.msra.mxu0 %v1045_v63  ;;  %v1190_v63 = vunpack.c.l.s8.bf16 %v854_v59  ;;  %v1287_v54 = vunpack.c.l.s8.bf16 %v903_v50 }
 0x3c3   :  { %2134 = vmatpush1.bf16.msra.mxu1 %v1047_v2  ;;  %2049 = vmatprep.subr.bf16.mxu0 %v1062_v3  ;;  %v853_v2 = vld [vmem:[#allocation7 + $0x2e0] sm:$0xff]  ;;  %v1192_v3 = vunpack.c.l.s8.bf16 %v856_v60 }
 0x3c4   :  { %2135 = vmatprep.subr.bf16.mxu1 %v1064_v5  ;;  %v1189_v5 = vunpack.c.l.s8.bf16 %v853_v2  ;;  %v1205_v14 = vunpack.c.h.s8.bf16 %v853_v2  ;;  %v919_v2 = vld [vmem:[#allocation7 + $0x4f0] sm:$0xff] }
 0x3c5   :  { %v1319_v4 = vunpack.c.l.s8.bf16 %v919_v2 }
 0x3c6   :  { %2050 = vmatpush1.bf16.msra.mxu0 %v1061_v7  ;;  %v1206_v7 = vunpack.c.h.s8.bf16 %v854_v59 }
 0x3c7   :  { %2136 = vmatpush1.bf16.msra.mxu1 %v1063_v16  ;;  %2051 = vmatprep.subr.bf16.mxu0 %v1078_v8  ;;  %v1208_v16 = vunpack.c.h.s8.bf16 %v856_v60  ;;  %v870_v8 = vld [vmem:[#allocation7 + $0x368] sm:$0xff]  ;;  %v1303_v60 = vunpack.c.h.s8.bf16 %v903_v50 }
 0x3c8   :  { %2137 = vmatprep.subr.bf16.mxu1 %v1080_v9  ;;  %v872_v9 = vld [vmem:[#allocation7 + $0x378] sm:$0xff] }
 0x3ca   :  { %2052 = vmatpush1.bf16.msra.mxu0 %v1077_v17  ;;  %v1222_v17 = vunpack.c.l.s8.bf16 %v870_v8 }
 0x3cb   :  { %2138 = vmatpush1.bf16.msra.mxu1 %v1079_v20  ;;  %2053 = vmatprep.subr.bf16.mxu0 %v1094_v12  ;;  %v869_v20 = vld [vmem:[#allocation7 + $0x360] sm:$0xff]  ;;  %v1224_v12 = vunpack.c.l.s8.bf16 %v872_v9 }
 0x3cc   :  { %2139 = vmatprep.subr.bf16.mxu1 %v1096_v18  ;;  %v1221_v18 = vunpack.c.l.s8.bf16 %v869_v20  ;;  %v1237_v19 = vunpack.c.h.s8.bf16 %v869_v20 }
 0x3ce   :  { %2054 = vmatpush1.bf16.msra.mxu0 %v1093_v27  ;;  %v1238_v27 = vunpack.c.h.s8.bf16 %v870_v8  ;;  %v1335_v8 = vunpack.c.h.s8.bf16 %v919_v2 }
 0x3cf   :  { %2140 = vmatpush1.bf16.msra.mxu1 %v1095_v28  ;;  %2055 = vmatprep.subr.bf16.mxu0 %v1110_v30  ;;  %v1240_v28 = vunpack.c.h.s8.bf16 %v872_v9  ;;  %v886_v30 = vld [vmem:[#allocation7 + $0x3e8] sm:$0xff]  ;;  %v933_v9 = vld [vmem:[#allocation7 + $0x560] sm:$0xff] }
 0x3d0   :  { %2141 = vmatprep.subr.bf16.mxu1 %v1112_v32  ;;  %v888_v32 = vld [vmem:[#allocation7 + $0x3f8] sm:$0xff]  ;;  %v1349_v20 = vunpack.c.l.s8.bf16 %v933_v9 }
 0x3d2   :  { %2056 = vmatpush1.bf16.msra.mxu0 %v1109_v33  ;;  %v1254_v33 = vunpack.c.l.s8.bf16 %v886_v30 }
 0x3d3   :  { %2142 = vmatpush1.bf16.msra.mxu1 %v1111_v34  ;;  %2057 = vmatprep.subr.bf16.mxu0 %v1126_v35  ;;  %v885_v34 = vld [vmem:[#allocation7 + $0x3e0] sm:$0xff]  ;;  %v1256_v35 = vunpack.c.l.s8.bf16 %v888_v32 }
 0x3d4   :  { %2143 = vmatprep.subr.bf16.mxu1 %v1128_v37  ;;  %v1253_v37 = vunpack.c.l.s8.bf16 %v885_v34  ;;  %v1269_v43 = vunpack.c.h.s8.bf16 %v885_v34  ;;  %v1365_v34 = vunpack.c.h.s8.bf16 %v933_v9 }
 0x3d6   :  { %2058 = vmatpush1.bf16.msra.mxu0 %v1125_v39  ;;  %v1270_v39 = vunpack.c.h.s8.bf16 %v886_v30  ;;  %v950_v30 = vld [vmem:[#allocation7 + $0x5e8] sm:$0xff] }
 0x3d7   :  { %2144 = vmatpush1.bf16.msra.mxu1 %v1127_v40  ;;  %2059 = vmatprep.subr.bf16.mxu0 %v1142_v41  ;;  %v1272_v40 = vunpack.c.h.s8.bf16 %v888_v32  ;;  %v902_v41 = vld [vmem:[#allocation7 + $0x468] sm:$0xff] }
 0x3d8   :  { %2145 = vmatprep.subr.bf16.mxu1 %v1144_v42  ;;  %v904_v42 = vld [vmem:[#allocation7 + $0x478] sm:$0xff] }
 0x3da   :  { %2060 = vmatpush1.bf16.msra.mxu0 %v1141_v46  ;;  %v1286_v46 = vunpack.c.l.s8.bf16 %v902_v41 }
 0x3db   :  { %2146 = vmatpush1.bf16.msra.mxu1 %v1143_v48  ;;  %2061 = vmatprep.subr.bf16.mxu0 %v1158_v49  ;;  %v901_v48 = vld [vmem:[#allocation7 + $0x460] sm:$0xff]  ;;  %v1288_v49 = vunpack.c.l.s8.bf16 %v904_v42 }
 0x3dc   :  { %2147 = vmatprep.subr.bf16.mxu1 %v1160_v51  ;;  %v1285_v51 = vunpack.c.l.s8.bf16 %v901_v48  ;;  %v1301_v59 = vunpack.c.h.s8.bf16 %v901_v48 }
 0x3de   :  { %2062 = vmatpush1.bf16.msra.mxu0 %v1157_v55  ;;  %v1302_v55 = vunpack.c.h.s8.bf16 %v902_v41 }
 0x3df   :  { %2148 = vmatpush1.bf16.msra.mxu1 %v1159_v56  ;;  %2063 = vmatprep.subr.bf16.mxu0 %v1174_v57  ;;  %v918_v56 = vld [vmem:[#allocation7 + $0x4e8] sm:$0xff]  ;;  %v1304_v57 = vunpack.c.h.s8.bf16 %v904_v42  ;;  %v2360_v42 = vrot.slane %v3642_v47, %v3687_v21 }
 0x3e0   :  { %2149 = vmatprep.subr.bf16.mxu1 %v1176_v58  ;;  %v920_v58 = vld [vmem:[#allocation7 + $0x4f8] sm:$0xff] }
 0x3e2   :  { %2064 = vmatpush1.bf16.msra.mxu0 %v1173_v61  ;;  %v1318_v61 = vunpack.c.l.s8.bf16 %v918_v56 }
 0x3e3   :  { %2150 = vmatpush1.bf16.msra.mxu1 %v1175_v62  ;;  %2065 = vmatprep.subr.bf16.mxu0 %v1190_v63  ;;  %v917_v62 = vld [vmem:[#allocation7 + $0x4e0] sm:$0xff]  ;;  %v1320_v63 = vunpack.c.l.s8.bf16 %v920_v58 }
 0x3e4   :  { %2151 = vmatprep.subr.bf16.mxu1 %v1192_v3  ;;  %v1317_v3 = vunpack.c.l.s8.bf16 %v917_v62 }
 0x3e6   :  { %2066 = vmatpush1.bf16.msra.mxu0 %v1189_v5  ;;  %v1336_v5 = vunpack.c.h.s8.bf16 %v920_v58 }
 0x3e7   :  { %2152 = vmatpush1.bf16.msra.mxu1 %v1191_v6  ;;  %2067 = vmatprep.subr.bf16.mxu0 %v1206_v7  ;;  %v934_v6 = vld [vmem:[#allocation7 + $0x568] sm:$0xff]  ;;  %v936_v7 = vld [vmem:[#allocation7 + $0x578] sm:$0xff] }
 0x3e8   :  { %2153 = vmatprep.subr.bf16.mxu1 %v1208_v16  ;;  %v1333_v16 = vunpack.c.h.s8.bf16 %v917_v62 }
 0x3ea   :  { %2068 = vmatpush1.bf16.msra.mxu0 %v1205_v14  ;;  %v1352_v14 = vunpack.c.l.s8.bf16 %v936_v7 }
 0x3eb   :  { %2154 = vmatpush1.bf16.msra.mxu1 %v1207_v15  ;;  %2069 = vmatprep.subr.bf16.mxu0 %v1222_v17  ;;  %v935_v15 = vld [vmem:[#allocation7 + $0x570] sm:$0xff]  ;;  %v3681_v17 = vsub.s32 4, %v3551_v23 }
 0x3ec   :  { %2155 = vmatprep.subr.bf16.mxu1 %v1224_v12  ;;  %v3684_v12 = vsub.s32 6, %v3551_v23 }
 0x3ed   :  { %v2240_v32 = vrot.slane %v3637_v44, %v3681_v17 }
 0x3ee   :  { %2070 = vmatpush1.bf16.msra.mxu0 %v1221_v18  ;;  %v1351_v18 = vunpack.c.l.s8.bf16 %v935_v15  ;;  %v2364_v41 = vrot.slane %v3642_v47, %v3684_v12 }
 0x3ef   :  { %2156 = vmatpush1.bf16.msra.mxu1 %v1223_v22  ;;  %2071 = vmatprep.subr.bf16.mxu0 %v1238_v27  ;;  %v3690_v22 = vsub.s32 7, %v3551_v23  ;;  %v1366_v27 = vunpack.c.h.s8.bf16 %v934_v6  ;;  %v2356_v23 = vrot.slane %v3642_v47, %v3681_v17 }
 0x3f0   :  { %2157 = vmatprep.subr.bf16.mxu1 %v1240_v28  ;;  %v1368_v28 = vunpack.c.h.s8.bf16 %v936_v7 }
 0x3f1   :  { %v2252_v36 = vrot.slane %v3637_v44, %v3690_v22 }
 0x3f2   :  { %2072 = vmatpush1.bf16.msra.mxu0 %v1237_v19  ;;  %v3694_v19 = vld [vmem:[#allocation7 + $0x5f8] sm:$0xff] }
 0x3f3   :  { %2158 = vmatpush1.bf16.msra.mxu1 %v1239_v25  ;;  %2073 = vmatprep.subr.bf16.mxu0 %v1254_v33  ;;  %v2248_v25 = vrot.slane %v3637_v44, %v3684_v12  ;;  %v2244_v33 = vrot.slane %v3637_v44, %v3687_v21  ;;  %v2368_v44 = vrot.slane %v3642_v47, %v3690_v22  ;;  %v966_v47 = vld [vmem:[#allocation7 + $0x668] sm:$0xff] }
 0x3f4   :  { %2159 = vmatprep.subr.bf16.mxu1 %v1256_v35  ;;  %v3700_v35 = vld [vmem:[#allocation7 + $0x5e0] sm:$0xff] }
 0x3f6   :  { %2074 = vmatpush1.bf16.msra.mxu0 %v1253_v37  ;;  %v1367_v37 = vunpack.c.h.s8.bf16 %v935_v15 }
 0x3f7   :  { %2160 = vmatpush1.bf16.msra.mxu1 %v1255_v38  ;;  %2075 = vmatprep.subr.bf16.mxu0 %v1270_v39  ;;  %v1382_v38 = vunpack.c.l.s8.bf16 %v950_v30  ;;  %v3706_v39 = vld [vmem:[#allocation7 + $0x5f0] sm:$0xff] }
 0x3f8   :  { %2161 = vmatprep.subr.bf16.mxu1 %v1272_v40  ;;  %v1399_v15 = vunpack.c.h.s8.bf16 %v3706_v39 }
 0x3fa   :  { %2076 = vmatpush1.bf16.msra.mxu0 %v1269_v43  ;;  %v1384_v43 = vunpack.c.l.s8.bf16 %v3694_v19 }
 0x3fb   :  { %2162 = vmatpush1.bf16.msra.mxu1 %v1271_v45  ;;  %2088 = vmatprep.subr.bf16.mxu0 %v1286_v46 }
 0x3fc   :  { %2174 = vmatprep.subr.bf16.mxu1 %v1288_v49  ;;  %v1381_v49 = vunpack.c.l.s8.bf16 %v3700_v35 }
 0x3fd   :  { %2078 = vmatmul.mubr.bf16.vlgmr.msra.gmra.mrb[20].mxu0 %v3602_v10 }
 0x3fe   :  { %2164 = vmatmul.mubr.bf16.vlgmr.msra.gmra.mrb[20].mxu1 %v3602_v10  ;;  %2089 = vmatpush1.bf16.msra.mxu0 %v1285_v51  ;;  %v1334_v10 = vunpack.c.h.s8.bf16 %v918_v56  ;;  %v1383_v56 = vunpack.c.l.s8.bf16 %v3706_v39 }
 0x3ff   :  { %2120 = vmatprep.mubr.bf16.mxu0 %v3608_v13  ;;  %2175 = vmatpush1.bf16.msra.mxu1 %v1287_v54 }
 0x400   :  { %2206 = vmatprep.mubr.bf16.mxu1 %v3608_v13  ;;  %2090 = vmatprep.subr.bf16.mxu0 %v1302_v55  ;;  %v1350_v13 = vunpack.c.l.s8.bf16 %v934_v6  ;;  %v968_v6 = vld [vmem:[#allocation7 + $0x678] sm:$0xff] }
 0x401   :  { %2176 = vmatprep.subr.bf16.mxu1 %v1304_v57  ;;  %v1398_v57 = vunpack.c.h.s8.bf16 %v950_v30  ;;  %v1416_v30 = vunpack.c.l.s8.bf16 %v968_v6 }
 0x402   :  { %2091 = vmatpush1.bf16.msra.mxu0 %v1301_v59 }
 0x403   :  { %2177 = vmatpush1.bf16.msra.mxu1 %v1303_v60  ;;  %2092 = vmatprep.subr.bf16.mxu0 %v1318_v61 }
 0x404   :  { %2178 = vmatprep.subr.bf16.mxu1 %v1320_v63  ;;  %v1400_v63 = vunpack.c.h.s8.bf16 %v3694_v19 }
 0x406   :  { %2093 = vmatpush1.bf16.msra.mxu0 %v1317_v3 }
 0x407   :  { %2179 = vmatpush1.bf16.msra.mxu1 %v1319_v4  ;;  %2094 = vmatprep.subr.bf16.mxu0 %v1334_v10 }
 0x408   :  { %2180 = vmatprep.subr.bf16.mxu1 %v1336_v5 }
 0x40a   :  { %2095 = vmatpush1.bf16.msra.mxu0 %v1333_v16 }
 0x40b   :  { %2181 = vmatpush1.bf16.msra.mxu1 %v1335_v8  ;;  %2096 = vmatprep.subr.bf16.mxu0 %v1350_v13  ;;  %v1397_v13 = vunpack.c.h.s8.bf16 %v3700_v35 }
 0x40c   :  { %2182 = vmatprep.subr.bf16.mxu1 %v1352_v14 }
 0x40e   :  { %2097 = vmatpush1.bf16.msra.mxu0 %v1349_v20  ;;  %v1414_v20 = vunpack.c.l.s8.bf16 %v966_v47 }
 0x40f   :  { %2183 = vmatpush1.bf16.msra.mxu1 %v1351_v18  ;;  %2098 = vmatprep.subr.bf16.mxu0 %v1366_v27 }
 0x410   :  { %v1778_v40 = vpop.f32.mrb[12].mxu0  ;;  %2184 = vmatprep.subr.bf16.mxu1 %v1368_v28 }
 0x411   :  { %v2305_v45 = vmul.f32 %v2240_v32, %v1778_v40  ;;  %v1864_v46 = vpop.f32.mrb[12].mxu1  ;;  %v1780_v48 = vpop.f32.mrb[13].mxu0 }
 0x412   :  { %v2307_v50 = vmul.f32 %v2248_v25, %v1864_v46  ;;  %v2306_v51 = vmul.f32 %v2244_v33, %v1780_v48  ;;  %v1866_v54 = vpop.f32.mrb[13].mxu1  ;;  %v1782_v55 = vpop.f32.mrb[14].mxu0  ;;  %2099 = vmatpush1.bf16.msra.mxu0 %v1365_v34  ;;  %v982_v46 = vld [vmem:[#allocation7 + $0x6e8] sm:$0xff]  ;;  %v984_v48 = vld [vmem:[#allocation7 + $0x6f8] sm:$0xff] }
 0x413   :  { %v2421_v58 = vadd.f32 %v2356_v23, %v2305_v45  ;;  %v2308_v59 = vmul.f32 %v2252_v36, %v1866_v54  ;;  %v2321_v60 = vmul.f32 %v2240_v32, %v1782_v55  ;;  %v1868_v61 = vpop.f32.mrb[14].mxu1  ;;  %2185 = vmatpush1.bf16.msra.mxu1 %v1367_v37  ;;  %v1784_v62 = vpop.f32.mrb[15].mxu0  ;;  %2100 = vmatprep.subr.bf16.mxu0 %v1382_v38  ;;  %v965_v32 = vld [vmem:[#allocation7 + $0x660] sm:$0xff]  ;;  %v1432_v45 = vunpack.c.h.s8.bf16 %v968_v6  ;;  %v983_v55 = vld [vmem:[#allocation7 + $0x6f0] sm:$0xff] }
 0x414   :  { %v2423_v2 = vadd.f32 %v2364_v41, %v2307_v50  ;;  %v2422_v3 = vadd.f32 %v2360_v42, %v2306_v51  ;;  %v2323_v4 = vmul.f32 %v2248_v25, %v1868_v61  ;;  %v2322_v10 = vmul.f32 %v2244_v33, %v1784_v62  ;;  %v1870_v5 = vpop.f32.mrb[15].mxu1  ;;  %2186 = vmatprep.subr.bf16.mxu1 %v1384_v43  ;;  %v981_v51 = vld [vmem:[#allocation7 + $0x6e0] sm:$0xff]  ;;  %v1000_v61 = vld [vmem:[#allocation7 + $0x778] sm:$0xff] }
 0x415   :  { %v2424_v7 = vadd.f32 %v2368_v44, %v2308_v59  ;;  %v2437_v16 = vadd.f32 %v2356_v23, %v2321_v60  ;;  %v2324_v8 = vmul.f32 %v2252_v36, %v1870_v5  ;;  %v2453_v18 = vmax.f32 %v2421_v58, 0.0  ;;  %v967_v23 = vld [vmem:[#allocation7 + $0x670] sm:$0xff]  ;;  %v998_v60 = vld [vmem:[#allocation7 + $0x768] sm:$0xff] }
 0x416   :  { %v2439_v9 = vadd.f32 %v2364_v41, %v2323_v4  ;;  %v2438_v14 = vadd.f32 %v2360_v42, %v2322_v10  ;;  %2101 = vmatpush1.bf16.msra.mxu0 %v1381_v49  ;;  %v2455_v19 = vmax.f32 %v2423_v2, 0.0  ;;  %v2454_v25 = vmax.f32 %v2422_v3, 0.0  ;;  %v997_v2 = vld [vmem:[#allocation7 + $0x760] sm:$0xff]  ;;  %v999_v4 = vld [vmem:[#allocation7 + $0x770] sm:$0xff] }
 0x417   :  { %v2469_v27 = vmax.f32 %v2437_v16, 0.0  ;;  %v2440_v28 = vadd.f32 %v2368_v44, %v2324_v8  ;;  %2187 = vmatpush1.bf16.msra.mxu1 %v1383_v56  ;;  %2102 = vmatprep.subr.bf16.mxu0 %v1398_v57  ;;  %v2456_v35 = vmax.f32 %v2424_v7, 0.0  ;;  %v1413_v39 = vunpack.c.l.s8.bf16 %v965_v32  ;;  %v1014_v16 = vld [vmem:[#allocation7 + $0x7e8] sm:$0xff]  ;;  %v1016_v8 = vld [vmem:[#allocation7 + $0x7f8] sm:$0xff] }
 0x418   :  { %v2471_v33 = vmax.f32 %v2439_v9, 0.0  ;;  %v2470_v34 = vmax.f32 %v2438_v14, 0.0  ;;  %2188 = vmatprep.subr.bf16.mxu1 %v1400_v63  ;;  %v1415_v41 = vunpack.c.l.s8.bf16 %v967_v23  ;;  %v1430_v42 = vunpack.c.h.s8.bf16 %v966_v47 }
 0x419   :  { %v3720_v36 = vpack.c.bf16 %v2469_v27, %v2453_v18  ;;  %v2472_v37 = vmax.f32 %v2440_v28, 0.0  ;;  %v1429_v44 = vunpack.c.h.s8.bf16 %v965_v32  ;;  %v1431_v49 = vunpack.c.h.s8.bf16 %v967_v23  ;;  %v1015_v18 = vld [vmem:[#allocation7 + $0x7f0] sm:$0xff] }
 0x41a   :  { %v3722_v38 = vpack.c.bf16 %v2471_v33, %v2455_v19  ;;  %2103 = vmatpush1.bf16.msra.mxu0 %v1397_v13  ;;  %v3724_v40 = vpack.c.bf16 %v2470_v34, %v2454_v25  ;;  %v1446_v50 = vunpack.c.l.s8.bf16 %v982_v46  ;;  %v1448_v54 = vunpack.c.l.s8.bf16 %v984_v48  ;;  %v2501_v19 = vld [vmem:[#allocation9 + $0x20] sm:$0xff] }
 0x41b   :  { %2189 = vmatpush1.bf16.msra.mxu1 %v1399_v15  ;;  %2104 = vmatprep.subr.bf16.mxu0 %v1414_v20  ;;  %v3726_v43 = vpack.c.bf16 %v2472_v37, %v2456_v35  ;;  %v1445_v56 = vunpack.c.l.s8.bf16 %v981_v51  ;;  %v1447_v57 = vunpack.c.l.s8.bf16 %v983_v55  ;;  %v1462_v58 = vunpack.c.h.s8.bf16 %v982_v46  ;;  %v1013_v15 = vld [vmem:[#allocation7 + $0x7e0] sm:$0xff]  ;;  %v2502_v46 = vld [vmem:[#allocation9 + $0x28] sm:$0xff] }
 0x41c   :  { %2190 = vmatprep.subr.bf16.mxu1 %v1416_v30  ;;  %v1464_v59 = vunpack.c.h.s8.bf16 %v984_v48  ;;  %v1461_v62 = vunpack.c.h.s8.bf16 %v981_v51  ;;  %v1463_v63 = vunpack.c.h.s8.bf16 %v983_v55  ;;  %v1478_v47 = vunpack.c.l.s8.bf16 %v998_v60  ;;  %v2509_v25 = vld [vmem:[#allocation9 + $0x60] sm:$0xff] }
 0x41d   :  { %v1480_v3 = vunpack.c.l.s8.bf16 %v1000_v61  ;;  %v1477_v10 = vunpack.c.l.s8.bf16 %v997_v2  ;;  %v1479_v5 = vunpack.c.l.s8.bf16 %v999_v4  ;;  %v1494_v6 = vunpack.c.h.s8.bf16 %v998_v60  ;;  %v2497_v35 = vld [vmem:[#allocation9] sm:$0xff]  ;;  %v2503_v60 = vld [vmem:[#allocation9 + $0x30] sm:$0xff] }
 0x41e   :  { %2105 = vmatpush1.bf16.msra.mxu0 %v1413_v39  ;;  %v1496_v7 = vunpack.c.h.s8.bf16 %v1000_v61  ;;  %v1493_v13 = vunpack.c.h.s8.bf16 %v997_v2  ;;  %v1495_v9 = vunpack.c.h.s8.bf16 %v999_v4  ;;  %v1510_v14 = vunpack.c.l.s8.bf16 %v1014_v16  ;;  %v2505_v39 = vld [vmem:[#allocation9 + $0x40] sm:$0xff]  ;;  %v2507_v2 = vld [vmem:[#allocation9 + $0x50] sm:$0xff] }
 0x41f   :  { %2191 = vmatpush1.bf16.msra.mxu1 %v1415_v41  ;;  %2106 = vmatprep.subr.bf16.mxu0 %v1430_v42  ;;  %v1512_v20 = vunpack.c.l.s8.bf16 %v1016_v8  ;;  %v1509_v27 = vunpack.c.l.s8.bf16 %v1013_v15  ;;  %v1511_v28 = vunpack.c.l.s8.bf16 %v1015_v18  ;;  %v1526_v30 = vunpack.c.h.s8.bf16 %v1014_v16 }
 0x420   :  { %2192 = vmatprep.subr.bf16.mxu1 %v1432_v45  ;;  %v1528_v32 = vunpack.c.h.s8.bf16 %v1016_v8  ;;  %v1525_v33 = vunpack.c.h.s8.bf16 %v1013_v15  ;;  %v1527_v34 = vunpack.c.h.s8.bf16 %v1015_v18  ;;  %v2569_v23 = vunpack.c.l.s8.bf16 %v2501_v19  ;;  %v2508_v15 = vld [vmem:[#allocation9 + $0x58] sm:$0xff] }
 0x421   :  { %v2585_v37 = vunpack.c.l.s8.bf16 %v2509_v25  ;;  %v2561_v41 = vunpack.c.l.s8.bf16 %v2497_v35  ;;  %v2577_v42 = vunpack.c.l.s8.bf16 %v2505_v39  ;;  %v2570_v45 = vunpack.c.h.s8.bf16 %v2501_v19 }
 0x422   :  { %2107 = vmatpush1.bf16.msra.mxu0 %v1429_v44  ;;  %v2586_v48 = vunpack.c.h.s8.bf16 %v2509_v25  ;;  %v2510_v44 = vld [vmem:[#allocation9 + $0x68] sm:$0xff]  ;;  %v2571_v51 = vunpack.c.l.s8.bf16 %v2502_v46  ;;  %v2581_v4 = vunpack.c.l.s8.bf16 %v2507_v2  ;;  %v2582_v8 = vunpack.c.h.s8.bf16 %v2507_v2  ;;  %v2528_v2 = vld [vmem:[#allocation9 + $0xf8] sm:$0xff] }
 0x423   :  { %2193 = vmatpush1.bf16.msra.mxu1 %v1431_v49  ;;  %2108 = vmatprep.subr.bf16.mxu0 %v1446_v50  ;;  %v2562_v49 = vunpack.c.h.s8.bf16 %v2497_v35  ;;  %v2578_v50 = vunpack.c.h.s8.bf16 %v2505_v39  ;;  %v2587_v55 = vunpack.c.l.s8.bf16 %v2510_v44  ;;  %v2583_v18 = vunpack.c.l.s8.bf16 %v2508_v15  ;;  %v2521_v35 = vld [vmem:[#allocation9 + $0xc0] sm:$0xff] }
 0x424   :  { %2194 = vmatprep.subr.bf16.mxu1 %v1448_v54  ;;  %v2498_v54 = vld [vmem:[#allocation9 + $0x8] sm:$0xff]  ;;  %v2584_v25 = vunpack.c.h.s8.bf16 %v2508_v15  ;;  %v2609_v39 = vunpack.c.l.s8.bf16 %v2521_v35  ;;  %v2541_v15 = vld [vmem:[#allocation9 + $0x160] sm:$0xff] }
 0x425   :  { %v2564_v61 = vunpack.c.h.s8.bf16 %v2498_v54 }
 0x426   :  { %2109 = vmatpush1.bf16.msra.mxu0 %v1445_v56  ;;  %v2506_v56 = vld [vmem:[#allocation9 + $0x48] sm:$0xff] }
 0x427   :  { %2195 = vmatpush1.bf16.msra.mxu1 %v1447_v57  ;;  %2110 = vmatprep.subr.bf16.mxu0 %v1462_v58  ;;  %v2563_v57 = vunpack.c.l.s8.bf16 %v2498_v54  ;;  %v2579_v58 = vunpack.c.l.s8.bf16 %v2506_v56  ;;  %v2522_v54 = vld [vmem:[#allocation9 + $0xc8] sm:$0xff] }
 0x428   :  { %2196 = vmatprep.subr.bf16.mxu1 %v1464_v59  ;;  %v2588_v59 = vunpack.c.h.s8.bf16 %v2510_v44  ;;  %v2610_v44 = vunpack.c.h.s8.bf16 %v2521_v35  ;;  %v2542_v35 = vld [vmem:[#allocation9 + $0x168] sm:$0xff] }
 0x42a   :  { %2111 = vmatpush1.bf16.msra.mxu0 %v1461_v62  ;;  %v2580_v62 = vunpack.c.h.s8.bf16 %v2506_v56 }
 0x42b   :  { %2197 = vmatpush1.bf16.msra.mxu1 %v1463_v63  ;;  %2112 = vmatprep.subr.bf16.mxu0 %v1478_v47  ;;  %v2499_v63 = vld [vmem:[#allocation9 + $0x10] sm:$0xff] }
 0x42c   :  { %2198 = vmatprep.subr.bf16.mxu1 %v1480_v3  ;;  %v2565_v3 = vunpack.c.l.s8.bf16 %v2499_v63  ;;  %v2566_v16 = vunpack.c.h.s8.bf16 %v2499_v63 }
 0x42e   :  { %2113 = vmatpush1.bf16.msra.mxu0 %v1477_v10  ;;  %v2574_v10 = vunpack.c.h.s8.bf16 %v2503_v60 }
 0x42f   :  { %2199 = vmatpush1.bf16.msra.mxu1 %v1479_v5  ;;  %2114 = vmatprep.subr.bf16.mxu0 %v1494_v6  ;;  %v2504_v6 = vld [vmem:[#allocation9 + $0x38] sm:$0xff] }
 0x430   :  { %2200 = vmatprep.subr.bf16.mxu1 %v1496_v7  ;;  %v2512_v7 = vld [vmem:[#allocation9 + $0x78] sm:$0xff] }
 0x432   :  { %2115 = vmatpush1.bf16.msra.mxu0 %v1493_v13  ;;  %v2575_v13 = vunpack.c.l.s8.bf16 %v2504_v6 }
 0x433   :  { %2201 = vmatpush1.bf16.msra.mxu1 %v1495_v9  ;;  %2116 = vmatprep.subr.bf16.mxu0 %v1510_v14  ;;  %v2500_v9 = vld [vmem:[#allocation9 + $0x18] sm:$0xff]  ;;  %v2591_v14 = vunpack.c.l.s8.bf16 %v2512_v7 }
 0x434   :  { %2202 = vmatprep.subr.bf16.mxu1 %v1512_v20  ;;  %v2567_v20 = vunpack.c.l.s8.bf16 %v2500_v9  ;;  %v2568_v19 = vunpack.c.h.s8.bf16 %v2500_v9  ;;  %v2624_v9 = vunpack.c.h.s8.bf16 %v2528_v2 }
 0x436   :  { %2117 = vmatpush1.bf16.msra.mxu0 %v1509_v27  ;;  %v2576_v27 = vunpack.c.h.s8.bf16 %v2504_v6  ;;  %v2623_v6 = vunpack.c.l.s8.bf16 %v2528_v2 }
 0x437   :  { %2203 = vmatpush1.bf16.msra.mxu1 %v1511_v28  ;;  %2118 = vmatprep.subr.bf16.mxu0 %v1526_v30  ;;  %v2592_v28 = vunpack.c.h.s8.bf16 %v2512_v7  ;;  %v2517_v30 = vld [vmem:[#allocation9 + $0xa0] sm:$0xff]  ;;  %v2524_v7 = vld [vmem:[#allocation9 + $0xd8] sm:$0xff] }
 0x438   :  { %2204 = vmatprep.subr.bf16.mxu1 %v1528_v32  ;;  %v2525_v32 = vld [vmem:[#allocation9 + $0xe0] sm:$0xff] }
 0x43a   :  { %2119 = vmatpush1.bf16.msra.mxu0 %v1525_v33  ;;  %v2601_v33 = vunpack.c.l.s8.bf16 %v2517_v30 }
 0x43b   :  { %2205 = vmatpush1.bf16.msra.mxu1 %v1527_v34  ;;  %3047 = vmatprep.subr.bf16.mxu0 %v2569_v23  ;;  %v2513_v34 = vld [vmem:[#allocation9 + $0x80] sm:$0xff]  ;;  %v2617_v23 = vunpack.c.l.s8.bf16 %v2525_v32 }
 0x43c   :  { %3069 = vmatprep.subr.bf16.mxu1 %v2585_v37  ;;  %v2593_v37 = vunpack.c.l.s8.bf16 %v2513_v34 }
 0x43d   :  { %2121 = vmatmul.mubr.bf16.vlgmr.msra.gmra.mrb[20].mxu0 %v3604_v11 }
 0x43e   :  { %2207 = vmatmul.mubr.bf16.vlgmr.msra.gmra.mrb[20].mxu1 %v3604_v11  ;;  %3048 = vmatpush3.bf16.msra.mxu0 %v2561_v41  ;;  %v2572_v11 = vunpack.c.h.s8.bf16 %v2502_v46  ;;  %v2602_v41 = vunpack.c.h.s8.bf16 %v2517_v30  ;;  %v2526_v46 = vld [vmem:[#allocation9 + $0xe8] sm:$0xff]  ;;  %v2649_v30 = vunpack.c.l.s8.bf16 %v2541_v15 }
 0x43f   :  { %2721 = vmatprep.mubr.bf16.mxu0 %v3668_v0  ;;  %3070 = vmatpush3.bf16.msra.mxu1 %v2577_v42  ;;  %v2511_v0 = vld [vmem:[#allocation9 + $0x70] sm:$0xff]  ;;  %v2518_v42 = vld [vmem:[#allocation9 + $0xa8] sm:$0xff]  ;;  %v2620_v56 = vunpack.c.h.s8.bf16 %v2526_v46 }
 0x440   :  { %2762 = vmatprep.mubr.bf16.mxu1 %v3670_v1  ;;  %3049 = vmatprep.subr.bf16.mxu0 %v2570_v45  ;;  %v2573_v1 = vunpack.c.l.s8.bf16 %v2503_v60  ;;  %v2589_v47 = vunpack.c.l.s8.bf16 %v2511_v0  ;;  %v2590_v5 = vunpack.c.h.s8.bf16 %v2511_v0  ;;  %v2618_v45 = vunpack.c.h.s8.bf16 %v2525_v32  ;;  %v2523_v0 = vld [vmem:[#allocation9 + $0xd0] sm:$0xff]  ;;  %v2537_v32 = vld [vmem:[#allocation9 + $0x140] sm:$0xff] }
 0x441   :  { %3071 = vmatprep.subr.bf16.mxu1 %v2586_v48  ;;  %v2594_v48 = vunpack.c.h.s8.bf16 %v2513_v34  ;;  %v2650_v34 = vunpack.c.h.s8.bf16 %v2541_v15 }
 0x442   :  { %3050 = vmatpush3.bf16.msra.mxu0 %v2562_v49  ;;  %v2603_v49 = vunpack.c.l.s8.bf16 %v2518_v42 }
 0x443   :  { %3072 = vmatpush3.bf16.msra.mxu1 %v2578_v50  ;;  %3051 = vmatprep.subr.bf16.mxu0 %v2571_v51  ;;  %v2514_v50 = vld [vmem:[#allocation9 + $0x88] sm:$0xff]  ;;  %v2619_v51 = vunpack.c.l.s8.bf16 %v2526_v46 }
 0x444   :  { %3073 = vmatprep.subr.bf16.mxu1 %v2587_v55  ;;  %v2611_v55 = vunpack.c.l.s8.bf16 %v2522_v54  ;;  %v2538_v46 = vld [vmem:[#allocation9 + $0x148] sm:$0xff] }
 0x446   :  { %3052 = vmatpush3.bf16.msra.mxu0 %v2563_v57  ;;  %v2519_v57 = vld [vmem:[#allocation9 + $0xb0] sm:$0xff] }
 0x447   :  { %3074 = vmatpush3.bf16.msra.mxu1 %v2579_v58  ;;  %3053 = vmatprep.subr.bf16.mxu0 %v2572_v11  ;;  %v2596_v58 = vunpack.c.h.s8.bf16 %v2514_v50  ;;  %v2612_v11 = vunpack.c.h.s8.bf16 %v2522_v54  ;;  %v2644_v54 = vunpack.c.h.s8.bf16 %v2538_v46 }
 0x448   :  { %3075 = vmatprep.subr.bf16.mxu1 %v2588_v59  ;;  %v2515_v59 = vld [vmem:[#allocation9 + $0x90] sm:$0xff] }
 0x44a   :  { %3054 = vmatpush3.bf16.msra.mxu0 %v2564_v61  ;;  %v2597_v61 = vunpack.c.l.s8.bf16 %v2515_v59 }
 0x44b   :  { %3076 = vmatpush3.bf16.msra.mxu1 %v2580_v62  ;;  %3055 = vmatprep.subr.bf16.mxu0 %v2573_v1  ;;  %v2613_v62 = vunpack.c.l.s8.bf16 %v2523_v0  ;;  %v2606_v1 = vunpack.c.h.s8.bf16 %v2519_v57 }
 0x44c   :  { %3077 = vmatprep.subr.bf16.mxu1 %v2589_v47  ;;  %v2520_v47 = vld [vmem:[#allocation9 + $0xb8] sm:$0xff] }
 0x44e   :  { %3056 = vmatpush3.bf16.msra.mxu0 %v2565_v3  ;;  %v2598_v3 = vunpack.c.h.s8.bf16 %v2515_v59 }
 0x44f   :  { %3078 = vmatpush3.bf16.msra.mxu1 %v2581_v4  ;;  %3057 = vmatprep.subr.bf16.mxu0 %v2574_v10  ;;  %v2614_v4 = vunpack.c.h.s8.bf16 %v2523_v0  ;;  %v2607_v10 = vunpack.c.l.s8.bf16 %v2520_v47 }
 0x450   :  { %3079 = vmatprep.subr.bf16.mxu1 %v2590_v5  ;;  %v2516_v5 = vld [vmem:[#allocation9 + $0x98] sm:$0xff] }
 0x452   :  { %3058 = vmatpush3.bf16.msra.mxu0 %v2566_v16  ;;  %v2599_v16 = vunpack.c.l.s8.bf16 %v2516_v5 }
 0x453   :  { %3080 = vmatpush3.bf16.msra.mxu1 %v2582_v8  ;;  %3059 = vmatprep.subr.bf16.mxu0 %v2575_v13  ;;  %v2615_v8 = vunpack.c.l.s8.bf16 %v2524_v7  ;;  %v2608_v13 = vunpack.c.h.s8.bf16 %v2520_v47  ;;  %v3756_v47 = vld [vmem:[#allocation9 + $0x118] sm:$0xff] }
 0x454   :  { %3081 = vmatprep.subr.bf16.mxu1 %v2591_v14  ;;  %v2533_v14 = vld [vmem:[#allocation9 + $0x120] sm:$0xff]  ;;  %v2631_v15 = vunpack.c.l.s8.bf16 %v3756_v47 }
 0x456   :  { %3060 = vmatpush3.bf16.msra.mxu0 %v2567_v20  ;;  %v2600_v20 = vunpack.c.h.s8.bf16 %v2516_v5  ;;  %v3762_v5 = vld [vmem:[#allocation9 + $0x158] sm:$0xff] }
 0x457   :  { %3082 = vmatpush3.bf16.msra.mxu1 %v2583_v18  ;;  %3061 = vmatprep.subr.bf16.mxu0 %v2576_v27  ;;  %v2616_v18 = vunpack.c.h.s8.bf16 %v2524_v7  ;;  %v2633_v27 = vunpack.c.l.s8.bf16 %v2533_v14 }
 0x458   :  { %3083 = vmatprep.subr.bf16.mxu1 %v2592_v28  ;;  %v2529_v28 = vld [vmem:[#allocation9 + $0x100] sm:$0xff] }
 0x45a   :  { %3062 = vmatpush3.bf16.msra.mxu0 %v2568_v19  ;;  %v2625_v19 = vunpack.c.l.s8.bf16 %v2529_v28 }
 0x45b   :  { %3084 = vmatpush3.bf16.msra.mxu1 %v2584_v25  ;;  %3091 = vmatprep.subr.bf16.mxu0 %v2601_v33  ;;  %v2641_v25 = vunpack.c.l.s8.bf16 %v2537_v32  ;;  %v2634_v33 = vunpack.c.h.s8.bf16 %v2533_v14 }
 0x45c   :  { %3113 = vmatprep.subr.bf16.mxu1 %v2617_v23  ;;  %v2534_v23 = vld [vmem:[#allocation9 + $0x128] sm:$0xff] }
 0x45d   :  { %2722 = vmatmul.mubr.bf16.vlgmr.msra.gmra.mrb[24].mxu0 %v3664_v52  ;;  %v2595_v52 = vunpack.c.l.s8.bf16 %v2514_v50  ;;  %v2535_v50 = vld [vmem:[#allocation9 + $0x130] sm:$0xff] }
 0x45e   :  { %2763 = vmatmul.mubr.bf16.vlgmr.msra.gmra.mrb[24].mxu1 %v3666_v53  ;;  %3092 = vmatpush3.bf16.msra.mxu0 %v2593_v37  ;;  %v2604_v53 = vunpack.c.h.s8.bf16 %v2518_v42  ;;  %v2626_v37 = vunpack.c.h.s8.bf16 %v2529_v28  ;;  %v2530_v42 = vld [vmem:[#allocation9 + $0x108] sm:$0xff] }
 0x45f   :  { %2803 = vmatprep.mubr.bf16.mxu0 %v3724_v40  ;;  %3114 = vmatpush3.bf16.msra.mxu1 %v2609_v39  ;;  %v2527_v40 = vld [vmem:[#allocation9 + $0xf0] sm:$0xff]  ;;  %v2642_v39 = vunpack.c.h.s8.bf16 %v2537_v32 }
 0x460   :  { %2844 = vmatprep.mubr.bf16.mxu1 %v3726_v43  ;;  %3093 = vmatprep.subr.bf16.mxu0 %v2602_v41  ;;  %v2605_v43 = vunpack.c.l.s8.bf16 %v2519_v57  ;;  %v2621_v60 = vunpack.c.l.s8.bf16 %v2527_v40  ;;  %v2622_v63 = vunpack.c.h.s8.bf16 %v2527_v40  ;;  %v2635_v41 = vunpack.c.l.s8.bf16 %v2534_v23  ;;  %v3741_v40 = vld [vmem:[%s3812_s8 + $0x8] sm:$0xff] }
 0x461   :  { %3115 = vmatprep.subr.bf16.mxu1 %v2618_v45  ;;  %v2651_v45 = vunpack.c.l.s8.bf16 %v2542_v35  ;;  %v2256_v0 = vrot.slane %v3741_v40, %v3554_v24 }
 0x462   :  { %3094 = vmatpush3.bf16.msra.mxu0 %v2594_v48  ;;  %v2627_v48 = vunpack.c.l.s8.bf16 %v2530_v42 }
 0x463   :  { %3116 = vmatpush3.bf16.msra.mxu1 %v2610_v44  ;;  %3095 = vmatprep.subr.bf16.mxu0 %v2603_v49  ;;  %v2643_v44 = vunpack.c.l.s8.bf16 %v2538_v46  ;;  %v2636_v49 = vunpack.c.h.s8.bf16 %v2534_v23 }
 0x464   :  { %3117 = vmatprep.subr.bf16.mxu1 %v2619_v51  ;;  %v2628_v51 = vunpack.c.h.s8.bf16 %v2530_v42  ;;  %v2557_v42 = vld [vmem:[#allocation9 + $0x1e0] sm:$0xff] }
 0x466   :  { %3096 = vmatpush3.bf16.msra.mxu0 %v2595_v52  ;;  %v2637_v52 = vunpack.c.l.s8.bf16 %v2535_v50 }
 0x467   :  { %3118 = vmatpush3.bf16.msra.mxu1 %v2611_v55  ;;  %3097 = vmatprep.subr.bf16.mxu0 %v2604_v53  ;;  %v2531_v55 = vld [vmem:[#allocation9 + $0x110] sm:$0xff] }
 0x468   :  { %3119 = vmatprep.subr.bf16.mxu1 %v2620_v56  ;;  %v2539_v56 = vld [vmem:[#allocation9 + $0x150] sm:$0xff]  ;;  %v2629_v57 = vunpack.c.l.s8.bf16 %v2531_v55 }
 0x46a   :  { %3098 = vmatpush3.bf16.msra.mxu0 %v2596_v58  ;;  %v2645_v58 = vunpack.c.l.s8.bf16 %v2539_v56 }
 0x46b   :  { %3120 = vmatpush3.bf16.msra.mxu1 %v2612_v11  ;;  %3099 = vmatprep.subr.bf16.mxu0 %v2605_v43  ;;  %v2638_v11 = vunpack.c.h.s8.bf16 %v2535_v50  ;;  %v3746_v43 = vld [vmem:[%s3813_s9 + $0x8] sm:$0xff]  ;;  %v2648_v50 = vunpack.c.h.s8.bf16 %v3762_v5 }
 0x46c   :  { %3121 = vmatprep.subr.bf16.mxu1 %v2621_v60  ;;  %v2536_v60 = vld [vmem:[#allocation9 + $0x138] sm:$0xff]  ;;  %v2372_v2 = vrot.slane %v3746_v43, %v3554_v24  ;;  %v2380_v7 = vrot.slane %v3746_v43, %v3564_v29  ;;  %v2384_v14 = vrot.slane %v3746_v43, %v3568_v31 }
 0x46e   :  { %3100 = vmatpush3.bf16.msra.mxu0 %v2597_v61  ;;  %v3750_v61 = vld [vmem:[#allocation9 + $0x178] sm:$0xff] }
 0x46f   :  { %3122 = vmatpush3.bf16.msra.mxu1 %v2613_v62  ;;  %3101 = vmatprep.subr.bf16.mxu0 %v2606_v1  ;;  %v2264_v62 = vrot.slane %v3741_v40, %v3564_v29  ;;  %v2260_v1 = vrot.slane %v3741_v40, %v3557_v26  ;;  %v2647_v29 = vunpack.c.l.s8.bf16 %v3762_v5  ;;  %v2558_v5 = vld [vmem:[#allocation9 + $0x1e8] sm:$0xff] }
 0x470   :  { %3123 = vmatprep.subr.bf16.mxu1 %v2622_v63  ;;  %v2630_v63 = vunpack.c.h.s8.bf16 %v2531_v55  ;;  %v2681_v55 = vunpack.c.l.s8.bf16 %v2557_v42 }
 0x472   :  { %3102 = vmatpush3.bf16.msra.mxu0 %v2598_v3  ;;  %v2268_v3 = vrot.slane %v3741_v40, %v3568_v31  ;;  %v2549_v31 = vld [vmem:[#allocation9 + $0x1a0] sm:$0xff] }
 0x473   :  { %3124 = vmatpush3.bf16.msra.mxu1 %v2614_v4  ;;  %3103 = vmatprep.subr.bf16.mxu0 %v2607_v10  ;;  %v2646_v4 = vunpack.c.h.s8.bf16 %v2539_v56  ;;  %v2639_v10 = vunpack.c.l.s8.bf16 %v2536_v60 }
 0x474   :  { %3125 = vmatprep.subr.bf16.mxu1 %v2623_v6 }
 0x476   :  { %3104 = vmatpush3.bf16.msra.mxu0 %v2599_v16  ;;  %v2376_v16 = vrot.slane %v3746_v43, %v3557_v26 }
 0x477   :  { %3126 = vmatpush3.bf16.msra.mxu1 %v2615_v8  ;;  %3105 = vmatprep.subr.bf16.mxu0 %v2608_v13  ;;  %v2655_v8 = vunpack.c.l.s8.bf16 %v3750_v61 }
 0x478   :  { %3127 = vmatprep.subr.bf16.mxu1 %v2624_v9 }
 0x47a   :  { %3106 = vmatpush3.bf16.msra.mxu0 %v2600_v20 }
 0x47b   :  { %3128 = vmatpush3.bf16.msra.mxu1 %v2616_v18  ;;  %3135 = vmatprep.subr.bf16.mxu0 %v2633_v27 }
 0x47c   :  { %3157 = vmatprep.subr.bf16.mxu1 %v2649_v30  ;;  %v2640_v30 = vunpack.c.h.s8.bf16 %v2536_v60 }
 0x47d   :  { %2804 = vmatmul.mubr.bf16.vlgmr.msra.gmra.mrb[28].mxu0 %v3720_v36  ;;  %v2652_v36 = vunpack.c.h.s8.bf16 %v2542_v35 }
 0x47e   :  { %2845 = vmatmul.mubr.bf16.vlgmr.msra.gmra.mrb[28].mxu1 %v3722_v38  ;;  %3136 = vmatpush3.bf16.msra.mxu0 %v2625_v19  ;;  %v2543_v38 = vld [vmem:[#allocation9 + $0x170] sm:$0xff] }
 0x47f   :  { %3158 = vmatpush3.bf16.msra.mxu1 %v2641_v25  ;;  %3137 = vmatprep.subr.bf16.mxu0 %v2634_v33  ;;  %v2653_v53 = vunpack.c.l.s8.bf16 %v2543_v38  ;;  %v2654_v59 = vunpack.c.h.s8.bf16 %v2543_v38  ;;  %v2665_v38 = vunpack.c.l.s8.bf16 %v2549_v31 }
 0x480   :  { %3159 = vmatprep.subr.bf16.mxu1 %v2650_v34  ;;  %v2656_v34 = vunpack.c.h.s8.bf16 %v3750_v61 }
 0x482   :  { %3138 = vmatpush3.bf16.msra.mxu0 %v2626_v37 }
 0x483   :  { %3160 = vmatpush3.bf16.msra.mxu1 %v2642_v39  ;;  %3139 = vmatprep.subr.bf16.mxu0 %v2635_v41 }
 0x484   :  { %3161 = vmatprep.subr.bf16.mxu1 %v2651_v45 }
 0x486   :  { %3140 = vmatpush3.bf16.msra.mxu0 %v2627_v48 }
 0x487   :  { %3162 = vmatpush3.bf16.msra.mxu1 %v2643_v44  ;;  %3141 = vmatprep.subr.bf16.mxu0 %v2636_v49  ;;  %v2632_v44 = vunpack.c.h.s8.bf16 %v3756_v47 }
 0x488   :  { %3163 = vmatprep.subr.bf16.mxu1 %v2652_v36 }
 0x48a   :  { %3142 = vmatpush3.bf16.msra.mxu0 %v2628_v51 }
 0x48b   :  { %3164 = vmatpush3.bf16.msra.mxu1 %v2644_v54  ;;  %3143 = vmatprep.subr.bf16.mxu0 %v2637_v52 }
 0x48c   :  { %3165 = vmatprep.subr.bf16.mxu1 %v2653_v53  ;;  %v2545_v53 = vld [vmem:[#allocation9 + $0x180] sm:$0xff] }
 0x48e   :  { %3144 = vmatpush3.bf16.msra.mxu0 %v2629_v57 }
 0x48f   :  { %3166 = vmatpush3.bf16.msra.mxu1 %v2645_v58  ;;  %3145 = vmatprep.subr.bf16.mxu0 %v2638_v11 }
 0x490   :  { %v1950_v6 = vpop.f32.mrb[16].mxu0  ;;  %3167 = vmatprep.subr.bf16.mxu1 %v2654_v59  ;;  %v2553_v59 = vld [vmem:[#allocation9 + $0x1c0] sm:$0xff] }
 0x491   :  { %v2309_v13 = vmul.f32 %v2256_v0, %v1950_v6  ;;  %v2036_v24 = vpop.f32.mrb[16].mxu1  ;;  %v1952_v9 = vpop.f32.mrb[17].mxu0  ;;  %v2658_v6 = vunpack.c.h.s8.bf16 %v2545_v53 }
 0x492   :  { %v2311_v20 = vmul.f32 %v2264_v62, %v2036_v24  ;;  %v2310_v18 = vmul.f32 %v2260_v1, %v1952_v9  ;;  %v2038_v27 = vpop.f32.mrb[17].mxu1  ;;  %v1954_v28 = vpop.f32.mrb[18].mxu0  ;;  %3146 = vmatpush3.bf16.msra.mxu0 %v2630_v63  ;;  %v2657_v63 = vunpack.c.l.s8.bf16 %v2545_v53  ;;  %v2554_v24 = vld [vmem:[#allocation9 + $0x1c8] sm:$0xff]  ;;  %v2284_v53 = vrot.slane %v3741_v40, %v3690_v22 }
 0x493   :  { %v2425_v26 = vadd.f32 %v2372_v2, %v2309_v13  ;;  %v2312_v32 = vmul.f32 %v2268_v3, %v2038_v27  ;;  %v2325_v19 = vmul.f32 %v2256_v0, %v1954_v28  ;;  %v2040_v25 = vpop.f32.mrb[18].mxu1  ;;  %3168 = vmatpush3.bf16.msra.mxu1 %v2646_v4  ;;  %v1956_v33 = vpop.f32.mrb[19].mxu0  ;;  %3147 = vmatprep.subr.bf16.mxu0 %v2639_v10  ;;  %v2682_v4 = vunpack.c.h.s8.bf16 %v2557_v42  ;;  %v2550_v10 = vld [vmem:[#allocation9 + $0x1a8] sm:$0xff]  ;;  %v2559_v27 = vld [vmem:[#allocation9 + $0x1f0] sm:$0xff]  ;;  %v2548_v42 = vld [vmem:[#allocation9 + $0x198] sm:$0xff] }
 0x494   :  { %v2427_v23 = vadd.f32 %v2380_v7, %v2311_v20  ;;  %v2426_v35 = vadd.f32 %v2376_v16, %v2310_v18  ;;  %v2327_v37 = vmul.f32 %v2264_v62, %v2040_v25  ;;  %v2326_v39 = vmul.f32 %v2260_v1, %v1956_v33  ;;  %v2042_v41 = vpop.f32.mrb[19].mxu1  ;;  %3169 = vmatprep.subr.bf16.mxu1 %v2655_v8  ;;  %v2546_v8 = vld [vmem:[#allocation9 + $0x188] sm:$0xff]  ;;  %v2551_v18 = vld [vmem:[#allocation9 + $0x1b0] sm:$0xff] }
 0x495   :  { %v2428_v45 = vadd.f32 %v2384_v14, %v2312_v32  ;;  %v2441_v46 = vadd.f32 %v2372_v2, %v2325_v19  ;;  %v2328_v48 = vmul.f32 %v2268_v3, %v2042_v41  ;;  %v2457_v51 = vmax.f32 %v2425_v26, 0.0  ;;  %v2547_v26 = vld [vmem:[#allocation9 + $0x190] sm:$0xff] }
 0x496   :  { %v2443_v49 = vadd.f32 %v2380_v7, %v2327_v37  ;;  %v2442_v36 = vadd.f32 %v2376_v16, %v2326_v39  ;;  %3148 = vmatpush3.bf16.msra.mxu0 %v2631_v15  ;;  %v2459_v56 = vmax.f32 %v2427_v23, 0.0  ;;  %v2458_v57 = vmax.f32 %v2426_v35, 0.0  ;;  %v2555_v19 = vld [vmem:[#allocation9 + $0x1d0] sm:$0xff]  ;;  %v2552_v23 = vld [vmem:[#allocation9 + $0x1b8] sm:$0xff] }
 0x497   :  { %v2473_v54 = vmax.f32 %v2441_v46, 0.0  ;;  %v2444_v52 = vadd.f32 %v2384_v14, %v2328_v48  ;;  %3170 = vmatpush3.bf16.msra.mxu1 %v2647_v29  ;;  %3149 = vmatprep.subr.bf16.mxu0 %v2640_v30  ;;  %v2460_v60 = vmax.f32 %v2428_v45, 0.0  ;;  %v2673_v2 = vunpack.c.l.s8.bf16 %v2553_v59  ;;  %v2560_v35 = vld [vmem:[#allocation9 + $0x1f8] sm:$0xff] }
 0x498   :  { %v2475_v58 = vmax.f32 %v2443_v49, 0.0  ;;  %v2474_v11 = vmax.f32 %v2442_v36, 0.0  ;;  %3171 = vmatprep.subr.bf16.mxu1 %v2656_v34  ;;  %v2666_v3 = vunpack.c.h.s8.bf16 %v2549_v31  ;;  %v2674_v7 = vunpack.c.h.s8.bf16 %v2553_v59  ;;  %v2556_v46 = vld [vmem:[#allocation9 + $0x1d8] sm:$0xff] }
 0x499   :  { %v2489_v0 = vpack.c.bf16 %v2473_v54, %v2457_v51  ;;  %v2476_v61 = vmax.f32 %v2444_v52, 0.0  ;;  %v2667_v16 = vunpack.c.l.s8.bf16 %v2550_v10  ;;  %v2683_v13 = vunpack.c.l.s8.bf16 %v2558_v5 }
 0x49a   :  { %v2491_v62 = vpack.c.bf16 %v2475_v58, %v2459_v56  ;;  %3150 = vmatpush3.bf16.msra.mxu0 %v2632_v44  ;;  %v2490_v1 = vpack.c.bf16 %v2474_v11, %v2458_v57  ;;  %v2659_v9 = vunpack.c.l.s8.bf16 %v2546_v8  ;;  %v2675_v14 = vunpack.c.l.s8.bf16 %v2554_v24 }
 0x49b   :  { %3172 = vmatpush3.bf16.msra.mxu1 %v2648_v50  ;;  %v2492_v47 = vpack.c.bf16 %v2476_v61, %v2460_v60  ;;  %3179 = vmatprep.subr.bf16.mxu0 %v2665_v38  ;;  %v2668_v15 = vunpack.c.h.s8.bf16 %v2550_v10  ;;  %v2684_v20 = vunpack.c.h.s8.bf16 %v2558_v5  ;;  %v2660_v28 = vunpack.c.h.s8.bf16 %v2546_v8 }
 0x49c   :  { %2885 = vmatprep.mubr.bf16.mxu0 %v2490_v1  ;;  %3201 = vmatprep.subr.bf16.mxu1 %v2681_v55  ;;  %v2676_v29 = vunpack.c.h.s8.bf16 %v2554_v24  ;;  %v2669_v30 = vunpack.c.l.s8.bf16 %v2551_v18  ;;  %v2685_v32 = vunpack.c.l.s8.bf16 %v2559_v27  ;;  %v2661_v25 = vunpack.c.l.s8.bf16 %v2547_v26 }
 0x49d   :  { %2926 = vmatprep.mubr.bf16.mxu1 %v2492_v47  ;;  %2886 = vmatmul.mubr.bf16.vlgmr.msra.gmra.mrb[32].mxu0 %v2489_v0  ;;  %v2677_v33 = vunpack.c.l.s8.bf16 %v2555_v19  ;;  %v2670_v34 = vunpack.c.h.s8.bf16 %v2551_v18  ;;  %v2686_v31 = vunpack.c.h.s8.bf16 %v2559_v27  ;;  %v2662_v37 = vunpack.c.h.s8.bf16 %v2547_v26 }
 0x49e   :  { %2927 = vmatmul.mubr.bf16.vlgmr.msra.gmra.mrb[32].mxu1 %v2491_v62  ;;  %3180 = vmatpush3.bf16.msra.mxu0 %v2657_v63  ;;  %v2678_v39 = vunpack.c.h.s8.bf16 %v2555_v19  ;;  %v2671_v41 = vunpack.c.l.s8.bf16 %v2552_v23  ;;  %v2687_v45 = vunpack.c.l.s8.bf16 %v2560_v35  ;;  %v2663_v48 = vunpack.c.l.s8.bf16 %v2548_v42 }
 0x49f   :  { %3202 = vmatpush3.bf16.msra.mxu1 %v2673_v2  ;;  %3181 = vmatprep.subr.bf16.mxu0 %v2666_v3  ;;  %v2679_v44 = vunpack.c.l.s8.bf16 %v2556_v46  ;;  %v2672_v49 = vunpack.c.h.s8.bf16 %v2552_v23  ;;  %v2688_v36 = vunpack.c.h.s8.bf16 %v2560_v35  ;;  %v2664_v50 = vunpack.c.h.s8.bf16 %v2548_v42 }
 0x4a0   :  { %3203 = vmatprep.subr.bf16.mxu1 %v2682_v4  ;;  %v2680_v38 = vunpack.c.h.s8.bf16 %v2556_v46  ;;  %v2272_v51 = vrot.slane %v3741_v40, %v3681_v17  ;;  %v2280_v54 = vrot.slane %v3741_v40, %v3684_v12  ;;  %v2276_v52 = vrot.slane %v3741_v40, %v3687_v21 }
 0x4a1   :  { %v2388_v55 = vrot.slane %v3746_v43, %v3681_v17  ;;  %v2396_v57 = vrot.slane %v3746_v43, %v3684_v12  ;;  %v2392_v58 = vrot.slane %v3746_v43, %v3687_v21  ;;  %v2400_v0 = vrot.slane %v3746_v43, %v3690_v22 }
 0x4a2   :  { %3182 = vmatpush3.bf16.msra.mxu0 %v2658_v6 }
 0x4a3   :  { %3204 = vmatpush3.bf16.msra.mxu1 %v2674_v7  ;;  %3183 = vmatprep.subr.bf16.mxu0 %v2667_v16 }
 0x4a4   :  { %3205 = vmatprep.subr.bf16.mxu1 %v2683_v13 }
 0x4a6   :  { %3184 = vmatpush3.bf16.msra.mxu0 %v2659_v9 }
 0x4a7   :  { %3206 = vmatpush3.bf16.msra.mxu1 %v2675_v14  ;;  %3185 = vmatprep.subr.bf16.mxu0 %v2668_v15 }
 0x4a8   :  { %3207 = vmatprep.subr.bf16.mxu1 %v2684_v20 }
 0x4aa   :  { %3186 = vmatpush3.bf16.msra.mxu0 %v2660_v28 }
 0x4ab   :  { %3208 = vmatpush3.bf16.msra.mxu1 %v2676_v29  ;;  %3187 = vmatprep.subr.bf16.mxu0 %v2669_v30 }
 0x4ac   :  { %3209 = vmatprep.subr.bf16.mxu1 %v2685_v32 }
 0x4ae   :  { %3188 = vmatpush3.bf16.msra.mxu0 %v2661_v25 }
 0x4af   :  { %3210 = vmatpush3.bf16.msra.mxu1 %v2677_v33  ;;  %3189 = vmatprep.subr.bf16.mxu0 %v2670_v34 }
 0x4b0   :  { %3211 = vmatprep.subr.bf16.mxu1 %v2686_v31 }
 0x4b2   :  { %3190 = vmatpush3.bf16.msra.mxu0 %v2662_v37 }
 0x4b3   :  { %3212 = vmatpush3.bf16.msra.mxu1 %v2678_v39  ;;  %3191 = vmatprep.subr.bf16.mxu0 %v2671_v41 }
 0x4b4   :  { %3213 = vmatprep.subr.bf16.mxu1 %v2687_v45 }
 0x4b6   :  { %3192 = vmatpush3.bf16.msra.mxu0 %v2663_v48 }
 0x4b7   :  { %3214 = vmatpush3.bf16.msra.mxu1 %v2679_v44  ;;  %3193 = vmatprep.subr.bf16.mxu0 %v2672_v49 }
 0x4b8   :  { %3215 = vmatprep.subr.bf16.mxu1 %v2688_v36 }
 0x4ba   :  { %3194 = vmatpush3.bf16.msra.mxu0 %v2664_v50 }
 0x4bb   :  { %3216 = vmatpush3.bf16.msra.mxu1 %v2680_v38 }
 0x510   :  { %v2122_v56 = vpop.f32.mrb[20].mxu0 }
 0x511   :  { %v2313_v11 = vmul.f32 %v2272_v51, %v2122_v56  ;;  %v2208_v59 = vpop.f32.mrb[20].mxu1  ;;  %v2124_v60 = vpop.f32.mrb[21].mxu0 }
 0x512   :  { %v2315_v61 = vmul.f32 %v2280_v54, %v2208_v59  ;;  %v2314_v62 = vmul.f32 %v2276_v52, %v2124_v60  ;;  %v2210_v1 = vpop.f32.mrb[21].mxu1  ;;  %v2126_v17 = vpop.f32.mrb[22].mxu0 }
 0x513   :  { %v2429_v63 = vadd.f32 %v2388_v55, %v2313_v11  ;;  %v2316_v47 = vmul.f32 %v2284_v53, %v2210_v1  ;;  %v2329_v40 = vmul.f32 %v2272_v51, %v2126_v17  ;;  %v2212_v2 = vpop.f32.mrb[22].mxu1  ;;  %v2128_v3 = vpop.f32.mrb[23].mxu0 }
 0x514   :  { %v2431_v4 = vadd.f32 %v2396_v57, %v2315_v61  ;;  %v2430_v12 = vadd.f32 %v2392_v58, %v2314_v62  ;;  %v2331_v10 = vmul.f32 %v2280_v54, %v2212_v2  ;;  %v2330_v5 = vmul.f32 %v2276_v52, %v2128_v3  ;;  %v2214_v21 = vpop.f32.mrb[23].mxu1 }
 0x515   :  { %v2432_v6 = vadd.f32 %v2400_v0, %v2316_v47  ;;  %v2445_v7 = vadd.f32 %v2388_v55, %v2329_v40  ;;  %v2332_v16 = vmul.f32 %v2284_v53, %v2214_v21  ;;  %v2461_v22 = vmax.f32 %v2429_v63, 0.0 }
 0x516   :  { %v2447_v8 = vadd.f32 %v2396_v57, %v2331_v10  ;;  %v2446_v13 = vadd.f32 %v2392_v58, %v2330_v5  ;;  %v2463_v9 = vmax.f32 %v2431_v4, 0.0  ;;  %v2462_v14 = vmax.f32 %v2430_v12, 0.0 }
 0x517   :  { %v2477_v43 = vmax.f32 %v2445_v7, 0.0  ;;  %v2448_v24 = vadd.f32 %v2400_v0, %v2332_v16  ;;  %v2464_v18 = vmax.f32 %v2432_v6, 0.0 }
 0x518   :  { %v2479_v15 = vmax.f32 %v2447_v8, 0.0  ;;  %v2478_v20 = vmax.f32 %v2446_v13, 0.0 }
 0x519   :  { %v2493_v27 = vpack.c.bf16 %v2477_v43, %v2461_v22  ;;  %v2480_v28 = vmax.f32 %v2448_v24, 0.0 }
 0x51a   :  { %v2495_v29 = vpack.c.bf16 %v2479_v15, %v2463_v9  ;;  %v2494_v30 = vpack.c.bf16 %v2478_v20, %v2462_v14 }
 0x51b   :  { %v2496_v26 = vpack.c.bf16 %v2480_v28, %v2464_v18  ;;  %v3045_v18 = vld [vmem:[%s3815_s11] ss:$0 sm:$0xff] }
 0x51c   :  { %2967 = vmatprep.mubr.bf16.mxu0 %v2494_v30  ;;  %v3046_v30 = vld [vmem:[%s3816_s12] ss:$0 sm:$0xff] }
 0x51d   :  { %3008 = vmatprep.mubr.bf16.mxu1 %v2496_v26  ;;  %2968 = vmatmul.mubr.bf16.vlgmr.msra.gmra.mrb[36].mxu0 %v2493_v27 }
 0x51e   :  { %3009 = vmatmul.mubr.bf16.vlgmr.msra.gmra.mrb[36].mxu1 %v2495_v29 }
 0x530   :  { %v3063_v32 = vpop.f32.mrb[24].mxu0 }
 0x531   :  { %v3085_v19 = vpop.f32.mrb[24].mxu1  ;;  %v3064_v25 = vpop.f32.mrb[25].mxu0 }
 0x532   :  { %v3065_v33 = vadd.f32 %v3064_v25, %v3063_v32  ;;  %v3086_v34 = vpop.f32.mrb[25].mxu1  ;;  %v3066_v31 = vpop.f32.mrb[26].mxu0 }
 0x533   :  { %v3087_v23 = vadd.f32 %v3086_v34, %v3085_v19  ;;  %v3088_v35 = vpop.f32.mrb[26].mxu1  ;;  %v3067_v37 = vpop.f32.mrb[27].mxu0 }
 0x534   :  { %v3068_v39 = vadd.f32 %v3067_v37, %v3066_v31  ;;  %v3089_v41 = vpop.f32.mrb[27].mxu1 }
 0x535   :  { %v2765_v42 = vadd.f32 %v3087_v23, %v3065_v33  ;;  %v3090_v45 = vadd.f32 %v3089_v41, %v3088_v35 }
 0x537   :  { %v2768_v46 = vadd.f32 %v3090_v45, %v3068_v39 }
 0x550   :  { %v3107_v48 = vpop.f32.mrb[28].mxu0 }
 0x551   :  { %v3129_v44 = vpop.f32.mrb[28].mxu1  ;;  %v3108_v49 = vpop.f32.mrb[29].mxu0 }
 0x552   :  { %v3109_v36 = vadd.f32 %v3108_v49, %v3107_v48  ;;  %v3130_v50 = vpop.f32.mrb[29].mxu1  ;;  %v3110_v38 = vpop.f32.mrb[30].mxu0 }
 0x553   :  { %v3131_v51 = vadd.f32 %v3130_v50, %v3129_v44  ;;  %v3132_v54 = vpop.f32.mrb[30].mxu1  ;;  %v3111_v52 = vpop.f32.mrb[31].mxu0 }
 0x554   :  { %v2806_v55 = vadd.f32 %v3109_v36, %v2765_v42  ;;  %v3112_v53 = vadd.f32 %v3111_v52, %v3110_v38  ;;  %v3133_v56 = vpop.f32.mrb[31].mxu1 }
 0x555   :  { %v3134_v57 = vadd.f32 %v3133_v56, %v3132_v54 }
 0x556   :  { %v2847_v58 = vadd.f32 %v3131_v51, %v2806_v55  ;;  %v2809_v11 = vadd.f32 %v3112_v53, %v2768_v46 }
 0x558   :  { %v2850_v59 = vadd.f32 %v3134_v57, %v2809_v11 }
 0x570   :  { %v3151_v60 = vpop.f32.mrb[32].mxu0 }
 0x571   :  { %v3173_v0 = vpop.f32.mrb[32].mxu1  ;;  %v3152_v61 = vpop.f32.mrb[33].mxu0 }
 0x572   :  { %v3153_v62 = vadd.f32 %v3152_v61, %v3151_v60  ;;  %v3174_v1 = vpop.f32.mrb[33].mxu1  ;;  %v3154_v17 = vpop.f32.mrb[34].mxu0 }
 0x573   :  { %v3175_v63 = vadd.f32 %v3174_v1, %v3173_v0  ;;  %v3176_v47 = vpop.f32.mrb[34].mxu1  ;;  %v3155_v40 = vpop.f32.mrb[35].mxu0 }
 0x574   :  { %v2888_v2 = vadd.f32 %v3153_v62, %v2847_v58  ;;  %v3156_v3 = vadd.f32 %v3155_v40, %v3154_v17  ;;  %v3177_v4 = vpop.f32.mrb[35].mxu1 }
 0x575   :  { %v3178_v12 = vadd.f32 %v3177_v4, %v3176_v47 }
 0x576   :  { %v2929_v10 = vadd.f32 %v3175_v63, %v2888_v2  ;;  %v2891_v5 = vadd.f32 %v3156_v3, %v2850_v59 }
 0x578   :  { %v2932_v21 = vadd.f32 %v3178_v12, %v2891_v5 }
 0x5f0   :  { %v3195_v6 = vpop.f32.mrb[36].mxu0 }
 0x5f1   :  { %v3217_v7 = vpop.f32.mrb[36].mxu1  ;;  %v3196_v16 = vpop.f32.mrb[37].mxu0 }
 0x5f2   :  { %v3197_v8 = vadd.f32 %v3196_v16, %v3195_v6  ;;  %v3218_v13 = vpop.f32.mrb[37].mxu1  ;;  %v3198_v22 = vpop.f32.mrb[38].mxu0 }
 0x5f3   :  { %v3219_v43 = vadd.f32 %v3218_v13, %v3217_v7  ;;  %v3220_v24 = vpop.f32.mrb[38].mxu1  ;;  %v3199_v9 = vpop.f32.mrb[39].mxu0 }
 0x5f4   :  { %v2970_v14 = vadd.f32 %v3197_v8, %v2929_v10  ;;  %v3200_v15 = vadd.f32 %v3199_v9, %v3198_v22  ;;  %v3221_v20 = vpop.f32.mrb[39].mxu1 }
 0x5f5   :  { %v3222_v27 = vadd.f32 %v3221_v20, %v3220_v24 }
 0x5f6   :  { %v3011_v28 = vadd.f32 %v3219_v43, %v2970_v14  ;;  %v2973_v29 = vadd.f32 %v3200_v15, %v2932_v21 }
 0x5f8   :  { %v3024_v26 = vmul.f32 %v3045_v18, %v3011_v28  ;;  %v3014_v32 = vadd.f32 %v3222_v27, %v2973_v29 }
 0x5fa   :  { %v3033_v19 = vadd.f32 %v3046_v30, %v3024_v26  ;;  %v3025_v25 = vmul.f32 %v3045_v18, %v3014_v32 }
 0x5fc   :  { %3035 = vst [vmem:[%s3817_s13] sm:$0xff] %v3033_v19  ;;  %v3034_v33 = vadd.f32 %v3046_v30, %v3025_v25 }
 0x5fe   :  { %3036 = vst [vmem:[%s3817_s13 + $0x8] sm:$0xff] %v3034_v33 }
 0x5ff   :  { %3041 = vsyncpa [#allocation3], 1 }
 0x600   :  { %3042 = vsyncpa [#allocation5], 1 }
 0x601   :  { %3043 = vsyncpa [#allocation8], 1 }

</bundles_post_ra>
